<compile_context>
chip_gen: v5e
topology: v5e:2x2
jax: 0.10.0
libtpu: 0.0.40
codegen_flags: <defaults>
</compile_context>

<pallas_src>
import jax
import jax.numpy as jnp
from jax.experimental import pallas as pl
from jax.experimental.pallas import tpu as pltpu


# ----------------------------------------------------------------------------
# helpers
# ----------------------------------------------------------------------------
def _ru(x, m):
    return ((x + m - 1) // m) * m


def _pad2(x, rows, cols):
    r, c = x.shape
    return jnp.pad(x, ((0, rows - r), (0, cols - c)))


# ----------------------------------------------------------------------------
# CompGCN aggregation + fused projection kernel
# ----------------------------------------------------------------------------
def _make_compgcn_kernel(dinp, tm, te, apply_relu):
    def kernel(dst_ref, src_ref, mo_ref, mi_ref, w_ref, b_ref, h_ref, acc_ref):
        k = pl.program_id(1)

        @pl.when(k == 0)
        def _init():
            acc_ref[...] = jnp.zeros_like(acc_ref)

        # Build the 0/1 incidence tiles in-kernel from the per-chunk edge
        # endpoint indices (no [N,E] matrix in HBM).  Values 0/1 are exact in
        # bf16; padded edges carry index -1 and never match.
        row0 = pl.program_id(0) * tm
        rows = jax.lax.broadcasted_iota(jnp.int32, (tm, te), 0) + row0
        sdst = (dst_ref[...] == rows).astype(jnp.bfloat16)   # [tm, te]
        ssrc = (src_ref[...] == rows).astype(jnp.bfloat16)   # [tm, te]

        # bf16 x bf16 MXU matmuls, f32 accumulation.
        acc_ref[:, :dinp] += jnp.dot(sdst, mo_ref[...],
                                     preferred_element_type=jnp.float32)
        acc_ref[:, dinp:] += jnp.dot(ssrc, mi_ref[...],
                                     preferred_element_type=jnp.float32)

        @pl.when(k == pl.num_programs(1) - 1)
        def _finalize():
            # single fused projection: [ho|hi] @ [[0.5 W_O],[0.5 W_I]] + b_fused
            h = jnp.dot(acc_ref[...].astype(jnp.bfloat16), w_ref[...],
                        preferred_element_type=jnp.float32) + b_ref[...]
            if apply_relu:
                h = jnp.maximum(h, 0.0)
            h_ref[...] = h.astype(h_ref.dtype)

    return kernel


def compgcn_layer(src, dst, node_embs, edge_embs, lp, *,
                  apply_relu, compute_he=True, tm=128, te=512):
    """One CompGCN layer. Returns (h [N, Dout], he [E, Dout] or None)."""
    N, _ = node_embs.shape
    E = edge_embs.shape[0]
    Dout = lp["W_O"].shape[1]
    Dinp = lp["w_fused"].shape[0] // 2      # padded in_dim  (multiple of 128)
    Doutp = lp["w_fused"].shape[1]          # padded out_dim (multiple of 128)
    Np, Ep = _ru(N, tm), _ru(E, te)

    # per-edge messages: cheap gathers in the wrapper, cast to bf16 for the MXU
    msg_o = (node_embs[src] - edge_embs).astype(jnp.bfloat16)   # [E, Din]
    msg_i = (node_embs[dst] - edge_embs).astype(jnp.bfloat16)   # [E, Din]
    msg_o = _pad2(msg_o, Ep, Dinp)
    msg_i = _pad2(msg_i, Ep, Dinp)

    # edge endpoint indices, padded with -1 (never matches a node row)
    dst_p = jnp.pad(dst.astype(jnp.int32), (0, Ep - E),
                    constant_values=-1).reshape(1, Ep)
    src_p = jnp.pad(src.astype(jnp.int32), (0, Ep - E),
                    constant_values=-1).reshape(1, Ep)

    h = pl.pallas_call(
        _make_compgcn_kernel(Dinp, tm, te, apply_relu),
        grid=(Np // tm, Ep // te),
        in_specs=[
            pl.BlockSpec((1, te), lambda i, k: (0, k)),            # dst indices
            pl.BlockSpec((1, te), lambda i, k: (0, k)),            # src indices
            pl.BlockSpec((te, Dinp), lambda i, k: (k, 0)),         # msg_o (bf16)
            pl.BlockSpec((te, Dinp), lambda i, k: (k, 0)),         # msg_i (bf16)
            pl.BlockSpec((2 * Dinp, Doutp), lambda i, k: (0, 0)),  # W_fused bf16
            pl.BlockSpec((1, Doutp), lambda i, k: (0, 0)),         # b_fused f32
        ],
        out_specs=pl.BlockSpec((tm, Doutp), lambda i, k: (i, 0)),
        out_shape=jax.ShapeDtypeStruct((Np, Doutp), jnp.float32),
        scratch_shapes=[pltpu.VMEM((tm, 2 * Dinp), jnp.float32)],
        compiler_params=pltpu.CompilerParams(
            dimension_semantics=("parallel", "arbitrary"),
            vmem_limit_bytes=48 * 1024 * 1024),
    )(dst_p, src_p, msg_o, msg_i, lp["w_fused"], lp["b_fused"])
    h = h[:N, :Dout]

    he = None
    if compute_he:
        he = linear(edge_embs, lp["W_rel"], lp["b_rel"], apply_relu=apply_relu)
    return h, he


# ----------------------------------------------------------------------------
# generic tiled linear kernel: y = x @ W + b (optionally ReLU), bf16 operands
# ----------------------------------------------------------------------------
def _make_linear_kernel(apply_relu):
    def kernel(x_ref, w_ref, b_ref, y_ref):
        y = jnp.dot(x_ref[...], w_ref[...],
                    preferred_element_type=jnp.float32) + b_ref[...]
        if apply_relu:
            y = jnp.maximum(y, 0.0)
        y_ref[...] = y.astype(y_ref.dtype)
    return kernel


def linear(x, W, b, *, apply_relu=False, tr=128):
    R, K = x.shape
    Dout = W.shape[1]
    Rp, Kp, Dp = _ru(R, tr), _ru(K, 128), _ru(Dout, 128)
    xp = _pad2(x.astype(jnp.bfloat16), Rp, Kp)
    Wp = _pad2(W, Kp, Dp).astype(jnp.bfloat16)
    bp = _pad2(b.reshape(1, -1).astype(jnp.float32), 1, Dp)

    y = pl.pallas_call(
        _make_linear_kernel(apply_relu),
        grid=(Rp // tr,),
        in_specs=[
            pl.BlockSpec((tr, Kp), lambda i: (i, 0)),
            pl.BlockSpec((Kp, Dp), lambda i: (0, 0)),
            pl.BlockSpec((1, Dp), lambda i: (0, 0)),
        ],
        out_specs=pl.BlockSpec((tr, Dp), lambda i: (i, 0)),
        out_shape=jax.ShapeDtypeStruct((Rp, Dp), jnp.float32),
        compiler_params=pltpu.CompilerParams(
            dimension_semantics=("parallel",),
            vmem_limit_bytes=32 * 1024 * 1024),
    )(xp, Wp, bp)
    return y[:R, :Dout]


# ----------------------------------------------------------------------------
# fused graph readout + concept encoder + logits kernel:
#   hg = R @ hn ;  c = relu(cep @ W1 + b1) @ W2 + b2 ;  logits = hg @ c^T
# ----------------------------------------------------------------------------
def _readout_cep_logits_kernel(r_ref, h_ref, cep_ref, w1_ref, b1_ref,
                               w2_ref, b2_ref, out_ref):
    hg = jnp.dot(r_ref[...], h_ref[...], preferred_element_type=jnp.float32)
    c = jnp.dot(cep_ref[...], w1_ref[...],
                preferred_element_type=jnp.float32) + b1_ref[...]
    c = jnp.maximum(c, 0.0)
    c = jnp.dot(c.astype(jnp.bfloat16), w2_ref[...],
                preferred_element_type=jnp.float32) + b2_ref[...]
    # logits = hg @ c^T, contracting the feature dim (no explicit transpose)
    out_ref[...] = jax.lax.dot_general(
        hg, c, dimension_numbers=(((1,), (1,)), ((), ())),
        preferred_element_type=jnp.float32).astype(out_ref.dtype)


def readout_cep_logits(R, hn, cep_embs, w1, b1, w2, b2):
    G, N = R.shape
    C, D = cep_embs.shape
    Dmid, Dout = w1.shape[1], w2.shape[1]
    Gp, Np_ = _ru(G, 8), _ru(N, 128)
    Dp, Dmp, Dop, Cp = _ru(D, 128), _ru(Dmid, 128), _ru(Dout, 128), _ru(C, 128)

    Rp = _pad2(R.astype(jnp.float32), Gp, Np_)
    hp = _pad2(hn.astype(jnp.float32), Np_, Dop)
    cp = _pad2(cep_embs.astype(jnp.bfloat16), Cp, Dp)
    w1p = _pad2(w1, Dp, Dmp).astype(jnp.bfloat16)
    b1p = _pad2(b1.reshape(1, -1).astype(jnp.float32), 1, Dmp)
    w2p = _pad2(w2, Dmp, Dop).astype(jnp.bfloat16)
    b2p = _pad2(b2.reshape(1, -1).astype(jnp.float32), 1, Dop)

    full = lambda shp: pl.BlockSpec(shp, lambda i: (0,) * len(shp))
    out = pl.pallas_call(
        _readout_cep_logits_kernel,
        grid=(1,),
        in_specs=[full((Gp, Np_)), full((Np_, Dop)), full((Cp, Dp)),
                  full((Dp, Dmp)), full((1, Dmp)),
                  full((Dmp, Dop)), full((1, Dop))],
        out_specs=full((Gp, Cp)),
        out_shape=jax.ShapeDtypeStruct((Gp, Cp), jnp.float32),
        compiler_params=pltpu.CompilerParams(
            dimension_semantics=("arbitrary",),
            vmem_limit_bytes=32 * 1024 * 1024),
    )(Rp, hp, cp, w1p, b1p, w2p, b2p)
    return out[:G, :C]


# ----------------------------------------------------------------------------
# parameters
# ----------------------------------------------------------------------------
def init_linear(key, in_dim, out_dim):
    """nn.Linear-style init; returns W pre-transposed [in, out] and b [out]."""
    k = 1.0 / jnp.sqrt(in_dim)
    kw, kb = jax.random.split(key)
    w = jax.random.uniform(kw, (out_dim, in_dim), jnp.float32, -k, k)
    b = jax.random.uniform(kb, (out_dim,), jnp.float32, -k, k)
    return w.T, b


def init_compgcn_params(key, in_dim, out_dim):
    kO, kI, kR = jax.random.split(key, 3)
    W_O, b_O = init_linear(kO, in_dim, out_dim)
    W_I, b_I = init_linear(kI, in_dim, out_dim)
    W_rel, b_rel = init_linear(kR, in_dim, out_dim)
    # Fused + padded projection prepared ONCE at init time (bf16 for the MXU):
    #   h = [ho|hi] @ [[0.5 W_O],[0.5 W_I]] + 0.5*(b_O + b_I)
    Dinp, Doutp = _ru(in_dim, 128), _ru(out_dim, 128)
    w_fused = jnp.concatenate([_pad2(0.5 * W_O, Dinp, Doutp),
                               _pad2(0.5 * W_I, Dinp, Doutp)],
                              axis=0).astype(jnp.bfloat16)
    b_fused = _pad2((0.5 * (b_O + b_I)).reshape(1, -1), 1, Doutp)
    return dict(W_O=W_O, b_O=b_O, W_I=W_I, b_I=b_I, W_rel=W_rel, b_rel=b_rel,
                w_fused=w_fused, b_fused=b_fused)


# ----------------------------------------------------------------------------
# TaxoRelCGC forward
# ----------------------------------------------------------------------------
def build_readout_matrix(node_seg, n_graphs, op):
    r = jax.nn.one_hot(node_seg, n_graphs, dtype=jnp.float32).T    # [G, N]
    if op == "mean":
        r = r / jnp.maximum(r.sum(axis=1, keepdims=True), 1.0)
    return r


def taxorel_cgc_forward(src, dst, node_seg, node_embs, edge_embs, cep_embs,
                        params, *, n_graphs, g_readout="mean"):
    # Dropout is identity in eval mode.
    hn, he = compgcn_layer(src, dst, node_embs, edge_embs, params["gnn1"],
                           apply_relu=True)                       # relu fused
    # he of gnn2 is never used by TaxoRelCGC -> skip its computation.
    hn, _ = compgcn_layer(src, dst, hn, he, params["gnn2"],
                          apply_relu=False, compute_he=False)
    R = build_readout_matrix(node_seg, n_graphs, g_readout)
    return readout_cep_logits(R, hn, cep_embs,
                              params["cep_w1"], params["cep_b1"],
                              params["cep_w2"], params["cep_b2"])


# ----------------------------------------------------------------------------
# pure-JAX f32 references
# ----------------------------------------------------------------------------
def compgcn_ref(src, dst, x, e, lp):
    N, Din = x.shape
    ho = jnp.zeros((N, Din), jnp.float32).at[dst].add(x[src] - e)
    hi = jnp.zeros((N, Din), jnp.float32).at[src].add(x[dst] - e)
    h = 0.5 * (ho @ lp["W_O"] + lp["b_O"]) + 0.5 * (hi @ lp["W_I"] + lp["b_I"])
    he = e @ lp["W_rel"] + lp["b_rel"]
    return h, he


def taxorel_ref(src, dst, node_seg, node_embs, edge_embs, cep_embs, params, *,
                n_graphs, g_readout="mean"):
    hn, he = compgcn_ref(src, dst, node_embs, edge_embs, params["gnn1"])
    hn, he = jax.nn.relu(hn), jax.nn.relu(he)
    hn, _ = compgcn_ref(src, dst, hn, he, params["gnn2"])
    seg_sum = jax.ops.segment_sum(hn, node_seg, num_segments=n_graphs)
    if g_readout == "mean":
        cnt = jax.ops.segment_sum(jnp.ones((hn.shape[0],), jnp.float32),
                                  node_seg, num_segments=n_graphs)
        hg = seg_sum / jnp.maximum(cnt, 1.0)[:, None]
    else:
        hg = seg_sum
    c = jax.nn.relu(cep_embs @ params["cep_w1"] + params["cep_b1"])
    c = c @ params["cep_w2"] + params["cep_b2"]
    return hg @ c.T


def _relerr(a, b):
    a = a.astype(jnp.float32)
    b = b.astype(jnp.float32)
    return float(jnp.linalg.norm(a - b) / jnp.maximum(jnp.linalg.norm(b), 1e-6))


# ----------------------------------------------------------------------------
# test harness
# ----------------------------------------------------------------------------
if __name__ == "__main__":
    emb_dim = 128
    n_graphs = 2
    nodes_per_graph = (96, 104)
    edges_per_graph = (288, 312)
    n_cep = 50

    key = jax.random.PRNGKey(0)

    # build a batch of 2 small graphs (edges stay within each graph)
    srcs, dsts, segs = [], [], []
    offset = 0
    for g, (ng, eg) in enumerate(zip(nodes_per_graph, edges_per_graph)):
        key, k1, k2 = jax.random.split(key, 3)
        srcs.append(jax.random.randint(k1, (eg,), 0, ng, dtype=jnp.int32) + offset)
        dsts.append(jax.random.randint(k2, (eg,), 0, ng, dtype=jnp.int32) + offset)
        segs.append(jnp.full((ng,), g, jnp.int32))
        offset += ng
    src = jnp.concatenate(srcs)
    dst = jnp.concatenate(dsts)
    node_seg = jnp.concatenate(segs)
    N, E = offset, int(src.shape[0])

    key, kn, ke, kc = jax.random.split(key, 4)
    node_embs = jax.random.normal(kn, (N, emb_dim), jnp.float32)
    edge_embs = jax.random.normal(ke, (E, emb_dim), jnp.float32)
    cep_embs = jax.random.normal(kc, (n_cep, emb_dim), jnp.float32)

    key, kg1, kg2, kc1, kc2 = jax.random.split(key, 5)
    params = {
        "gnn1": init_compgcn_params(kg1, emb_dim, emb_dim // 4),
        "gnn2": init_compgcn_params(kg2, emb_dim // 4, emb_dim),
    }
    w1, b1 = init_linear(kc1, emb_dim, emb_dim // 4)
    w2, b2 = init_linear(kc2, emb_dim // 4, emb_dim)
    params.update(cep_w1=w1, cep_b1=b1, cep_w2=w2, cep_b2=b2)

    # full forward (jit'd; pallas kernels inside)
    fwd = jax.jit(taxorel_cgc_forward, static_argnames=("n_graphs", "g_readout"))
    logits = fwd(src, dst, node_seg, node_embs, edge_embs, cep_embs, params,
                 n_graphs=n_graphs, g_readout="mean")
    jax.block_until_ready(logits)

    # check a single CompGCN layer against the f32 reference (bf16 operands on
    # the MXU, f32 accumulation -> norm-relative error at the ~1e-3..1e-2 level)
    h1, he1 = compgcn_layer(src, dst, node_embs, edge_embs, params["gnn1"],
                            apply_relu=False)
    h1_ref, he1_ref = compgcn_ref(src, dst, node_embs, edge_embs, params["gnn1"])
    assert _relerr(h1, h1_ref) < 3e-2, _relerr(h1, h1_ref)
    assert _relerr(he1, he1_ref) < 2e-2, _relerr(he1, he1_ref)

    # check the full TaxoRelCGC forward
    logits_ref = taxorel_ref(src, dst, node_seg, node_embs, edge_embs, cep_embs,
                             params, n_graphs=n_graphs, g_readout="mean")
    assert logits.shape == (n_graphs, n_cep)
    assert _relerr(logits, logits_ref) < 6e-2, _relerr(logits, logits_ref)

    print("KERNEL_OK")
</pallas_src>

<mosaic_0001>
module attributes {stable_mosaic.version = 11 : i64} {
  func.func @kernel(%arg0: i32, %arg1: i32, %arg2: memref<1x512xi32, #tpu.memory_space<vmem>>, %arg3: memref<1x512xi32, #tpu.memory_space<vmem>>, %arg4: memref<512x128xbf16, #tpu.memory_space<vmem>>, %arg5: memref<512x128xbf16, #tpu.memory_space<vmem>>, %arg6: memref<256x128xbf16, #tpu.memory_space<vmem>>, %arg7: memref<1x128xf32, #tpu.memory_space<vmem>>, %arg8: memref<128x128xf32, #tpu.memory_space<vmem>>, %arg9: memref<128x256xf32, #tpu.memory_space<vmem>>) attributes {dimension_semantics = [#tpu.dimension_semantics<parallel>, #tpu.dimension_semantics<arbitrary>], iteration_bounds = array<i64: 2, 2>, scalar_prefetch = 0 : i64, scratch_operands = 1 : i64, tpu.core_type = #tpu.core_type<tc>, window_params = [{transform_indices = @transform_0, window_bounds = array<i64: 1, 512>}, {transform_indices = @transform_1, window_bounds = array<i64: 1, 512>}, {transform_indices = @transform_2, window_bounds = array<i64: 512, 128>}, {transform_indices = @transform_3, window_bounds = array<i64: 512, 128>}, {pipeline_mode = #tpu.pipeline_mode<synchronous>, transform_indices = @transform_4, window_bounds = array<i64: 256, 128>}, {pipeline_mode = #tpu.pipeline_mode<synchronous>, transform_indices = @transform_5, window_bounds = array<i64: 1, 128>}, {transform_indices = @transform_6, window_bounds = array<i64: 128, 128>}]} {
    %c0_i32 = arith.constant 0 : i32
    %0 = arith.cmpi eq, %arg1, %c0_i32 : i32
    %1 = arith.extui %0 : i1 to i32
    %c0_i32_0 = arith.constant 0 : i32
    %2 = arith.cmpi ne, %1, %c0_i32_0 : i32
    scf.if %2 {
      %cst_17 = arith.constant 0.000000e+00 : f32
      %32 = vector.broadcast %cst_17 : f32 to vector<128x256xf32>
      %c0_18 = arith.constant 0 : index
      %c0_19 = arith.constant 0 : index
      %33 = vector.load %arg9[%c0_18, %c0_19] : memref<128x256xf32, #tpu.memory_space<vmem>>, vector<128x256xf32>
      tpu.vector_store %arg9[%c0_18, %c0_19], %32 {strides = array<i32>} : memref<128x256xf32, #tpu.memory_space<vmem>>, vector<128x256xf32>,
    } else {
    }
    %c128_i32 = arith.constant 128 : i32
    %3 = arith.muli %arg0, %c128_i32 : i32
    %4 = tpu.iota {dimensions = array<i32: 0>} : vector<128x512xi32>
    %5 = vector.broadcast %3 : i32 to vector<128x512xi32>
    %6 = arith.addi %4, %5 : vector<128x512xi32>
    %c0 = arith.constant 0 : index
    %c0_1 = arith.constant 0 : index
    %7 = vector.load %arg2[%c0, %c0_1] : memref<1x512xi32, #tpu.memory_space<vmem>>, vector<1x512xi32>
    %8 = vector.broadcast %7 : vector<1x512xi32> to vector<128x512xi32>
    %9 = arith.cmpi eq, %8, %6 : vector<128x512xi32>
    %10 = arith.extui %9 : vector<128x512xi1> to vector<128x512xi32>
    %11 = arith.sitofp %10 : vector<128x512xi32> to vector<128x512xf32>
    %12 = arith.truncf %11 : vector<128x512xf32> to vector<128x512xbf16>
    %c0_2 = arith.constant 0 : index
    %c0_3 = arith.constant 0 : index
    %13 = vector.load %arg3[%c0_2, %c0_3] : memref<1x512xi32, #tpu.memory_space<vmem>>, vector<1x512xi32>
    %14 = vector.broadcast %13 : vector<1x512xi32> to vector<128x512xi32>
    %15 = arith.cmpi eq, %14, %6 : vector<128x512xi32>
    %16 = arith.extui %15 : vector<128x512xi1> to vector<128x512xi32>
    %17 = arith.sitofp %16 : vector<128x512xi32> to vector<128x512xf32>
    %18 = arith.truncf %17 : vector<128x512xf32> to vector<128x512xbf16>
    %c0_4 = arith.constant 0 : index
    %c0_5 = arith.constant 0 : index
    %19 = vector.load %arg9[%c0_4, %c0_5] : memref<128x256xf32, #tpu.memory_space<vmem>>, vector<128x128xf32>
    %c0_6 = arith.constant 0 : index
    %c0_7 = arith.constant 0 : index
    %20 = vector.load %arg4[%c0_6, %c0_7] : memref<512x128xbf16, #tpu.memory_space<vmem>>, vector<512x128xbf16>
    %cst = arith.constant dense<0.000000e+00> : vector<128x128xf32>
    %21 = tpu.matmul %12, %20, %cst {dimension_numbers = #tpu.dot_dimension_numbers<[1], [0], [0], [1], [0, 0, 1, 1], [], []>} : vector<128x512xbf16>, vector<512x128xbf16>, vector<128x128xf32> -> vector<128x128xf32>
    %22 = arith.addf %19, %21 : vector<128x128xf32>
    %c0_8 = arith.constant 0 : index
    %c0_9 = arith.constant 0 : index
    %23 = vector.load %arg9[%c0_8, %c0_9] : memref<128x256xf32, #tpu.memory_space<vmem>>, vector<128x128xf32>
    tpu.vector_store %arg9[%c0_8, %c0_9], %22 {strides = array<i32>} : memref<128x256xf32, #tpu.memory_space<vmem>>, vector<128x128xf32>,
    %c0_10 = arith.constant 0 : index
    %c128 = arith.constant 128 : index
    %24 = vector.load %arg9[%c0_10, %c128] : memref<128x256xf32, #tpu.memory_space<vmem>>, vector<128x128xf32>
    %c0_11 = arith.constant 0 : index
    %c0_12 = arith.constant 0 : index
    %25 = vector.load %arg5[%c0_11, %c0_12] : memref<512x128xbf16, #tpu.memory_space<vmem>>, vector<512x128xbf16>
    %cst_13 = arith.constant dense<0.000000e+00> : vector<128x128xf32>
    %26 = tpu.matmul %18, %25, %cst_13 {dimension_numbers = #tpu.dot_dimension_numbers<[1], [0], [0], [1], [0, 0, 1, 1], [], []>} : vector<128x512xbf16>, vector<512x128xbf16>, vector<128x128xf32> -> vector<128x128xf32>
    %27 = arith.addf %24, %26 : vector<128x128xf32>
    %c0_14 = arith.constant 0 : index
    %c128_15 = arith.constant 128 : index
    %28 = vector.load %arg9[%c0_14, %c128_15] : memref<128x256xf32, #tpu.memory_space<vmem>>, vector<128x128xf32>
    tpu.vector_store %arg9[%c0_14, %c128_15], %27 {strides = array<i32>} : memref<128x256xf32, #tpu.memory_space<vmem>>, vector<128x128xf32>,
    %c1_i32 = arith.constant 1 : i32
    %29 = arith.cmpi eq, %arg1, %c1_i32 : i32
    %30 = arith.extui %29 : i1 to i32
    %c0_i32_16 = arith.constant 0 : i32
    %31 = arith.cmpi ne, %30, %c0_i32_16 : i32
    scf.if %31 {
      %c0_17 = arith.constant 0 : index
      %c0_18 = arith.constant 0 : index
      %32 = vector.load %arg9[%c0_17, %c0_18] : memref<128x256xf32, #tpu.memory_space<vmem>>, vector<128x256xf32>
      %33 = arith.truncf %32 : vector<128x256xf32> to vector<128x256xbf16>
      %c0_19 = arith.constant 0 : index
      %c0_20 = arith.constant 0 : index
      %34 = vector.load %arg6[%c0_19, %c0_20] : memref<256x128xbf16, #tpu.memory_space<vmem>>, vector<256x128xbf16>
      %cst_21 = arith.constant dense<0.000000e+00> : vector<128x128xf32>
      %35 = tpu.matmul %33, %34, %cst_21 {dimension_numbers = #tpu.dot_dimension_numbers<[1], [0], [0], [1], [0, 0, 1, 1], [], []>} : vector<128x256xbf16>, vector<256x128xbf16>, vector<128x128xf32> -> vector<128x128xf32>
      %c0_22 = arith.constant 0 : index
      %c0_23 = arith.constant 0 : index
      %36 = vector.load %arg7[%c0_22, %c0_23] : memref<1x128xf32, #tpu.memory_space<vmem>>, vector<1x128xf32>
      %37 = vector.broadcast %36 : vector<1x128xf32> to vector<128x128xf32>
      %38 = arith.addf %35, %37 : vector<128x128xf32>
      %cst_24 = arith.constant 0.000000e+00 : f32
      %39 = vector.broadcast %cst_24 : f32 to vector<128x128xf32>
      %40 = arith.maximumf %38, %39 : vector<128x128xf32>
      %c0_25 = arith.constant 0 : index
      %c0_26 = arith.constant 0 : index
      %41 = vector.load %arg8[%c0_25, %c0_26] : memref<128x128xf32, #tpu.memory_space<vmem>>, vector<128x128xf32>
      tpu.vector_store %arg8[%c0_25, %c0_26], %40 {strides = array<i32>} : memref<128x128xf32, #tpu.memory_space<vmem>>, vector<128x128xf32>,
    } else {
    }
    return
  }
  func.func @transform_0(%arg0: i32, %arg1: i32) -> (i32, i32) {
    %c0_i32 = arith.constant 0 : i32
    %c0_i32_0 = arith.constant 0 : i32
    return %c0_i32, %arg1 : i32, i32
  }
  func.func @transform_1(%arg0: i32, %arg1: i32) -> (i32, i32) {
    %c0_i32 = arith.constant 0 : i32
    %c0_i32_0 = arith.constant 0 : i32
    return %c0_i32, %arg1 : i32, i32
  }
  func.func @transform_2(%arg0: i32, %arg1: i32) -> (i32, i32) {
    %c0_i32 = arith.constant 0 : i32
    %c0_i32_0 = arith.constant 0 : i32
    return %arg1, %c0_i32 : i32, i32
  }
  func.func @transform_3(%arg0: i32, %arg1: i32) -> (i32, i32) {
    %c0_i32 = arith.constant 0 : i32
    %c0_i32_0 = arith.constant 0 : i32
    return %arg1, %c0_i32 : i32, i32
  }
  func.func @transform_4(%arg0: i32, %arg1: i32) -> (i32, i32) {
    %c0_i32 = arith.constant 0 : i32
    %c0_i32_0 = arith.constant 0 : i32
    %c0_i32_1 = arith.constant 0 : i32
    return %c0_i32, %c0_i32_0 : i32, i32
  }
  func.func @transform_5(%arg0: i32, %arg1: i32) -> (i32, i32) {
    %c0_i32 = arith.constant 0 : i32
    %c0_i32_0 = arith.constant 0 : i32
    %c0_i32_1 = arith.constant 0 : i32
    return %c0_i32, %c0_i32_0 : i32, i32
  }
  func.func @transform_6(%arg0: i32, %arg1: i32) -> (i32, i32) {
    %c0_i32 = arith.constant 0 : i32
    %c0_i32_0 = arith.constant 0 : i32
    return %arg0, %c0_i32 : i32, i32
  }
}

module attributes {stable_mosaic.version = 11 : i64} {
  func.func @kernel(%arg0: i32, %arg1: memref<128x128xbf16, #tpu.memory_space<vmem>>, %arg2: memref<128x128xbf16, #tpu.memory_space<vmem>>, %arg3: memref<1x128xf32, #tpu.memory_space<vmem>>, %arg4: memref<128x128xf32, #tpu.memory_space<vmem>>) attributes {dimension_semantics = [#tpu.dimension_semantics<parallel>], iteration_bounds = array<i64: 5>, scalar_prefetch = 0 : i64, scratch_operands = 0 : i64, tpu.core_type = #tpu.core_type<tc>, window_params = [{transform_indices = @transform_0, window_bounds = array<i64: 128, 128>}, {pipeline_mode = #tpu.pipeline_mode<synchronous>, transform_indices = @transform_1, window_bounds = array<i64: 128, 128>}, {pipeline_mode = #tpu.pipeline_mode<synchronous>, transform_indices = @transform_2, window_bounds = array<i64: 1, 128>}, {transform_indices = @transform_3, window_bounds = array<i64: 128, 128>}]} {
    %c0 = arith.constant 0 : index
    %c0_0 = arith.constant 0 : index
    %0 = vector.load %arg1[%c0, %c0_0] : memref<128x128xbf16, #tpu.memory_space<vmem>>, vector<128x128xbf16>
    %c0_1 = arith.constant 0 : index
    %c0_2 = arith.constant 0 : index
    %1 = vector.load %arg2[%c0_1, %c0_2] : memref<128x128xbf16, #tpu.memory_space<vmem>>, vector<128x128xbf16>
    %cst = arith.constant dense<0.000000e+00> : vector<128x128xf32>
    %2 = tpu.matmul %0, %1, %cst {dimension_numbers = #tpu.dot_dimension_numbers<[1], [0], [0], [1], [0, 0, 1, 1], [], []>} : vector<128x128xbf16>, vector<128x128xbf16>, vector<128x128xf32> -> vector<128x128xf32>
    %c0_3 = arith.constant 0 : index
    %c0_4 = arith.constant 0 : index
    %3 = vector.load %arg3[%c0_3, %c0_4] : memref<1x128xf32, #tpu.memory_space<vmem>>, vector<1x128xf32>
    %4 = vector.broadcast %3 : vector<1x128xf32> to vector<128x128xf32>
    %5 = arith.addf %2, %4 : vector<128x128xf32>
    %cst_5 = arith.constant 0.000000e+00 : f32
    %6 = vector.broadcast %cst_5 : f32 to vector<128x128xf32>
    %7 = arith.maximumf %5, %6 : vector<128x128xf32>
    %c0_6 = arith.constant 0 : index
    %c0_7 = arith.constant 0 : index
    %8 = vector.load %arg4[%c0_6, %c0_7] : memref<128x128xf32, #tpu.memory_space<vmem>>, vector<128x128xf32>
    tpu.vector_store %arg4[%c0_6, %c0_7], %7 {strides = array<i32>} : memref<128x128xf32, #tpu.memory_space<vmem>>, vector<128x128xf32>,
    return
  }
  func.func @transform_0(%arg0: i32) -> (i32, i32) {
    %c0_i32 = arith.constant 0 : i32
    %c0_i32_0 = arith.constant 0 : i32
    return %arg0, %c0_i32 : i32, i32
  }
  func.func @transform_1(%arg0: i32) -> (i32, i32) {
    %c0_i32 = arith.constant 0 : i32
    %c0_i32_0 = arith.constant 0 : i32
    %c0_i32_1 = arith.constant 0 : i32
    return %c0_i32, %c0_i32_0 : i32, i32
  }
  func.func @transform_2(%arg0: i32) -> (i32, i32) {
    %c0_i32 = arith.constant 0 : i32
    %c0_i32_0 = arith.constant 0 : i32
    %c0_i32_1 = arith.constant 0 : i32
    return %c0_i32, %c0_i32_0 : i32, i32
  }
  func.func @transform_3(%arg0: i32) -> (i32, i32) {
    %c0_i32 = arith.constant 0 : i32
    %c0_i32_0 = arith.constant 0 : i32
    return %arg0, %c0_i32 : i32, i32
  }
}

module attributes {stable_mosaic.version = 11 : i64} {
  func.func @kernel(%arg0: i32, %arg1: i32, %arg2: memref<1x512xi32, #tpu.memory_space<vmem>>, %arg3: memref<1x512xi32, #tpu.memory_space<vmem>>, %arg4: memref<512x128xbf16, #tpu.memory_space<vmem>>, %arg5: memref<512x128xbf16, #tpu.memory_space<vmem>>, %arg6: memref<256x128xbf16, #tpu.memory_space<vmem>>, %arg7: memref<1x128xf32, #tpu.memory_space<vmem>>, %arg8: memref<128x128xf32, #tpu.memory_space<vmem>>, %arg9: memref<128x256xf32, #tpu.memory_space<vmem>>) attributes {dimension_semantics = [#tpu.dimension_semantics<parallel>, #tpu.dimension_semantics<arbitrary>], iteration_bounds = array<i64: 2, 2>, scalar_prefetch = 0 : i64, scratch_operands = 1 : i64, tpu.core_type = #tpu.core_type<tc>, window_params = [{transform_indices = @transform_0, window_bounds = array<i64: 1, 512>}, {transform_indices = @transform_1, window_bounds = array<i64: 1, 512>}, {transform_indices = @transform_2, window_bounds = array<i64: 512, 128>}, {transform_indices = @transform_3, window_bounds = array<i64: 512, 128>}, {pipeline_mode = #tpu.pipeline_mode<synchronous>, transform_indices = @transform_4, window_bounds = array<i64: 256, 128>}, {pipeline_mode = #tpu.pipeline_mode<synchronous>, transform_indices = @transform_5, window_bounds = array<i64: 1, 128>}, {transform_indices = @transform_6, window_bounds = array<i64: 128, 128>}]} {
    %c0_i32 = arith.constant 0 : i32
    %0 = arith.cmpi eq, %arg1, %c0_i32 : i32
    %1 = arith.extui %0 : i1 to i32
    %c0_i32_0 = arith.constant 0 : i32
    %2 = arith.cmpi ne, %1, %c0_i32_0 : i32
    scf.if %2 {
      %cst_17 = arith.constant 0.000000e+00 : f32
      %32 = vector.broadcast %cst_17 : f32 to vector<128x256xf32>
      %c0_18 = arith.constant 0 : index
      %c0_19 = arith.constant 0 : index
      %33 = vector.load %arg9[%c0_18, %c0_19] : memref<128x256xf32, #tpu.memory_space<vmem>>, vector<128x256xf32>
      tpu.vector_store %arg9[%c0_18, %c0_19], %32 {strides = array<i32>} : memref<128x256xf32, #tpu.memory_space<vmem>>, vector<128x256xf32>,
    } else {
    }
    %c128_i32 = arith.constant 128 : i32
    %3 = arith.muli %arg0, %c128_i32 : i32
    %4 = tpu.iota {dimensions = array<i32: 0>} : vector<128x512xi32>
    %5 = vector.broadcast %3 : i32 to vector<128x512xi32>
    %6 = arith.addi %4, %5 : vector<128x512xi32>
    %c0 = arith.constant 0 : index
    %c0_1 = arith.constant 0 : index
    %7 = vector.load %arg2[%c0, %c0_1] : memref<1x512xi32, #tpu.memory_space<vmem>>, vector<1x512xi32>
    %8 = vector.broadcast %7 : vector<1x512xi32> to vector<128x512xi32>
    %9 = arith.cmpi eq, %8, %6 : vector<128x512xi32>
    %10 = arith.extui %9 : vector<128x512xi1> to vector<128x512xi32>
    %11 = arith.sitofp %10 : vector<128x512xi32> to vector<128x512xf32>
    %12 = arith.truncf %11 : vector<128x512xf32> to vector<128x512xbf16>
    %c0_2 = arith.constant 0 : index
    %c0_3 = arith.constant 0 : index
    %13 = vector.load %arg3[%c0_2, %c0_3] : memref<1x512xi32, #tpu.memory_space<vmem>>, vector<1x512xi32>
    %14 = vector.broadcast %13 : vector<1x512xi32> to vector<128x512xi32>
    %15 = arith.cmpi eq, %14, %6 : vector<128x512xi32>
    %16 = arith.extui %15 : vector<128x512xi1> to vector<128x512xi32>
    %17 = arith.sitofp %16 : vector<128x512xi32> to vector<128x512xf32>
    %18 = arith.truncf %17 : vector<128x512xf32> to vector<128x512xbf16>
    %c0_4 = arith.constant 0 : index
    %c0_5 = arith.constant 0 : index
    %19 = vector.load %arg9[%c0_4, %c0_5] : memref<128x256xf32, #tpu.memory_space<vmem>>, vector<128x128xf32>
    %c0_6 = arith.constant 0 : index
    %c0_7 = arith.constant 0 : index
    %20 = vector.load %arg4[%c0_6, %c0_7] : memref<512x128xbf16, #tpu.memory_space<vmem>>, vector<512x128xbf16>
    %cst = arith.constant dense<0.000000e+00> : vector<128x128xf32>
    %21 = tpu.matmul %12, %20, %cst {dimension_numbers = #tpu.dot_dimension_numbers<[1], [0], [0], [1], [0, 0, 1, 1], [], []>} : vector<128x512xbf16>, vector<512x128xbf16>, vector<128x128xf32> -> vector<128x128xf32>
    %22 = arith.addf %19, %21 : vector<128x128xf32>
    %c0_8 = arith.constant 0 : index
    %c0_9 = arith.constant 0 : index
    %23 = vector.load %arg9[%c0_8, %c0_9] : memref<128x256xf32, #tpu.memory_space<vmem>>, vector<128x128xf32>
    tpu.vector_store %arg9[%c0_8, %c0_9], %22 {strides = array<i32>} : memref<128x256xf32, #tpu.memory_space<vmem>>, vector<128x128xf32>,
    %c0_10 = arith.constant 0 : index
    %c128 = arith.constant 128 : index
    %24 = vector.load %arg9[%c0_10, %c128] : memref<128x256xf32, #tpu.memory_space<vmem>>, vector<128x128xf32>
    %c0_11 = arith.constant 0 : index
    %c0_12 = arith.constant 0 : index
    %25 = vector.load %arg5[%c0_11, %c0_12] : memref<512x128xbf16, #tpu.memory_space<vmem>>, vector<512x128xbf16>
    %cst_13 = arith.constant dense<0.000000e+00> : vector<128x128xf32>
    %26 = tpu.matmul %18, %25, %cst_13 {dimension_numbers = #tpu.dot_dimension_numbers<[1], [0], [0], [1], [0, 0, 1, 1], [], []>} : vector<128x512xbf16>, vector<512x128xbf16>, vector<128x128xf32> -> vector<128x128xf32>
    %27 = arith.addf %24, %26 : vector<128x128xf32>
    %c0_14 = arith.constant 0 : index
    %c128_15 = arith.constant 128 : index
    %28 = vector.load %arg9[%c0_14, %c128_15] : memref<128x256xf32, #tpu.memory_space<vmem>>, vector<128x128xf32>
    tpu.vector_store %arg9[%c0_14, %c128_15], %27 {strides = array<i32>} : memref<128x256xf32, #tpu.memory_space<vmem>>, vector<128x128xf32>,
    %c1_i32 = arith.constant 1 : i32
    %29 = arith.cmpi eq, %arg1, %c1_i32 : i32
    %30 = arith.extui %29 : i1 to i32
    %c0_i32_16 = arith.constant 0 : i32
    %31 = arith.cmpi ne, %30, %c0_i32_16 : i32
    scf.if %31 {
      %c0_17 = arith.constant 0 : index
      %c0_18 = arith.constant 0 : index
      %32 = vector.load %arg9[%c0_17, %c0_18] : memref<128x256xf32, #tpu.memory_space<vmem>>, vector<128x256xf32>
      %33 = arith.truncf %32 : vector<128x256xf32> to vector<128x256xbf16>
      %c0_19 = arith.constant 0 : index
      %c0_20 = arith.constant 0 : index
      %34 = vector.load %arg6[%c0_19, %c0_20] : memref<256x128xbf16, #tpu.memory_space<vmem>>, vector<256x128xbf16>
      %cst_21 = arith.constant dense<0.000000e+00> : vector<128x128xf32>
      %35 = tpu.matmul %33, %34, %cst_21 {dimension_numbers = #tpu.dot_dimension_numbers<[1], [0], [0], [1], [0, 0, 1, 1], [], []>} : vector<128x256xbf16>, vector<256x128xbf16>, vector<128x128xf32> -> vector<128x128xf32>
      %c0_22 = arith.constant 0 : index
      %c0_23 = arith.constant 0 : index
      %36 = vector.load %arg7[%c0_22, %c0_23] : memref<1x128xf32, #tpu.memory_space<vmem>>, vector<1x128xf32>
      %37 = vector.broadcast %36 : vector<1x128xf32> to vector<128x128xf32>
      %38 = arith.addf %35, %37 : vector<128x128xf32>
      %c0_24 = arith.constant 0 : index
      %c0_25 = arith.constant 0 : index
      %39 = vector.load %arg8[%c0_24, %c0_25] : memref<128x128xf32, #tpu.memory_space<vmem>>, vector<128x128xf32>
      tpu.vector_store %arg8[%c0_24, %c0_25], %38 {strides = array<i32>} : memref<128x128xf32, #tpu.memory_space<vmem>>, vector<128x128xf32>,
    } else {
    }
    return
  }
  func.func @transform_0(%arg0: i32, %arg1: i32) -> (i32, i32) {
    %c0_i32 = arith.constant 0 : i32
    %c0_i32_0 = arith.constant 0 : i32
    return %c0_i32, %arg1 : i32, i32
  }
  func.func @transform_1(%arg0: i32, %arg1: i32) -> (i32, i32) {
    %c0_i32 = arith.constant 0 : i32
    %c0_i32_0 = arith.constant 0 : i32
    return %c0_i32, %arg1 : i32, i32
  }
  func.func @transform_2(%arg0: i32, %arg1: i32) -> (i32, i32) {
    %c0_i32 = arith.constant 0 : i32
    %c0_i32_0 = arith.constant 0 : i32
    return %arg1, %c0_i32 : i32, i32
  }
  func.func @transform_3(%arg0: i32, %arg1: i32) -> (i32, i32) {
    %c0_i32 = arith.constant 0 : i32
    %c0_i32_0 = arith.constant 0 : i32
    return %arg1, %c0_i32 : i32, i32
  }
  func.func @transform_4(%arg0: i32, %arg1: i32) -> (i32, i32) {
    %c0_i32 = arith.constant 0 : i32
    %c0_i32_0 = arith.constant 0 : i32
    %c0_i32_1 = arith.constant 0 : i32
    return %c0_i32, %c0_i32_0 : i32, i32
  }
  func.func @transform_5(%arg0: i32, %arg1: i32) -> (i32, i32) {
    %c0_i32 = arith.constant 0 : i32
    %c0_i32_0 = arith.constant 0 : i32
    %c0_i32_1 = arith.constant 0 : i32
    return %c0_i32, %c0_i32_0 : i32, i32
  }
  func.func @transform_6(%arg0: i32, %arg1: i32) -> (i32, i32) {
    %c0_i32 = arith.constant 0 : i32
    %c0_i32_0 = arith.constant 0 : i32
    return %arg0, %c0_i32 : i32, i32
  }
}

module attributes {stable_mosaic.version = 11 : i64} {
  func.func @_readout_cep_logits_kernel(%arg0: i32, %arg1: memref<8x256xf32, #tpu.memory_space<vmem>>, %arg2: memref<256x128xf32, #tpu.memory_space<vmem>>, %arg3: memref<128x128xbf16, #tpu.memory_space<vmem>>, %arg4: memref<128x128xbf16, #tpu.memory_space<vmem>>, %arg5: memref<1x128xf32, #tpu.memory_space<vmem>>, %arg6: memref<128x128xbf16, #tpu.memory_space<vmem>>, %arg7: memref<1x128xf32, #tpu.memory_space<vmem>>, %arg8: memref<8x128xf32, #tpu.memory_space<vmem>>) attributes {dimension_semantics = [#tpu.dimension_semantics<arbitrary>], iteration_bounds = array<i64: 1>, scalar_prefetch = 0 : i64, scratch_operands = 0 : i64, tpu.core_type = #tpu.core_type<tc>, window_params = [{pipeline_mode = #tpu.pipeline_mode<synchronous>, transform_indices = @transform_0, window_bounds = array<i64: 8, 256>}, {pipeline_mode = #tpu.pipeline_mode<synchronous>, transform_indices = @transform_1, window_bounds = array<i64: 256, 128>}, {pipeline_mode = #tpu.pipeline_mode<synchronous>, transform_indices = @transform_2, window_bounds = array<i64: 128, 128>}, {pipeline_mode = #tpu.pipeline_mode<synchronous>, transform_indices = @transform_3, window_bounds = array<i64: 128, 128>}, {pipeline_mode = #tpu.pipeline_mode<synchronous>, transform_indices = @transform_4, window_bounds = array<i64: 1, 128>}, {pipeline_mode = #tpu.pipeline_mode<synchronous>, transform_indices = @transform_5, window_bounds = array<i64: 128, 128>}, {pipeline_mode = #tpu.pipeline_mode<synchronous>, transform_indices = @transform_6, window_bounds = array<i64: 1, 128>}, {pipeline_mode = #tpu.pipeline_mode<synchronous>, transform_indices = @transform_7, window_bounds = array<i64: 8, 128>}]} {
    %c0 = arith.constant 0 : index
    %c0_0 = arith.constant 0 : index
    %0 = vector.load %arg1[%c0, %c0_0] : memref<8x256xf32, #tpu.memory_space<vmem>>, vector<8x256xf32>
    %c0_1 = arith.constant 0 : index
    %c0_2 = arith.constant 0 : index
    %1 = vector.load %arg2[%c0_1, %c0_2] : memref<256x128xf32, #tpu.memory_space<vmem>>, vector<256x128xf32>
    %cst = arith.constant dense<0.000000e+00> : vector<8x128xf32>
    %2 = tpu.matmul %0, %1, %cst {dimension_numbers = #tpu.dot_dimension_numbers<[1], [0], [0], [1], [0, 0, 1, 1], [], []>} : vector<8x256xf32>, vector<256x128xf32>, vector<8x128xf32> -> vector<8x128xf32>
    %c0_3 = arith.constant 0 : index
    %c0_4 = arith.constant 0 : index
    %3 = vector.load %arg3[%c0_3, %c0_4] : memref<128x128xbf16, #tpu.memory_space<vmem>>, vector<128x128xbf16>
    %c0_5 = arith.constant 0 : index
    %c0_6 = arith.constant 0 : index
    %4 = vector.load %arg4[%c0_5, %c0_6] : memref<128x128xbf16, #tpu.memory_space<vmem>>, vector<128x128xbf16>
    %cst_7 = arith.constant dense<0.000000e+00> : vector<128x128xf32>
    %5 = tpu.matmul %3, %4, %cst_7 {dimension_numbers = #tpu.dot_dimension_numbers<[1], [0], [0], [1], [0, 0, 1, 1], [], []>} : vector<128x128xbf16>, vector<128x128xbf16>, vector<128x128xf32> -> vector<128x128xf32>
    %c0_8 = arith.constant 0 : index
    %c0_9 = arith.constant 0 : index
    %6 = vector.load %arg5[%c0_8, %c0_9] : memref<1x128xf32, #tpu.memory_space<vmem>>, vector<1x128xf32>
    %7 = vector.broadcast %6 : vector<1x128xf32> to vector<128x128xf32>
    %8 = arith.addf %5, %7 : vector<128x128xf32>
    %cst_10 = arith.constant 0.000000e+00 : f32
    %9 = vector.broadcast %cst_10 : f32 to vector<128x128xf32>
    %10 = arith.maximumf %8, %9 : vector<128x128xf32>
    %11 = arith.truncf %10 : vector<128x128xf32> to vector<128x128xbf16>
    %c0_11 = arith.constant 0 : index
    %c0_12 = arith.constant 0 : index
    %12 = vector.load %arg6[%c0_11, %c0_12] : memref<128x128xbf16, #tpu.memory_space<vmem>>, vector<128x128xbf16>
    %cst_13 = arith.constant dense<0.000000e+00> : vector<128x128xf32>
    %13 = tpu.matmul %11, %12, %cst_13 {dimension_numbers = #tpu.dot_dimension_numbers<[1], [0], [0], [1], [0, 0, 1, 1], [], []>} : vector<128x128xbf16>, vector<128x128xbf16>, vector<128x128xf32> -> vector<128x128xf32>
    %c0_14 = arith.constant 0 : index
    %c0_15 = arith.constant 0 : index
    %14 = vector.load %arg7[%c0_14, %c0_15] : memref<1x128xf32, #tpu.memory_space<vmem>>, vector<1x128xf32>
    %15 = vector.broadcast %14 : vector<1x128xf32> to vector<128x128xf32>
    %16 = arith.addf %13, %15 : vector<128x128xf32>
    %cst_16 = arith.constant dense<0.000000e+00> : vector<8x128xf32>
    %17 = tpu.matmul %2, %16, %cst_16 {dimension_numbers = #tpu.dot_dimension_numbers<[1], [1], [0], [0], [0, 0, 1, 0], [], []>} : vector<8x128xf32>, vector<128x128xf32>, vector<8x128xf32> -> vector<8x128xf32>
    %c0_17 = arith.constant 0 : index
    %c0_18 = arith.constant 0 : index
    %18 = vector.load %arg8[%c0_17, %c0_18] : memref<8x128xf32, #tpu.memory_space<vmem>>, vector<8x128xf32>
    tpu.vector_store %arg8[%c0_17, %c0_18], %17 {strides = array<i32>} : memref<8x128xf32, #tpu.memory_space<vmem>>, vector<8x128xf32>,
    return
  }
  func.func @transform_0(%arg0: i32) -> (i32, i32) {
    %c0_i32 = arith.constant 0 : i32
    %c0_i32_0 = arith.constant 0 : i32
    %c0_i32_1 = arith.constant 0 : i32
    return %c0_i32, %c0_i32_0 : i32, i32
  }
  func.func @transform_1(%arg0: i32) -> (i32, i32) {
    %c0_i32 = arith.constant 0 : i32
    %c0_i32_0 = arith.constant 0 : i32
    %c0_i32_1 = arith.constant 0 : i32
    return %c0_i32, %c0_i32_0 : i32, i32
  }
  func.func @transform_2(%arg0: i32) -> (i32, i32) {
    %c0_i32 = arith.constant 0 : i32
    %c0_i32_0 = arith.constant 0 : i32
    %c0_i32_1 = arith.constant 0 : i32
    return %c0_i32, %c0_i32_0 : i32, i32
  }
  func.func @transform_3(%arg0: i32) -> (i32, i32) {
    %c0_i32 = arith.constant 0 : i32
    %c0_i32_0 = arith.constant 0 : i32
    %c0_i32_1 = arith.constant 0 : i32
    return %c0_i32, %c0_i32_0 : i32, i32
  }
  func.func @transform_4(%arg0: i32) -> (i32, i32) {
    %c0_i32 = arith.constant 0 : i32
    %c0_i32_0 = arith.constant 0 : i32
    %c0_i32_1 = arith.constant 0 : i32
    return %c0_i32, %c0_i32_0 : i32, i32
  }
  func.func @transform_5(%arg0: i32) -> (i32, i32) {
    %c0_i32 = arith.constant 0 : i32
    %c0_i32_0 = arith.constant 0 : i32
    %c0_i32_1 = arith.constant 0 : i32
    return %c0_i32, %c0_i32_0 : i32, i32
  }
  func.func @transform_6(%arg0: i32) -> (i32, i32) {
    %c0_i32 = arith.constant 0 : i32
    %c0_i32_0 = arith.constant 0 : i32
    %c0_i32_1 = arith.constant 0 : i32
    return %c0_i32, %c0_i32_0 : i32, i32
  }
  func.func @transform_7(%arg0: i32) -> (i32, i32) {
    %c0_i32 = arith.constant 0 : i32
    %c0_i32_0 = arith.constant 0 : i32
    %c0_i32_1 = arith.constant 0 : i32
    return %c0_i32, %c0_i32_0 : i32, i32
  }
}

</mosaic_0001>

<bundles_post_ra>
// kernel: taxorel_cgc_forward.4
= control target key start
LH: loop header
LB: loop body
LE: loop exit
PB: predicated region body
PF: predicated region fallthrough
CT: control target
= control target key end

     0   :  { %s3078_s21 = smov 0   ;;  %s3080_s22 = smov 0   ;;  %s3727_s0 = inlined_call_operand.vmem [shape: s32[1,1024], index: 0, kind: input, shape index: {}]   ;;  %s3728_s1 = inlined_call_operand.vmem [shape: s32[1,1024], index: 1, kind: input, shape index: {}]   ;;  %s3729_s2 = inlined_call_operand.vmem [shape: bf16[1024,128], index: 2, kind: input, shape index: {}]   ;;  %s3730_s3 = inlined_call_operand.vmem [shape: bf16[1024,128], index: 3, kind: input, shape index: {}]   ;;  %s3731_s4 = inlined_call_operand.vmem [shape: bf16[256,128], index: 4, kind: input, shape index: {}]   ;;  %s3732_s5 = inlined_call_operand.vmem [shape: f32[1,128], index: 5, kind: input, shape index: {}]   ;;  %s3733_s6 = inlined_call_operand.vmem [shape: f32[256,128], index: 6, kind: output, shape index: {}]  }
   0x1   :  { %s3082_s23 = smov 0   ;;  %s3084_s24 = smov 0  }
   0x2   :  { %s3086_s25 = smov 0  }
   0x3 LB: > { %s25_s26 = sadd.s32 1, %s3031_s23  ;;  %s28_s27 = sadd.s32 1, %s3035_s24  ;;  %s3039_s25 = sphi %s3086_s25, %s16_s25   ;;  %s3035_s24 = sphi %s3084_s24, %s3740_s24   ;;  %s3031_s23 = sphi %s3082_s23, %s3739_s23   ;;  %s3027_s22 = sphi %s3080_s22, %s3738_s22   ;;  %s3023_s21 = sphi %s3078_s21, %s3737_s21  }
   0x4   : > { %p26_p0 = scmp.ge.s32.totalorder %s25_s26, 2  ;;  %p2272_p1 = scmp.ge.s32.totalorder %s3039_s25, 1 }
   0x5   : > { %p256_p2 = scmp.lt.s32.totalorder %s3039_s25, 5 }
   0x6   : > { %s3742_s26 = smov (%p26_p0, %s25_s26), 0  ;;  %s3744_s27 = smov (!%p26_p0, %s28_s27), %s3035_s24 }
   0x7   : > { %p257_p3 = pnand %p2272_p1, %p256_p2  ;;  %p30_p4 = scmp.ge.s32.totalorder %s3744_s27, 2 }
   0x8   : > { %s2273_s28 = sshll.u32 (!%p257_p3), %s3023_s21, 2  ;;  %s2275_s29 = sshll.u32 (!%p257_p3), %s3023_s21, 6 }
   0x9   : > { %s3746_s27 = smov (%p30_p4, %s3744_s27), 0  ;;  %260 = sbr.rel (%p257_p3) target bundleno = 703 (0x2bf), region = 44 }
   0xa   : > { %p300_p5 = scmp.lt.s32.totalorder (!%p257_p3), %s2273_s28, 7  ;;  %p310_p6 = scmp.lt.s32.totalorder (!%p257_p3), %s2275_s29, 127 }
   0xb   : > { %s2279_s30 = sshll.u32 (!%p257_p3), %s3027_s22, 4  ;;  %p2281_p8 = scmp.ne.s32.totalorder (!%p257_p3), %s3023_s21, 0 }
   0xc   : > { %p322_p7 = scmp.lt.s32.totalorder (!%p257_p3), %s2279_s30, 31 }
   0xe   : > { %s3748_s28 = smov (!%p300_p5, %s2273_s28), 7  ;;  %s3750_s29 = smov (!%p310_p6, %s2275_s29), 127 }
   0xf   : > { %s307_s12 = scalar_lea.vmem %s3728_s1, %s3748_s28  ;;  %s2276_s13 = sshll.u32 %s3750_s29, 2 }
  0x10   : > { %s3128_s16 = scalar_lea.vmem %s3729_s2, %s2276_s13  ;;  %s3133_s19 = scalar_lea.vmem %s3730_s3, %s2276_s13 }
  0x11   : > { %s3752_s30 = smov (!%p322_p7, %s2279_s30), 31  ;;  %330 = sbr.rel (%p2281_p8) target bundleno = 55 (0x37), region = 48 }
  0x12   : > { %s2280_s20 = sshll.u32 %s3752_s30, 3 }
  0x13   : > { %s3138_s9 = scalar_lea.vmem %s3733_s6, %s2280_s20 }
  0x16   : > { %v3041_v0 = vmov 0.0  }
  0x17   : > { %331 = vst [vmem:[#allocation2 + $0xb0] sm:$0xff] %v3041_v0 }
  0x18   : > { %332 = vst [vmem:[#allocation2] sm:$0xff] %v3041_v0 }
  0x19   : > { %333 = vst [vmem:[#allocation2 + $0xd8] sm:$0xff] %v3041_v0 }
  0x1a   : > { %334 = vst [vmem:[#allocation2 + $0x18] sm:$0xff] %v3041_v0 }
  0x1b   : > { %335 = vst [vmem:[#allocation2 + $0x50] sm:$0xff] %v3041_v0 }
  0x1c   : > { %336 = vst [vmem:[#allocation2 + $0x68] sm:$0xff] %v3041_v0 }
  0x1d   : > { %337 = vst [vmem:[#allocation2 + $0x30] sm:$0xff] %v3041_v0 }
  0x1e   : > { %338 = vst [vmem:[#allocation2 + $0x48] sm:$0xff] %v3041_v0 }
  0x1f   : > { %339 = vst [vmem:[#allocation2 + $0x80] sm:$0xff] %v3041_v0 }
  0x20   : > { %340 = vst [vmem:[#allocation2 + $0x88] sm:$0xff] %v3041_v0 }
  0x21   : > { %341 = vst [vmem:[#allocation2 + $0xe8] sm:$0xff] %v3041_v0 }
  0x22   : > { %342 = vst [vmem:[#allocation2 + $0xb8] sm:$0xff] %v3041_v0 }
  0x23   : > { %343 = vst [vmem:[#allocation2 + $0x60] sm:$0xff] %v3041_v0 }
  0x24   : > { %344 = vst [vmem:[#allocation2 + $0xf0] sm:$0xff] %v3041_v0 }
  0x25   : > { %345 = vst [vmem:[#allocation2 + $0x8] sm:$0xff] %v3041_v0 }
  0x26   : > { %346 = vst [vmem:[#allocation2 + $0x78] sm:$0xff] %v3041_v0 }
  0x27   : > { %347 = vst [vmem:[#allocation2 + $0x38] sm:$0xff] %v3041_v0 }
  0x28   : > { %348 = vst [vmem:[#allocation2 + $0x58] sm:$0xff] %v3041_v0 }
  0x29   : > { %349 = vst [vmem:[#allocation2 + $0x40] sm:$0xff] %v3041_v0 }
  0x2a   : > { %350 = vst [vmem:[#allocation2 + $0xc8] sm:$0xff] %v3041_v0 }
  0x2b   : > { %351 = vst [vmem:[#allocation2 + $0xe0] sm:$0xff] %v3041_v0 }
  0x2c   : > { %352 = vst [vmem:[#allocation2 + $0x90] sm:$0xff] %v3041_v0 }
  0x2d   : > { %353 = vst [vmem:[#allocation2 + $0x70] sm:$0xff] %v3041_v0 }
  0x2e   : > { %354 = vst [vmem:[#allocation2 + $0xc0] sm:$0xff] %v3041_v0 }
  0x2f   : > { %355 = vst [vmem:[#allocation2 + $0xa8] sm:$0xff] %v3041_v0 }
  0x30   : > { %356 = vst [vmem:[#allocation2 + $0xd0] sm:$0xff] %v3041_v0 }
  0x31   : > { %357 = vst [vmem:[#allocation2 + $0x10] sm:$0xff] %v3041_v0 }
  0x32   : > { %358 = vst [vmem:[#allocation2 + $0x28] sm:$0xff] %v3041_v0 }
  0x33   : > { %359 = vst [vmem:[#allocation2 + $0xa0] sm:$0xff] %v3041_v0 }
  0x34   : > { %360 = vst [vmem:[#allocation2 + $0xf8] sm:$0xff] %v3041_v0 }
  0x35   : > { %361 = vst [vmem:[#allocation2 + $0x20] sm:$0xff] %v3041_v0 }
  0x36   : > { %362 = vst [vmem:[#allocation2 + $0x98] sm:$0xff] %v3041_v0 }
  0x37 PF: > { %v2869_v1 = vld [vmem:[%s3128_s16 + $0x38] sm:$0xff]  ;;  %v2868_v5 = vld [vmem:[%s3128_s16 + $0x30] sm:$0xff]  ;;  %v2867_v9 = vld [vmem:[%s3128_s16 + $0x28] sm:$0xff]  ;;  %v364_v13 = vlaneseq  ;;  %s2282_s29 = sshll.u32 %s3027_s22, 7  ;;  %s3734_s11 = scalar_lea.vmem %s3727_s0, %s3748_s28  ;;  %v3042_v51 = vmov 1.0|1.0  }
  0x38   : > { %v2877_v2 = vld [vmem:[%s3128_s16 + $0x78] sm:$0xff]  ;;  %1128 = vmatpush.bf16.msra.mxu0 %v2869_v1  ;;  %v2876_v6 = vld [vmem:[%s3128_s16 + $0x70] sm:$0xff]  ;;  %v2875_v10 = vld [vmem:[%s3128_s16 + $0x68] sm:$0xff]  ;;  %v3167_v26 = vstv %s2282_s29  ;;  %p2795_p9 = scmp.ne.s32.totalorder %s3023_s21, 1 }
  0x39   : > { %v2885_v3 = vld [vmem:[%s3128_s16 + $0xb8] sm:$0xff]  ;;  %1177 = vmatpush.bf16.msra.mxu1 %v2877_v2  ;;  %v2884_v7 = vld [vmem:[%s3128_s16 + $0xb0] sm:$0xff]  ;;  %v2883_v11 = vld [vmem:[%s3128_s16 + $0xa8] sm:$0xff]  ;;  %v3157_v18 = vshrl.u32 %v364_v13, 7 }
  0x3a   : > { %v2893_v4 = vld [vmem:[%s3128_s16 + $0xf8] sm:$0xff]  ;;  %1226 = vmatpush.bf16.msra.mxu2 %v2885_v3  ;;  %v2892_v8 = vld [vmem:[%s3128_s16 + $0xf0] sm:$0xff]  ;;  %v2891_v12 = vld [vmem:[%s3128_s16 + $0xe8] sm:$0xff] }
  0x3b   : > { %1275 = vmatpush.bf16.msra.mxu3 %v2893_v4  ;;  %v2866_v14 = vld [vmem:[%s3128_s16 + $0x20] sm:$0xff]  ;;  %v2865_v19 = vld [vmem:[%s3128_s16 + $0x18] sm:$0xff]  ;;  %v366_v23 = vadd.s32 8, %v3157_v18  ;;  %v2864_v24 = vld [vmem:[%s3128_s16 + $0x10] sm:$0xff]  ;;  %v3178_v30 = vadd.s32 %v3167_v26, %v3157_v18  ;;  %v367_v52 = vadd.s32 16, %v3157_v18  ;;  %v368_v53 = vadd.s32 24, %v3157_v18 }
  0x3c   : > { %1129 = vmatpush.bf16.msra.mxu0 %v2868_v5  ;;  %v2874_v15 = vld [vmem:[%s3128_s16 + $0x60] sm:$0xff]  ;;  %v2873_v20 = vld [vmem:[%s3128_s16 + $0x58] sm:$0xff]  ;;  %v2872_v25 = vld [vmem:[%s3128_s16 + $0x50] sm:$0xff]  ;;  %v369_v62 = vadd.s32 32, %v3157_v18  ;;  %v370_v63 = vadd.s32 40, %v3157_v18 }
  0x3d   : > { %1178 = vmatpush.bf16.msra.mxu1 %v2876_v6  ;;  %v2882_v16 = vld [vmem:[%s3128_s16 + $0xa0] sm:$0xff]  ;;  %v2881_v21 = vld [vmem:[%s3128_s16 + $0x98] sm:$0xff]  ;;  %v2880_v28 = vld [vmem:[%s3128_s16 + $0x90] sm:$0xff]  ;;  %v3181_v31 = vadd.s32 %v3167_v26, %v366_v23  ;;  %v3238_v58 = vadd.s32 %v3167_v26, %v367_v52  ;;  %v3241_v59 = vadd.s32 %v3167_v26, %v368_v53  ;;  %v371_v6 = vadd.s32 48, %v3157_v18 }
  0x3e   : > { %1227 = vmatpush.bf16.msra.mxu2 %v2884_v7  ;;  %v2890_v17 = vld [vmem:[%s3128_s16 + $0xe0] sm:$0xff]  ;;  %v2889_v22 = vld [vmem:[%s3128_s16 + $0xd8] sm:$0xff]  ;;  %v2888_v29 = vld [vmem:[%s3128_s16 + $0xd0] sm:$0xff]  ;;  %v3272_v4 = vadd.s32 %v3167_v26, %v369_v62  ;;  %v3275_v5 = vadd.s32 %v3167_v26, %v370_v63  ;;  %v372_v7 = vadd.s32 56, %v3157_v18  ;;  %v375_v23 = vadd.s32 80, %v3157_v18 }
  0x3f   : > { %1276 = vmatpush.bf16.msra.mxu3 %v2892_v8  ;;  %v398_v27 = vld [vmem:[%s3734_s11] sm:$0xf]  ;;  %v2863_v33 = vld [vmem:[%s3128_s16 + $0x8] sm:$0xff]  ;;  %v2917_v45 = vld [vmem:[%s3133_s19 + $0xb8] sm:$0xff] }
  0x40   : > { %1130 = vmatpush.bf16.msra.mxu0 %v2867_v9  ;;  %v3183_v32 = vperm.slane %v398_v27, 0  ;;  %v2871_v34 = vld [vmem:[%s3128_s16 + $0x48] sm:$0xff]  ;;  %v3187_v35 = vperm.slane %v398_v27, 1  ;;  %v3191_v38 = vperm.slane %v398_v27, 2  ;;  %v3193_v39 = vperm.slane %v398_v27, 3  ;;  %v2862_v40 = vld [vmem:[%s3128_s16] sm:$0xff] }
  0x41   : > { %1179 = vmatpush.bf16.msra.mxu1 %v2875_v10  ;;  %v2879_v36 = vld [vmem:[%s3128_s16 + $0x88] sm:$0xff]  ;;  %v2870_v41 = vld [vmem:[%s3128_s16 + $0x40] sm:$0xff]  ;;  %v2925_v46 = vld [vmem:[%s3133_s19 + $0xf8] sm:$0xff]  ;;  %v3307_v13 = vadd.s32 %v3167_v26, %v372_v7 }
  0x42   : > { %1228 = vmatpush.bf16.msra.mxu2 %v2883_v11  ;;  %v2887_v37 = vld [vmem:[%s3128_s16 + $0xc8] sm:$0xff]  ;;  %vm403_vm0 = vcmp.eq.s32.totalorder %v3183_v32, %v3178_v30  ;;  %vm407_vm1 = vcmp.eq.s32.totalorder %v3183_v32, %v3181_v31  ;;  %vm404_vm2 = vcmp.eq.s32.totalorder %v3187_v35, %v3178_v30  ;;  %vm408_vm3 = vcmp.eq.s32.totalorder %v3187_v35, %v3181_v31  ;;  %v2878_v42 = vld [vmem:[%s3128_s16 + $0x80] sm:$0xff]  ;;  %v2901_v47 = vld [vmem:[%s3133_s19 + $0x38] sm:$0xff] }
  0x43   : > { %1277 = vmatpush.bf16.msra.mxu3 %v2891_v12  ;;  %v2886_v43 = vld [vmem:[%s3128_s16 + $0xc0] sm:$0xff]  ;;  %vm405_vm4 = vcmp.eq.s32.totalorder %v3191_v38, %v3178_v30  ;;  %vm409_vm5 = vcmp.eq.s32.totalorder %v3191_v38, %v3181_v31  ;;  %vm3211_vm6 = vmpackc.low %vm407_vm1, %vm403_vm0  ;;  %vm406_vm7 = vcmp.eq.s32.totalorder %v3193_v39, %v3178_v30  ;;  %vm410_vm8 = vcmp.eq.s32.totalorder %v3193_v39, %v3181_v31  ;;  %v2909_v48 = vld [vmem:[%s3133_s19 + $0x78] sm:$0xff] }
  0x44   : > { %1131 = vmatpush.bf16.msra.mxu0 %v2866_v14  ;;  %vm2555_vm9 = vmpackc.low %vm408_vm3, %vm404_vm2  ;;  %v2916_v49 = vld [vmem:[%s3133_s19 + $0xb0] sm:$0xff]  ;;  %v2915_v56 = vld [vmem:[%s3133_s19 + $0xa8] sm:$0xff]  ;;  %vm411_vm12 = vcmp.eq.s32.totalorder %v3183_v32, %v3238_v58  ;;  %vm415_vm13 = vcmp.eq.s32.totalorder %v3183_v32, %v3241_v59  ;;  %vm412_vm14 = vcmp.eq.s32.totalorder %v3187_v35, %v3238_v58  ;;  %vm416_vm15 = vcmp.eq.s32.totalorder %v3187_v35, %v3241_v59 }
  0x45   : > { %1180 = vmatpush.bf16.msra.mxu1 %v2874_v15  ;;  %vm2571_vm10 = vmpackc.low %vm409_vm5, %vm405_vm4  ;;  %v2924_v50 = vld [vmem:[%s3133_s19 + $0xf0] sm:$0xff]  ;;  %v2923_v57 = vld [vmem:[%s3133_s19 + $0xe8] sm:$0xff]  ;;  %vm413_vm0 = vcmp.eq.s32.totalorder %v3191_v38, %v3238_v58  ;;  %vm417_vm1 = vcmp.eq.s32.totalorder %v3191_v38, %v3241_v59  ;;  %vm414_vm3 = vcmp.eq.s32.totalorder %v3193_v39, %v3238_v58  ;;  %vm418_vm4 = vcmp.eq.s32.totalorder %v3193_v39, %v3241_v59 }
  0x46   : > { %1229 = vmatpush.bf16.msra.mxu2 %v2882_v16  ;;  %vm2587_vm11 = vmpackc.low %vm410_vm8, %vm406_vm7  ;;  %v2900_v54 = vld [vmem:[%s3133_s19 + $0x30] sm:$0xff]  ;;  %v2899_v60 = vld [vmem:[%s3133_s19 + $0x28] sm:$0xff]  ;;  %vm419_vm8 = vcmp.eq.s32.totalorder %v3183_v32, %v3272_v4  ;;  %v3304_v12 = vadd.s32 %v3167_v26, %v371_v6  ;;  %v373_v14 = vadd.s32 64, %v3157_v18  ;;  %v374_v15 = vadd.s32 72, %v3157_v18 }
  0x47   : > { %1278 = vmatpush.bf16.msra.mxu3 %v2890_v17  ;;  %v2908_v55 = vld [vmem:[%s3133_s19 + $0x70] sm:$0xff]  ;;  %v2907_v61 = vld [vmem:[%s3133_s19 + $0x68] sm:$0xff]  ;;  %vm2541_vm2 = vmpackc.low %vm415_vm13, %vm411_vm12  ;;  %vm421_vm12 = vcmp.eq.s32.totalorder %v3191_v38, %v3272_v4  ;;  %vm425_vm13 = vcmp.eq.s32.totalorder %v3191_v38, %v3275_v5 }
  0x48   : > { %1132 = vmatpush.bf16.msra.mxu0 %v2865_v19  ;;  %vm2557_vm5 = vmpackc.low %vm416_vm15, %vm412_vm14  ;;  %v2914_v0 = vld [vmem:[%s3133_s19 + $0xa0] sm:$0xff]  ;;  %vm422_vm15 = vcmp.eq.s32.totalorder %v3193_v39, %v3272_v4  ;;  %v2913_v8 = vld [vmem:[%s3133_s19 + $0x98] sm:$0xff] }
  0x49   : > { %1181 = vmatpush.bf16.msra.mxu1 %v2873_v20  ;;  %vm2589_vm7 = vmpackc.low %vm418_vm4, %vm414_vm3  ;;  %v2922_v1 = vld [vmem:[%s3133_s19 + $0xe0] sm:$0xff]  ;;  %v2921_v9 = vld [vmem:[%s3133_s19 + $0xd8] sm:$0xff]  ;;  %vm427_vm4 = vcmp.eq.s32.totalorder %v3183_v32, %v3304_v12 }
  0x4a   : > { %1230 = vmatpush.bf16.msra.mxu2 %v2881_v21  ;;  %v2898_v2 = vld [vmem:[%s3133_s19 + $0x20] sm:$0xff]  ;;  %v2897_v10 = vld [vmem:[%s3133_s19 + $0x18] sm:$0xff]  ;;  %v2912_v16 = vld [vmem:[%s3133_s19 + $0x90] sm:$0xff]  ;;  %v3336_v21 = vadd.s32 %v3167_v26, %v373_v14 }
  0x4b   : > { %1279 = vmatpush.bf16.msra.mxu3 %v2889_v22  ;;  %v2906_v3 = vld [vmem:[%s3133_s19 + $0x60] sm:$0xff]  ;;  %v2905_v11 = vld [vmem:[%s3133_s19 + $0x58] sm:$0xff]  ;;  %v2920_v17 = vld [vmem:[%s3133_s19 + $0xd0] sm:$0xff]  ;;  %v3339_v22 = vadd.s32 %v3167_v26, %v374_v15 }
  0x4c   : > { %1133 = vmatpush.bf16.msra.mxu0 %v2864_v24  ;;  %v2896_v19 = vld [vmem:[%s3133_s19 + $0x10] sm:$0xff]  ;;  %v376_v24 = vadd.s32 88, %v3157_v18  ;;  %v2919_v27 = vld [vmem:[%s3133_s19 + $0xc8] sm:$0xff] }
  0x4d   : > { %1182 = vmatpush.bf16.msra.mxu1 %v2872_v25  ;;  %v2904_v20 = vld [vmem:[%s3133_s19 + $0x50] sm:$0xff]  ;;  %v2911_v25 = vld [vmem:[%s3133_s19 + $0x88] sm:$0xff] }
  0x4e   : > { %1231 = vmatpush.bf16.msra.mxu2 %v2880_v28  ;;  %v2895_v28 = vld [vmem:[%s3133_s19 + $0x8] sm:$0xff]  ;;  %v858_v14 = vld [vmem:[#allocation2 + $0x50] sm:$0xff] }
  0x4f   : > { %1280 = vmatpush.bf16.msra.mxu3 %v2888_v29  ;;  %v2903_v29 = vld [vmem:[%s3133_s19 + $0x48] sm:$0xff] }
  0x50   : > { %1134 = vmatpush.bf16.msra.mxu0 %v2863_v33  ;;  %v3368_v33 = vadd.s32 %v3167_v26, %v375_v23 }
  0x51   : > { %1183 = vmatpush.bf16.msra.mxu1 %v2871_v34  ;;  %v3371_v34 = vadd.s32 %v3167_v26, %v376_v24 }
  0x52   : > { %1232 = vmatpush.bf16.msra.mxu2 %v2879_v36  ;;  %v377_v36 = vadd.s32 96, %v3157_v18 }
  0x53   : > { %1281 = vmatpush.bf16.msra.mxu3 %v2887_v37  ;;  %v378_v37 = vadd.s32 104, %v3157_v18 }
  0x54   : > { %1135 = vmatpush.bf16.msra.mxu0 %v2862_v40  ;;  %v2910_v40 = vld [vmem:[%s3133_s19 + $0x80] sm:$0xff]  ;;  %v3400_v44 = vadd.s32 %v3167_v26, %v377_v36 }
  0x55   : > { %1184 = vmatpush.bf16.msra.mxu1 %v2870_v41  ;;  %v2918_v41 = vld [vmem:[%s3133_s19 + $0xc0] sm:$0xff] }
  0x56   : > { %1233 = vmatpush.bf16.msra.mxu2 %v2878_v42  ;;  %v2894_v42 = vld [vmem:[%s3133_s19] sm:$0xff] }
  0x57   : > { %1282 = vmatpush.bf16.msra.mxu3 %v2886_v43  ;;  %2540 = vmatmul.msk.bf16.vlgmr.msra.gmra.mxu0 %vm3211_vm6, %v3042_v51  ;;  %vm2573_vm6 = vmpackc.low %vm417_vm1, %vm413_vm0  ;;  %vm426_vm0 = vcmp.eq.s32.totalorder %v3193_v39, %v3275_v5  ;;  %v2902_v43 = vld [vmem:[%s3133_s19 + $0x40] sm:$0xff] }
  0x58   : > { %2556 = vmatmul.msk.bf16.vlgmr.msra.gmra.mxu1 %vm2555_vm9, %v3042_v51  ;;  %1628 = vmatpush.bf16.msrb.mxu0 %v2901_v47  ;;  %vm423_vm9 = vcmp.eq.s32.totalorder %v3183_v32, %v3275_v5  ;;  %vm2591_vm3 = vmpackc.low %vm426_vm0, %vm422_vm15  ;;  %vm435_vm0 = vcmp.eq.s32.totalorder %v3183_v32, %v3336_v21  ;;  %v380_v47 = vadd.s32 120, %v3157_v18 }
  0x59   : > { %2572 = vmatmul.msk.bf16.vlgmr.msra.gmra.mxu2 %vm2571_vm10, %v3042_v51  ;;  %1677 = vmatpush.bf16.msrb.mxu1 %v2909_v48  ;;  %vm420_vm10 = vcmp.eq.s32.totalorder %v3187_v35, %v3272_v4  ;;  %vm2543_vm14 = vmpackc.low %vm423_vm9, %vm419_vm8  ;;  %vm429_vm8 = vcmp.eq.s32.totalorder %v3191_v38, %v3304_v12  ;;  %vm433_vm9 = vcmp.eq.s32.totalorder %v3191_v38, %v3307_v13 }
  0x5a   : > { %1726 = vmatpush.bf16.msrb.mxu2 %v2917_v45  ;;  %2588 = vmatmul.msk.bf16.vlgmr.msra.gmra.mxu3 %vm2587_vm11, %v3042_v51  ;;  %vm424_vm11 = vcmp.eq.s32.totalorder %v3187_v35, %v3275_v5  ;;  %v3403_v45 = vadd.s32 %v3167_v26, %v378_v37 }
  0x5b   : > { %1775 = vmatpush.bf16.msrb.mxu3 %v2925_v46  ;;  %vm2559_vm1 = vmpackc.low %vm424_vm11, %vm420_vm10  ;;  %vm430_vm11 = vcmp.eq.s32.totalorder %v3193_v39, %v3304_v12  ;;  %v379_v46 = vadd.s32 112, %v3157_v18  ;;  %v627_v18 = vld [vmem:[%s307_s12] sm:$0xf] }
  0x5c   : > { %1629 = vmatpush.bf16.msrb.mxu0 %v2900_v54 }
  0x5d   : > { %1678 = vmatpush.bf16.msrb.mxu1 %v2908_v55  ;;  %v3428_v48 = vadd.s32 %v3167_v26, %v379_v46 }
  0x5e   : > { %1727 = vmatpush.bf16.msrb.mxu2 %v2916_v49  ;;  %v3431_v49 = vadd.s32 %v3167_v26, %v380_v47  ;;  %v3458_v26 = vperm.slane %v627_v18, 0 }
  0x5f   : > { %1776 = vmatpush.bf16.msrb.mxu3 %v2924_v50 }
  0x60   : > { %1630 = vmatpush.bf16.msrb.mxu0 %v2899_v60 }
  0x61   : > { %1679 = vmatpush.bf16.msrb.mxu1 %v2907_v61 }
  0x62   : > { %1728 = vmatpush.bf16.msrb.mxu2 %v2915_v56 }
  0x63   : > { %1777 = vmatpush.bf16.msrb.mxu3 %v2923_v57 }
  0x64   : > { %1631 = vmatpush.bf16.msrb.mxu0 %v2898_v2 }
  0x65   : > { %1680 = vmatpush.bf16.msrb.mxu1 %v2906_v3  ;;  %v857_v3 = vld [vmem:[#allocation2 + $0xd8] sm:$0xff] }
  0x66   : > { %1729 = vmatpush.bf16.msrb.mxu2 %v2914_v0 }
  0x67   : > { %2542 = vmatmul.msk.bf16.gmra.mxu0 %vm2541_vm2, %v3042_v51  ;;  %1778 = vmatpush.bf16.msrb.mxu3 %v2922_v1  ;;  %vm2575_vm2 = vmpackc.low %vm425_vm13, %vm421_vm12  ;;  %vm434_vm12 = vcmp.eq.s32.totalorder %v3193_v39, %v3307_v13 }
  0x68   : > { %2558 = vmatmul.msk.bf16.gmra.mxu1 %vm2557_vm5, %v3042_v51  ;;  %1632 = vmatpush.bf16.msrb.mxu0 %v2897_v10  ;;  %vm431_vm5 = vcmp.eq.s32.totalorder %v3183_v32, %v3307_v13  ;;  %vm2593_vm15 = vmpackc.low %vm434_vm12, %vm430_vm11  ;;  %vm443_vm12 = vcmp.eq.s32.totalorder %v3183_v32, %v3368_v33 }
  0x69   : > { %2574 = vmatmul.msk.bf16.gmra.mxu2 %vm2573_vm6, %v3042_v51  ;;  %1681 = vmatpush.bf16.msrb.mxu1 %v2905_v11  ;;  %vm428_vm6 = vcmp.eq.s32.totalorder %v3187_v35, %v3304_v12  ;;  %vm2545_vm10 = vmpackc.low %vm431_vm5, %vm427_vm4  ;;  %vm437_vm4 = vcmp.eq.s32.totalorder %v3191_v38, %v3336_v21  ;;  %vm441_vm5 = vcmp.eq.s32.totalorder %v3191_v38, %v3339_v22 }
  0x6a   : > { %2590 = vmatmul.msk.bf16.gmra.mxu3 %vm2589_vm7, %v3042_v51  ;;  %1730 = vmatpush.bf16.msrb.mxu2 %v2913_v8  ;;  %vm432_vm7 = vcmp.eq.s32.totalorder %v3187_v35, %v3307_v13 }
  0x6b   : > { %1779 = vmatpush.bf16.msrb.mxu3 %v2921_v9  ;;  %vm2561_vm13 = vmpackc.low %vm432_vm7, %vm428_vm6  ;;  %vm438_vm7 = vcmp.eq.s32.totalorder %v3193_v39, %v3336_v21 }
  0x6c   : > { %1633 = vmatpush.bf16.msrb.mxu0 %v2896_v19 }
  0x6d   : > { %1682 = vmatpush.bf16.msrb.mxu1 %v2904_v20 }
  0x6e   : > { %1731 = vmatpush.bf16.msrb.mxu2 %v2912_v16 }
  0x6f   : > { %1780 = vmatpush.bf16.msrb.mxu3 %v2920_v17 }
  0x70   : > { %1634 = vmatpush.bf16.msrb.mxu0 %v2895_v28 }
  0x71   : > { %1683 = vmatpush.bf16.msrb.mxu1 %v2903_v29 }
  0x72   : > { %1732 = vmatpush.bf16.msrb.mxu2 %v2911_v25 }
  0x73   : > { %1781 = vmatpush.bf16.msrb.mxu3 %v2919_v27  ;;  %v859_v27 = vld [vmem:[#allocation2 + $0x30] sm:$0xff] }
  0x74   : > { %1635 = vmatpush.bf16.msrb.mxu0 %v2894_v42  ;;  %v860_v42 = vld [vmem:[#allocation2 + $0x80] sm:$0xff] }
  0x75   : > { %1684 = vmatpush.bf16.msrb.mxu1 %v2902_v43 }
  0x76   : > { %1733 = vmatpush.bf16.msrb.mxu2 %v2910_v40 }
  0x77   : > { %2544 = vmatmul.msk.bf16.gmra.mxu0 %vm2543_vm14, %v3042_v51  ;;  %vm2577_vm14 = vmpackc.low %vm433_vm9, %vm429_vm8  ;;  %vm442_vm8 = vcmp.eq.s32.totalorder %v3193_v39, %v3339_v22  ;;  %1782 = vmatpush.bf16.msrb.mxu3 %v2918_v41 }
  0x78   : > { %2560 = vmatmul.msk.bf16.gmra.mxu1 %vm2559_vm1, %v3042_v51  ;;  %vm439_vm1 = vcmp.eq.s32.totalorder %v3183_v32, %v3339_v22  ;;  %vm2595_vm11 = vmpackc.low %vm442_vm8, %vm438_vm7  ;;  %vm451_vm8 = vcmp.eq.s32.totalorder %v3183_v32, %v3400_v44 }
  0x79   : > { %2576 = vmatmul.msk.bf16.gmra.mxu2 %vm2575_vm2, %v3042_v51  ;;  %vm436_vm2 = vcmp.eq.s32.totalorder %v3187_v35, %v3336_v21  ;;  %vm2547_vm6 = vmpackc.low %vm439_vm1, %vm435_vm0  ;;  %vm445_vm0 = vcmp.eq.s32.totalorder %v3191_v38, %v3368_v33  ;;  %vm449_vm1 = vcmp.eq.s32.totalorder %v3191_v38, %v3371_v34 }
  0x7a   : > { %2592 = vmatmul.msk.bf16.gmra.mxu3 %vm2591_vm3, %v3042_v51  ;;  %vm440_vm3 = vcmp.eq.s32.totalorder %v3187_v35, %v3339_v22 }
  0x7b   : > { %vm2563_vm9 = vmpackc.low %vm440_vm3, %vm436_vm2  ;;  %vm446_vm3 = vcmp.eq.s32.totalorder %v3193_v39, %v3368_v33 }
  0x87   : > { %2546 = vmatmul.msk.bf16.gmra.mxu0 %vm2545_vm10, %v3042_v51  ;;  %vm2579_vm10 = vmpackc.low %vm441_vm5, %vm437_vm4  ;;  %vm450_vm4 = vcmp.eq.s32.totalorder %v3193_v39, %v3371_v34 }
  0x88   : > { %2562 = vmatmul.msk.bf16.gmra.mxu1 %vm2561_vm13, %v3042_v51  ;;  %vm447_vm13 = vcmp.eq.s32.totalorder %v3183_v32, %v3371_v34  ;;  %vm2597_vm7 = vmpackc.low %vm450_vm4, %vm446_vm3  ;;  %vm459_vm4 = vcmp.eq.s32.totalorder %v3183_v32, %v3428_v48 }
  0x89   : > { %2578 = vmatmul.msk.bf16.gmra.mxu2 %vm2577_vm14, %v3042_v51  ;;  %vm444_vm14 = vcmp.eq.s32.totalorder %v3187_v35, %v3368_v33  ;;  %vm2549_vm2 = vmpackc.low %vm447_vm13, %vm443_vm12  ;;  %vm453_vm12 = vcmp.eq.s32.totalorder %v3191_v38, %v3400_v44  ;;  %vm457_vm13 = vcmp.eq.s32.totalorder %v3191_v38, %v3403_v45 }
  0x8a   : > { %2594 = vmatmul.msk.bf16.gmra.mxu3 %vm2593_vm15, %v3042_v51  ;;  %vm448_vm15 = vcmp.eq.s32.totalorder %v3187_v35, %v3371_v34 }
  0x8b   : > { %vm2565_vm5 = vmpackc.low %vm448_vm15, %vm444_vm14  ;;  %vm454_vm15 = vcmp.eq.s32.totalorder %v3193_v39, %v3400_v44 }
  0x97   : > { %2548 = vmatmul.msk.bf16.gmra.mxu0 %vm2547_vm6, %v3042_v51  ;;  %vm2581_vm6 = vmpackc.low %vm449_vm1, %vm445_vm0  ;;  %vm458_vm0 = vcmp.eq.s32.totalorder %v3193_v39, %v3403_v45 }
  0x98   : > { %2564 = vmatmul.msk.bf16.gmra.mxu1 %vm2563_vm9, %v3042_v51  ;;  %vm455_vm9 = vcmp.eq.s32.totalorder %v3183_v32, %v3403_v45  ;;  %vm2599_vm3 = vmpackc.low %vm458_vm0, %vm454_vm15  ;;  %vm632_vm0 = vcmp.eq.s32.totalorder %v3458_v26, %v3178_v30 }
  0x99   : > { %2580 = vmatmul.msk.bf16.gmra.mxu2 %vm2579_vm10, %v3042_v51  ;;  %vm452_vm10 = vcmp.eq.s32.totalorder %v3187_v35, %v3400_v44  ;;  %vm2551_vm14 = vmpackc.low %vm455_vm9, %vm451_vm8  ;;  %vm461_vm8 = vcmp.eq.s32.totalorder %v3191_v38, %v3428_v48  ;;  %vm465_vm9 = vcmp.eq.s32.totalorder %v3191_v38, %v3431_v49  ;;  %v3464_v38 = vperm.slane %v627_v18, 3 }
  0x9a   : > { %2596 = vmatmul.msk.bf16.gmra.mxu3 %vm2595_vm11, %v3042_v51  ;;  %vm456_vm11 = vcmp.eq.s32.totalorder %v3187_v35, %v3403_v45 }
  0x9b   : > { %vm2567_vm1 = vmpackc.low %vm456_vm11, %vm452_vm10  ;;  %vm462_vm11 = vcmp.eq.s32.totalorder %v3193_v39, %v3428_v48 }
  0xa7   : > { %2550 = vmatmul.msk.bf16.gmra.mxu0 %vm2549_vm2, %v3042_v51  ;;  %vm2583_vm2 = vmpackc.low %vm457_vm13, %vm453_vm12  ;;  %vm466_vm12 = vcmp.eq.s32.totalorder %v3193_v39, %v3431_v49 }
  0xa8   : > { %2566 = vmatmul.msk.bf16.gmra.mxu1 %vm2565_vm5, %v3042_v51  ;;  %vm463_vm5 = vcmp.eq.s32.totalorder %v3183_v32, %v3431_v49  ;;  %vm2601_vm15 = vmpackc.low %vm466_vm12, %vm462_vm11  ;;  %v3460_v32 = vperm.slane %v627_v18, 1  ;;  %vm640_vm12 = vcmp.eq.s32.totalorder %v3458_v26, %v3238_v58 }
  0xa9   : > { %2582 = vmatmul.msk.bf16.gmra.mxu2 %vm2581_vm6, %v3042_v51  ;;  %vm460_vm6 = vcmp.eq.s32.totalorder %v3187_v35, %v3428_v48  ;;  %vm2553_vm10 = vmpackc.low %vm463_vm5, %vm459_vm4 }
  0xaa   : > { %2598 = vmatmul.msk.bf16.gmra.mxu3 %vm2597_vm7, %v3042_v51  ;;  %vm464_vm7 = vcmp.eq.s32.totalorder %v3187_v35, %v3431_v49  ;;  %v3462_v35 = vperm.slane %v627_v18, 2 }
  0xab   : > { %vm2569_vm13 = vmpackc.low %vm464_vm7, %vm460_vm6  ;;  %vm635_vm7 = vcmp.eq.s32.totalorder %v3464_v38, %v3178_v30 }
  0xac   : > { %vm634_vm4 = vcmp.eq.s32.totalorder %v3462_v35, %v3178_v30  ;;  %vm638_vm5 = vcmp.eq.s32.totalorder %v3462_v35, %v3181_v31 }
  0xb7   : > { %2552 = vmatmul.msk.bf16.gmra.mxu0 %vm2551_vm14, %v3042_v51  ;;  %vm2585_vm14 = vmpackc.low %vm465_vm9, %vm461_vm8  ;;  %vm639_vm8 = vcmp.eq.s32.totalorder %v3464_v38, %v3181_v31 }
  0xb8   : > { %2568 = vmatmul.msk.bf16.gmra.mxu1 %vm2567_vm1, %v3042_v51  ;;  %vm636_vm1 = vcmp.eq.s32.totalorder %v3458_v26, %v3181_v31  ;;  %vm2779_vm11 = vmpackc.low %vm639_vm8, %vm635_vm7  ;;  %vm648_vm8 = vcmp.eq.s32.totalorder %v3458_v26, %v3272_v4 }
  0xb9   : > { %2584 = vmatmul.msk.bf16.gmra.mxu2 %vm2583_vm2, %v3042_v51  ;;  %vm633_vm2 = vcmp.eq.s32.totalorder %v3460_v32, %v3178_v30  ;;  %vm2731_vm6 = vmpackc.low %vm636_vm1, %vm632_vm0  ;;  %vm642_vm0 = vcmp.eq.s32.totalorder %v3462_v35, %v3238_v58  ;;  %vm646_vm1 = vcmp.eq.s32.totalorder %v3462_v35, %v3241_v59 }
  0xba   : > { %2600 = vmatmul.msk.bf16.gmra.mxu3 %vm2599_vm3, %v3042_v51  ;;  %vm637_vm3 = vcmp.eq.s32.totalorder %v3460_v32, %v3181_v31  ;;  %v856_v31 = vld [vmem:[#allocation2 + $0xb0] sm:$0xff] }
  0xbb   : > { %vm2747_vm9 = vmpackc.low %vm637_vm3, %vm633_vm2  ;;  %vm643_vm3 = vcmp.eq.s32.totalorder %v3464_v38, %v3238_v58 }
  0xc7   : > { %2554 = vmatmul.msk.bf16.gmra.mxu0 %vm2553_vm10, %v3042_v51  ;;  %vm2763_vm10 = vmpackc.low %vm638_vm5, %vm634_vm4  ;;  %vm647_vm4 = vcmp.eq.s32.totalorder %v3464_v38, %v3241_v59 }
  0xc8   : > { %2570 = vmatmul.msk.bf16.gmra.mxu1 %vm2569_vm13, %v3042_v51  ;;  %vm644_vm13 = vcmp.eq.s32.totalorder %v3458_v26, %v3241_v59  ;;  %vm2781_vm7 = vmpackc.low %vm647_vm4, %vm643_vm3  ;;  %vm656_vm4 = vcmp.eq.s32.totalorder %v3458_v26, %v3304_v12 }
  0xc9   : > { %2586 = vmatmul.msk.bf16.gmra.mxu2 %vm2585_vm14, %v3042_v51  ;;  %vm641_vm14 = vcmp.eq.s32.totalorder %v3460_v32, %v3238_v58  ;;  %vm2733_vm2 = vmpackc.low %vm644_vm13, %vm640_vm12  ;;  %vm650_vm12 = vcmp.eq.s32.totalorder %v3462_v35, %v3272_v4  ;;  %vm654_vm13 = vcmp.eq.s32.totalorder %v3462_v35, %v3275_v5 }
  0xca   : > { %2602 = vmatmul.msk.bf16.gmra.mxu3 %vm2601_vm15, %v3042_v51  ;;  %vm645_vm15 = vcmp.eq.s32.totalorder %v3460_v32, %v3241_v59 }
  0xcb   : > { %vm2749_vm5 = vmpackc.low %vm645_vm15, %vm641_vm14  ;;  %vm651_vm15 = vcmp.eq.s32.totalorder %v3464_v38, %v3272_v4 }
  0xd4   : > { %v1137_v39 = vpop.f32.mrf.mxu0 }
  0xd5   : > { %v1186_v50 = vpop.f32.mrf.mxu1 }
  0xd6   : > { %v1187_v52 = vadd.f32 %v1186_v50, %v1137_v39 }
  0xd7   : > { %2732 = vmatmul.msk.bf16.vlgmr.msrb.gmra.mxu0 %vm2731_vm6, %v3042_v51  ;;  %vm2765_vm6 = vmpackc.low %vm646_vm1, %vm642_vm0  ;;  %vm655_vm0 = vcmp.eq.s32.totalorder %v3464_v38, %v3275_v5 }
  0xd8   : > { %2748 = vmatmul.msk.bf16.vlgmr.msrb.gmra.mxu1 %vm2747_vm9, %v3042_v51  ;;  %vm652_vm9 = vcmp.eq.s32.totalorder %v3458_v26, %v3275_v5  ;;  %vm2783_vm3 = vmpackc.low %vm655_vm0, %vm651_vm15  ;;  %vm664_vm0 = vcmp.eq.s32.totalorder %v3458_v26, %v3336_v21 }
  0xd9   : > { %2764 = vmatmul.msk.bf16.vlgmr.msrb.gmra.mxu2 %vm2763_vm10, %v3042_v51  ;;  %vm649_vm10 = vcmp.eq.s32.totalorder %v3460_v32, %v3272_v4  ;;  %vm2735_vm14 = vmpackc.low %vm652_vm9, %vm648_vm8  ;;  %vm658_vm8 = vcmp.eq.s32.totalorder %v3462_v35, %v3304_v12  ;;  %vm662_vm9 = vcmp.eq.s32.totalorder %v3462_v35, %v3307_v13 }
  0xda   : > { %2780 = vmatmul.msk.bf16.vlgmr.msrb.gmra.mxu3 %vm2779_vm11, %v3042_v51  ;;  %vm653_vm11 = vcmp.eq.s32.totalorder %v3460_v32, %v3275_v5 }
  0xdb   : > { %vm2751_vm1 = vmpackc.low %vm653_vm11, %vm649_vm10  ;;  %vm659_vm11 = vcmp.eq.s32.totalorder %v3464_v38, %v3304_v12 }
  0xdc   : > { %v1235_v53 = vpop.f32.mrf.mxu2  ;;  %v1139_v55 = vpop.f32.mrf.mxu0 }
  0xdd   : > { %v1284_v54 = vpop.f32.mrf.mxu3  ;;  %v1236_v30 = vadd.f32 %v1235_v53, %v1187_v52  ;;  %v1188_v56 = vpop.f32.mrf.mxu1 }
  0xde   : > { %v1189_v61 = vadd.f32 %v1188_v56, %v1139_v55 }
  0xdf   : > { %v1285_v57 = vadd.f32 %v1284_v54, %v1236_v30  ;;  %v861_v54 = vld [vmem:[#allocation2 + $0xe8] sm:$0xff] }
  0xe1   : > { %v1324_v60 = vadd.f32 %v1285_v57, %v856_v31 }
  0xe3   : > { %1340 = vst [vmem:[#allocation2 + $0xb0] sm:$0xff] %v1324_v60 }
  0xe4   : > { %v1237_v62 = vpop.f32.mrf.mxu2  ;;  %v1142_v1 = vpop.f32.mrf.mxu0 }
  0xe5   : > { %v1286_v63 = vpop.f32.mrf.mxu3  ;;  %v1238_v0 = vadd.f32 %v1237_v62, %v1189_v61  ;;  %v1191_v2 = vpop.f32.mrf.mxu1  ;;  %v862_v61 = vld [vmem:[#allocation2 + $0x60] sm:$0xff] }
  0xe6   : > { %v1192_v8 = vadd.f32 %v1191_v2, %v1142_v1 }
  0xe7   : > { %v1287_v6 = vadd.f32 %v1286_v63, %v1238_v0  ;;  %2734 = vmatmul.msk.bf16.gmra.mxu0 %vm2733_vm2, %v3042_v51  ;;  %vm2767_vm2 = vmpackc.low %vm654_vm13, %vm650_vm12  ;;  %vm663_vm12 = vcmp.eq.s32.totalorder %v3464_v38, %v3307_v13 }
  0xe8   : > { %2750 = vmatmul.msk.bf16.gmra.mxu1 %vm2749_vm5, %v3042_v51  ;;  %vm660_vm5 = vcmp.eq.s32.totalorder %v3458_v26, %v3307_v13  ;;  %vm2785_vm15 = vmpackc.low %vm663_vm12, %vm659_vm11  ;;  %vm672_vm12 = vcmp.eq.s32.totalorder %v3458_v26, %v3368_v33 }
  0xe9   : > { %v1325_v7 = vadd.f32 %v1287_v6, %v857_v3  ;;  %2766 = vmatmul.msk.bf16.gmra.mxu2 %vm2765_vm6, %v3042_v51  ;;  %vm657_vm6 = vcmp.eq.s32.totalorder %v3460_v32, %v3304_v12  ;;  %vm2737_vm10 = vmpackc.low %vm660_vm5, %vm656_vm4  ;;  %vm666_vm4 = vcmp.eq.s32.totalorder %v3462_v35, %v3336_v21  ;;  %vm670_vm5 = vcmp.eq.s32.totalorder %v3462_v35, %v3339_v22 }
  0xea   : > { %2782 = vmatmul.msk.bf16.gmra.mxu3 %vm2781_vm7, %v3042_v51  ;;  %vm661_vm7 = vcmp.eq.s32.totalorder %v3460_v32, %v3307_v13 }
  0xeb   : > { %1341 = vst [vmem:[#allocation2 + $0xd8] sm:$0xff] %v1325_v7  ;;  %vm2753_vm13 = vmpackc.low %vm661_vm7, %vm657_vm6  ;;  %vm667_vm7 = vcmp.eq.s32.totalorder %v3464_v38, %v3336_v21 }
  0xec   : > { %v1240_v58 = vpop.f32.mrf.mxu2  ;;  %v1144_v10 = vpop.f32.mrf.mxu0 }
  0xed   : > { %v1289_v59 = vpop.f32.mrf.mxu3  ;;  %v1241_v9 = vadd.f32 %v1240_v58, %v1192_v8  ;;  %v1193_v11 = vpop.f32.mrf.mxu1  ;;  %v863_v8 = vld [vmem:[#allocation2 + $0x8] sm:$0xff] }
  0xee   : > { %v1194_v17 = vadd.f32 %v1193_v11, %v1144_v10 }
  0xef   : > { %v1290_v15 = vadd.f32 %v1289_v59, %v1241_v9 }
  0xf1   : > { %v1326_v16 = vadd.f32 %v1290_v15, %v858_v14  ;;  %v864_v15 = vld [vmem:[#allocation2 + $0x38] sm:$0xff] }
  0xf3   : > { %1342 = vst [vmem:[#allocation2 + $0x50] sm:$0xff] %v1326_v16 }
  0xf4   : > { %v1242_v19 = vpop.f32.mrf.mxu2  ;;  %v1147_v24 = vpop.f32.mrf.mxu0 }
  0xf5   : > { %v1291_v20 = vpop.f32.mrf.mxu3  ;;  %v1243_v23 = vadd.f32 %v1242_v19, %v1194_v17  ;;  %v1196_v25 = vpop.f32.mrf.mxu1 }
  0xf6   : > { %v1197_v36 = vadd.f32 %v1196_v25, %v1147_v24 }
  0xf7   : > { %v1292_v28 = vadd.f32 %v1291_v20, %v1243_v23  ;;  %2736 = vmatmul.msk.bf16.gmra.mxu0 %vm2735_vm14, %v3042_v51  ;;  %vm2769_vm14 = vmpackc.low %vm662_vm9, %vm658_vm8  ;;  %vm671_vm8 = vcmp.eq.s32.totalorder %v3464_v38, %v3339_v22 }
  0xf8   : > { %2752 = vmatmul.msk.bf16.gmra.mxu1 %vm2751_vm1, %v3042_v51  ;;  %vm668_vm1 = vcmp.eq.s32.totalorder %v3458_v26, %v3339_v22  ;;  %vm2787_vm11 = vmpackc.low %vm671_vm8, %vm667_vm7  ;;  %vm680_vm8 = vcmp.eq.s32.totalorder %v3458_v26, %v3400_v44 }
  0xf9   : > { %v1327_v29 = vadd.f32 %v1292_v28, %v859_v27  ;;  %2768 = vmatmul.msk.bf16.gmra.mxu2 %vm2767_vm2, %v3042_v51  ;;  %vm665_vm2 = vcmp.eq.s32.totalorder %v3460_v32, %v3336_v21  ;;  %vm2739_vm6 = vmpackc.low %vm668_vm1, %vm664_vm0  ;;  %vm674_vm0 = vcmp.eq.s32.totalorder %v3462_v35, %v3368_v33  ;;  %vm678_vm1 = vcmp.eq.s32.totalorder %v3462_v35, %v3371_v34  ;;  %v865_v28 = vld [vmem:[#allocation2 + $0x40] sm:$0xff] }
  0xfa   : > { %2784 = vmatmul.msk.bf16.gmra.mxu3 %vm2783_vm3, %v3042_v51  ;;  %vm669_vm3 = vcmp.eq.s32.totalorder %v3460_v32, %v3339_v22 }
  0xfb   : > { %1343 = vst [vmem:[#allocation2 + $0x30] sm:$0xff] %v1327_v29  ;;  %vm2755_vm9 = vmpackc.low %vm669_vm3, %vm665_vm2  ;;  %vm675_vm3 = vcmp.eq.s32.totalorder %v3464_v38, %v3368_v33 }
  0xfc   : > { %v1245_v4 = vpop.f32.mrf.mxu2  ;;  %v1149_v40 = vpop.f32.mrf.mxu0 }
  0xfd   : > { %v1294_v5 = vpop.f32.mrf.mxu3  ;;  %v1246_v37 = vadd.f32 %v1245_v4, %v1197_v36  ;;  %v1198_v41 = vpop.f32.mrf.mxu1 }
  0xfe   : > { %v1199_v47 = vadd.f32 %v1198_v41, %v1149_v40  ;;  %v866_v41 = vld [vmem:[#allocation2 + $0xe0] sm:$0xff] }
  0xff   : > { %v1295_v43 = vadd.f32 %v1294_v5, %v1246_v37 }
 0x101   : > { %v1328_v46 = vadd.f32 %v1295_v43, %v860_v42 }
 0x103   : > { %1344 = vst [vmem:[#allocation2 + $0x80] sm:$0xff] %v1328_v46 }
 0x104   : > { %v1247_v18 = vpop.f32.mrf.mxu2  ;;  %v1152_v52 = vpop.f32.mrf.mxu0 }
 0x105   : > { %v1296_v39 = vpop.f32.mrf.mxu3  ;;  %v1248_v50 = vadd.f32 %v1247_v18, %v1199_v47  ;;  %v1201_v53 = vpop.f32.mrf.mxu1 }
 0x106   : > { %v1202_v56 = vadd.f32 %v1201_v53, %v1152_v52  ;;  %v867_v53 = vld [vmem:[#allocation2 + $0x70] sm:$0xff] }
 0x107   : > { %v1297_v30 = vadd.f32 %v1296_v39, %v1248_v50  ;;  %2738 = vmatmul.msk.bf16.gmra.mxu0 %vm2737_vm10, %v3042_v51  ;;  %vm2771_vm10 = vmpackc.low %vm670_vm5, %vm666_vm4  ;;  %vm679_vm4 = vcmp.eq.s32.totalorder %v3464_v38, %v3371_v34 }
 0x108   : > { %2754 = vmatmul.msk.bf16.gmra.mxu1 %vm2753_vm13, %v3042_v51  ;;  %vm676_vm13 = vcmp.eq.s32.totalorder %v3458_v26, %v3371_v34  ;;  %vm2789_vm7 = vmpackc.low %vm679_vm4, %vm675_vm3  ;;  %vm688_vm4 = vcmp.eq.s32.totalorder %v3458_v26, %v3428_v48 }
 0x109   : > { %v1329_v55 = vadd.f32 %v1297_v30, %v861_v54  ;;  %2770 = vmatmul.msk.bf16.gmra.mxu2 %vm2769_vm14, %v3042_v51  ;;  %vm673_vm14 = vcmp.eq.s32.totalorder %v3460_v32, %v3368_v33  ;;  %vm2741_vm2 = vmpackc.low %vm676_vm13, %vm672_vm12  ;;  %vm682_vm12 = vcmp.eq.s32.totalorder %v3462_v35, %v3400_v44  ;;  %vm686_vm13 = vcmp.eq.s32.totalorder %v3462_v35, %v3403_v45 }
 0x10a   : > { %2786 = vmatmul.msk.bf16.gmra.mxu3 %vm2785_vm15, %v3042_v51  ;;  %vm677_vm15 = vcmp.eq.s32.totalorder %v3460_v32, %v3371_v34 }
 0x10b   : > { %1345 = vst [vmem:[#allocation2 + $0xe8] sm:$0xff] %v1329_v55  ;;  %vm2757_vm5 = vmpackc.low %vm677_vm15, %vm673_vm14  ;;  %vm683_vm15 = vcmp.eq.s32.totalorder %v3464_v38, %v3400_v44 }
 0x10c   : > { %v1250_v12 = vpop.f32.mrf.mxu2  ;;  %v1154_v57 = vpop.f32.mrf.mxu0 }
 0x10d   : > { %v1299_v13 = vpop.f32.mrf.mxu3  ;;  %v1251_v31 = vadd.f32 %v1250_v12, %v1202_v56  ;;  %v1203_v60 = vpop.f32.mrf.mxu1 }
 0x10e   : > { %v1204_v0 = vadd.f32 %v1203_v60, %v1154_v57 }
 0x10f   : > { %v1300_v62 = vadd.f32 %v1299_v13, %v1251_v31  ;;  %v868_v31 = vld [vmem:[#allocation2 + $0xa8] sm:$0xff] }
 0x111   : > { %v1330_v63 = vadd.f32 %v1300_v62, %v862_v61 }
 0x113   : > { %1346 = vst [vmem:[#allocation2 + $0x60] sm:$0xff] %v1330_v63 }
 0x114   : > { %v1252_v1 = vpop.f32.mrf.mxu2  ;;  %v1157_v6 = vpop.f32.mrf.mxu0 }
 0x115   : > { %v1301_v2 = vpop.f32.mrf.mxu3  ;;  %v1253_v3 = vadd.f32 %v1252_v1, %v1204_v0  ;;  %v1206_v7 = vpop.f32.mrf.mxu1  ;;  %v869_v1 = vld [vmem:[#allocation2 + $0x10] sm:$0xff] }
 0x116   : > { %v1207_v9 = vadd.f32 %v1206_v7, %v1157_v6 }
 0x117   : > { %v1302_v58 = vadd.f32 %v1301_v2, %v1253_v3  ;;  %2740 = vmatmul.msk.bf16.gmra.mxu0 %vm2739_vm6, %v3042_v51  ;;  %vm2773_vm6 = vmpackc.low %vm678_vm1, %vm674_vm0  ;;  %vm687_vm0 = vcmp.eq.s32.totalorder %v3464_v38, %v3403_v45 }
 0x118   : > { %2756 = vmatmul.msk.bf16.gmra.mxu1 %vm2755_vm9, %v3042_v51  ;;  %vm684_vm9 = vcmp.eq.s32.totalorder %v3458_v26, %v3403_v45  ;;  %vm2791_vm3 = vmpackc.low %vm687_vm0, %vm683_vm15 }
 0x119   : > { %v1331_v59 = vadd.f32 %v1302_v58, %v863_v8  ;;  %2772 = vmatmul.msk.bf16.gmra.mxu2 %vm2771_vm10, %v3042_v51  ;;  %vm681_vm10 = vcmp.eq.s32.totalorder %v3460_v32, %v3400_v44  ;;  %vm2743_vm14 = vmpackc.low %vm684_vm9, %vm680_vm8  ;;  %vm690_vm8 = vcmp.eq.s32.totalorder %v3462_v35, %v3428_v48  ;;  %vm694_vm9 = vcmp.eq.s32.totalorder %v3462_v35, %v3431_v49  ;;  %v870_v8 = vld [vmem:[#allocation2 + $0xa0] sm:$0xff] }
 0x11a   : > { %2788 = vmatmul.msk.bf16.gmra.mxu3 %vm2787_vm11, %v3042_v51  ;;  %vm685_vm11 = vcmp.eq.s32.totalorder %v3460_v32, %v3403_v45 }
 0x11b   : > { %1347 = vst [vmem:[#allocation2 + $0x8] sm:$0xff] %v1331_v59  ;;  %vm2759_vm1 = vmpackc.low %vm685_vm11, %vm681_vm10  ;;  %vm691_vm11 = vcmp.eq.s32.totalorder %v3464_v38, %v3428_v48 }
 0x11c   : > { %v1255_v21 = vpop.f32.mrf.mxu2  ;;  %v1159_v11 = vpop.f32.mrf.mxu0 }
 0x11d   : > { %v1304_v22 = vpop.f32.mrf.mxu3  ;;  %v1256_v10 = vadd.f32 %v1255_v21, %v1207_v9  ;;  %v1208_v14 = vpop.f32.mrf.mxu1 }
 0x11e   : > { %v1209_v19 = vadd.f32 %v1208_v14, %v1159_v11 }
 0x11f   : > { %v1305_v16 = vadd.f32 %v1304_v22, %v1256_v10 }
 0x121   : > { %v1332_v17 = vadd.f32 %v1305_v16, %v864_v15  ;;  %v871_v15 = vld [vmem:[#allocation2 + $0x20] sm:$0xff] }
 0x123   : > { %1348 = vst [vmem:[#allocation2 + $0x38] sm:$0xff] %v1332_v17 }
 0x124   : > { %v1257_v20 = vpop.f32.mrf.mxu2  ;;  %v1162_v25 = vpop.f32.mrf.mxu0 }
 0x125   : > { %v1306_v23 = vpop.f32.mrf.mxu3  ;;  %v1258_v24 = vadd.f32 %v1257_v20, %v1209_v19  ;;  %v1211_v27 = vpop.f32.mrf.mxu1 }
 0x126   : > { %v1212_v4 = vadd.f32 %v1211_v27, %v1162_v25  ;;  %v1356_v27 = vld [vmem:[#allocation2] sm:$0xff] }
 0x127   : > { %v1307_v29 = vadd.f32 %v1306_v23, %v1258_v24  ;;  %2742 = vmatmul.msk.bf16.gmra.mxu0 %vm2741_vm2, %v3042_v51  ;;  %vm2775_vm2 = vmpackc.low %vm686_vm13, %vm682_vm12  ;;  %vm695_vm12 = vcmp.eq.s32.totalorder %v3464_v38, %v3431_v49 }
 0x128   : > { %2758 = vmatmul.msk.bf16.gmra.mxu1 %vm2757_vm5, %v3042_v51  ;;  %vm692_vm5 = vcmp.eq.s32.totalorder %v3458_v26, %v3431_v49  ;;  %vm2793_vm15 = vmpackc.low %vm695_vm12, %vm691_vm11 }
 0x129   : > { %v1333_v36 = vadd.f32 %v1307_v29, %v865_v28  ;;  %2774 = vmatmul.msk.bf16.gmra.mxu2 %vm2773_vm6, %v3042_v51  ;;  %vm689_vm6 = vcmp.eq.s32.totalorder %v3460_v32, %v3428_v48  ;;  %vm2745_vm10 = vmpackc.low %vm692_vm5, %vm688_vm4 }
 0x12a   : > { %2790 = vmatmul.msk.bf16.gmra.mxu3 %vm2789_vm7, %v3042_v51  ;;  %vm693_vm7 = vcmp.eq.s32.totalorder %v3460_v32, %v3431_v49 }
 0x12b   : > { %1349 = vst [vmem:[#allocation2 + $0x40] sm:$0xff] %v1333_v36  ;;  %vm2761_vm13 = vmpackc.low %vm693_vm7, %vm689_vm6 }
 0x12c   : > { %v1260_v33 = vpop.f32.mrf.mxu2  ;;  %v1164_v37 = vpop.f32.mrf.mxu0 }
 0x12d   : > { %v1309_v34 = vpop.f32.mrf.mxu3  ;;  %v1261_v5 = vadd.f32 %v1260_v33, %v1212_v4  ;;  %v1213_v40 = vpop.f32.mrf.mxu1 }
 0x12e   : > { %v1214_v46 = vadd.f32 %v1213_v40, %v1164_v37  ;;  %v1357_v40 = vld [vmem:[#allocation2 + $0x18] sm:$0xff] }
 0x12f   : > { %v1310_v42 = vadd.f32 %v1309_v34, %v1261_v5 }
 0x131   : > { %v1334_v43 = vadd.f32 %v1310_v42, %v866_v41 }
 0x133   : > { %1350 = vst [vmem:[#allocation2 + $0xe0] sm:$0xff] %v1334_v43 }
 0x134   : > { %v1262_v47 = vpop.f32.mrf.mxu2  ;;  %v1167_v50 = vpop.f32.mrf.mxu0 }
 0x135   : > { %v1311_v18 = vpop.f32.mrf.mxu3  ;;  %v1263_v39 = vadd.f32 %v1262_v47, %v1214_v46  ;;  %v1216_v52 = vpop.f32.mrf.mxu1 }
 0x136   : > { %v1217_v55 = vadd.f32 %v1216_v52, %v1167_v50  ;;  %v1358_v52 = vld [vmem:[#allocation2 + $0x68] sm:$0xff] }
 0x137   : > { %v1312_v54 = vadd.f32 %v1311_v18, %v1263_v39  ;;  %2744 = vmatmul.msk.bf16.gmra.mxu0 %vm2743_vm14, %v3042_v51  ;;  %vm2777_vm14 = vmpackc.low %vm694_vm9, %vm690_vm8 }
 0x138   : > { %2760 = vmatmul.msk.bf16.gmra.mxu1 %vm2759_vm1, %v3042_v51 }
 0x139   : > { %v1335_v30 = vadd.f32 %v1312_v54, %v867_v53  ;;  %2776 = vmatmul.msk.bf16.gmra.mxu2 %vm2775_vm2, %v3042_v51 }
 0x13a   : > { %2792 = vmatmul.msk.bf16.gmra.mxu3 %vm2791_vm3, %v3042_v51 }
 0x13b   : > { %1351 = vst [vmem:[#allocation2 + $0x70] sm:$0xff] %v1335_v30 }
 0x13c   : > { %v1265_v44 = vpop.f32.mrf.mxu2  ;;  %v1169_v12 = vpop.f32.mrf.mxu0 }
 0x13d   : > { %v1314_v45 = vpop.f32.mrf.mxu3  ;;  %v1266_v56 = vadd.f32 %v1265_v44, %v1217_v55  ;;  %v1218_v13 = vpop.f32.mrf.mxu1 }
 0x13e   : > { %v1219_v61 = vadd.f32 %v1218_v13, %v1169_v12  ;;  %v1359_v13 = vld [vmem:[#allocation2 + $0x48] sm:$0xff] }
 0x13f   : > { %v1315_v57 = vadd.f32 %v1314_v45, %v1266_v56 }
 0x141   : > { %v1336_v60 = vadd.f32 %v1315_v57, %v868_v31 }
 0x143   : > { %1352 = vst [vmem:[#allocation2 + $0xa8] sm:$0xff] %v1336_v60 }
 0x144   : > { %v1267_v26 = vpop.f32.mrf.mxu2  ;;  %v1172_v32 = vpop.f32.mrf.mxu0 }
 0x145   : > { %v1316_v62 = vpop.f32.mrf.mxu3  ;;  %v1268_v63 = vadd.f32 %v1267_v26, %v1219_v61  ;;  %v1221_v0 = vpop.f32.mrf.mxu1 }
 0x146   : > { %v1222_v3 = vadd.f32 %v1221_v0, %v1172_v32  ;;  %v1360_v0 = vld [vmem:[#allocation2 + $0x88] sm:$0xff] }
 0x147   : > { %v1317_v2 = vadd.f32 %v1316_v62, %v1268_v63  ;;  %2746 = vmatmul.msk.bf16.gmra.mxu0 %vm2745_vm10, %v3042_v51 }
 0x148   : > { %2762 = vmatmul.msk.bf16.gmra.mxu1 %vm2761_vm13, %v3042_v51 }
 0x149   : > { %v1337_v35 = vadd.f32 %v1317_v2, %v869_v1  ;;  %2778 = vmatmul.msk.bf16.gmra.mxu2 %vm2777_vm14, %v3042_v51 }
 0x14a   : > { %2794 = vmatmul.msk.bf16.gmra.mxu3 %vm2793_vm15, %v3042_v51 }
 0x14b   : > { %1353 = vst [vmem:[#allocation2 + $0x10] sm:$0xff] %v1337_v35 }
 0x14c   : > { %v1270_v48 = vpop.f32.mrf.mxu2  ;;  %v1174_v6 = vpop.f32.mrf.mxu0 }
 0x14d   : > { %v1319_v49 = vpop.f32.mrf.mxu3  ;;  %v1271_v38 = vadd.f32 %v1270_v48, %v1222_v3  ;;  %v1223_v7 = vpop.f32.mrf.mxu1 }
 0x14e   : > { %v1224_v9 = vadd.f32 %v1223_v7, %v1174_v6  ;;  %v1361_v7 = vld [vmem:[#allocation2 + $0xb8] sm:$0xff] }
 0x14f   : > { %v1320_v58 = vadd.f32 %v1319_v49, %v1271_v38 }
 0x151   : > { %v1338_v59 = vadd.f32 %v1320_v58, %v870_v8 }
 0x153   : > { %1354 = vst [vmem:[#allocation2 + $0xa0] sm:$0xff] %v1338_v59 }
 0x154   : > { %v1272_v21 = vpop.f32.mrf.mxu2  ;;  %v1637_v11 = vpop.f32.mrf.mxu0 }
 0x155   : > { %v1321_v22 = vpop.f32.mrf.mxu3  ;;  %v1273_v10 = vadd.f32 %v1272_v21, %v1224_v9  ;;  %v1686_v14 = vpop.f32.mrf.mxu1 }
 0x156   : > { %v1687_v51 = vadd.f32 %v1686_v14, %v1637_v11  ;;  %v1362_v14 = vld [vmem:[#allocation2 + $0xf0] sm:$0xff] }
 0x157   : > { %v1322_v16 = vadd.f32 %v1321_v22, %v1273_v10 }
 0x159   : > { %v1339_v17 = vadd.f32 %v1322_v16, %v871_v15 }
 0x15b   : > { %1355 = vst [vmem:[#allocation2 + $0x20] sm:$0xff] %v1339_v17 }
 0x15c   : > { %v1735_v19 = vpop.f32.mrf.mxu2  ;;  %v1639_v24 = vpop.f32.mrf.mxu0 }
 0x15d   : > { %v1784_v20 = vpop.f32.mrf.mxu3  ;;  %v1736_v23 = vadd.f32 %v1735_v19, %v1687_v51  ;;  %v1688_v25 = vpop.f32.mrf.mxu1 }
 0x15e   : > { %v1689_v36 = vadd.f32 %v1688_v25, %v1639_v24  ;;  %v1363_v25 = vld [vmem:[#allocation2 + $0x78] sm:$0xff] }
 0x15f   : > { %v1785_v28 = vadd.f32 %v1784_v20, %v1736_v23 }
 0x161   : > { %v1824_v29 = vadd.f32 %v1785_v28, %v1356_v27 }
 0x163   : > { %1840 = vst [vmem:[#allocation2] sm:$0xff] %v1824_v29 }
 0x164   : > { %v1737_v4 = vpop.f32.mrf.mxu2  ;;  %v1642_v5 = vpop.f32.mrf.mxu0 }
 0x165   : > { %v1786_v33 = vpop.f32.mrf.mxu3  ;;  %v1738_v34 = vadd.f32 %v1737_v4, %v1689_v36  ;;  %v1691_v37 = vpop.f32.mrf.mxu1 }
 0x166   : > { %v1692_v43 = vadd.f32 %v1691_v37, %v1642_v5  ;;  %v1364_v37 = vld [vmem:[#allocation2 + $0x58] sm:$0xff] }
 0x167   : > { %v1787_v41 = vadd.f32 %v1786_v33, %v1738_v34 }
 0x169   : > { %v1825_v42 = vadd.f32 %v1787_v41, %v1357_v40 }
 0x16b   : > { %1841 = vst [vmem:[#allocation2 + $0x18] sm:$0xff] %v1825_v42 }
 0x16c   : > { %v1740_v46 = vpop.f32.mrf.mxu2  ;;  %v1644_v39 = vpop.f32.mrf.mxu0 }
 0x16d   : > { %v1789_v47 = vpop.f32.mrf.mxu3  ;;  %v1741_v18 = vadd.f32 %v1740_v46, %v1692_v43  ;;  %v1693_v50 = vpop.f32.mrf.mxu1 }
 0x16e   : > { %v1694_v30 = vadd.f32 %v1693_v50, %v1644_v39  ;;  %v1365_v50 = vld [vmem:[#allocation2 + $0xc8] sm:$0xff] }
 0x16f   : > { %v1790_v53 = vadd.f32 %v1789_v47, %v1741_v18 }
 0x171   : > { %v1826_v54 = vadd.f32 %v1790_v53, %v1358_v52 }
 0x173   : > { %1842 = vst [vmem:[#allocation2 + $0x68] sm:$0xff] %v1826_v54 }
 0x174   : > { %v1742_v55 = vpop.f32.mrf.mxu2  ;;  %v1647_v56 = vpop.f32.mrf.mxu0 }
 0x175   : > { %v1791_v44 = vpop.f32.mrf.mxu3  ;;  %v1743_v45 = vadd.f32 %v1742_v55, %v1694_v30  ;;  %v1696_v12 = vpop.f32.mrf.mxu1 }
 0x176   : > { %v1697_v60 = vadd.f32 %v1696_v12, %v1647_v56  ;;  %v1366_v12 = vld [vmem:[#allocation2 + $0x90] sm:$0xff] }
 0x177   : > { %v1792_v31 = vadd.f32 %v1791_v44, %v1743_v45 }
 0x179   : > { %v1827_v57 = vadd.f32 %v1792_v31, %v1359_v13 }
 0x17b   : > { %1843 = vst [vmem:[#allocation2 + $0x48] sm:$0xff] %v1827_v57 }
 0x17c   : > { %v1745_v61 = vpop.f32.mrf.mxu2  ;;  %v1649_v63 = vpop.f32.mrf.mxu0 }
 0x17d   : > { %v1794_v26 = vpop.f32.mrf.mxu3  ;;  %v1746_v62 = vadd.f32 %v1745_v61, %v1697_v60  ;;  %v1698_v32 = vpop.f32.mrf.mxu1 }
 0x17e   : > { %v1699_v35 = vadd.f32 %v1698_v32, %v1649_v63  ;;  %v1367_v32 = vld [vmem:[#allocation2 + $0xc0] sm:$0xff] }
 0x17f   : > { %v1795_v1 = vadd.f32 %v1794_v26, %v1746_v62 }
 0x181   : > { %v1828_v2 = vadd.f32 %v1795_v1, %v1360_v0 }
 0x183   : > { %1844 = vst [vmem:[#allocation2 + $0x88] sm:$0xff] %v1828_v2 }
 0x184   : > { %v1747_v3 = vpop.f32.mrf.mxu2  ;;  %v1652_v38 = vpop.f32.mrf.mxu0 }
 0x185   : > { %v1796_v48 = vpop.f32.mrf.mxu3  ;;  %v1748_v49 = vadd.f32 %v1747_v3, %v1699_v35  ;;  %v1701_v6 = vpop.f32.mrf.mxu1 }
 0x186   : > { %v1702_v59 = vadd.f32 %v1701_v6, %v1652_v38  ;;  %v1368_v6 = vld [vmem:[#allocation2 + $0xd0] sm:$0xff] }
 0x187   : > { %v1797_v8 = vadd.f32 %v1796_v48, %v1748_v49 }
 0x189   : > { %v1829_v58 = vadd.f32 %v1797_v8, %v1361_v7 }
 0x18b   : > { %1845 = vst [vmem:[#allocation2 + $0xb8] sm:$0xff] %v1829_v58 }
 0x18c   : > { %v1750_v9 = vpop.f32.mrf.mxu2  ;;  %v1654_v10 = vpop.f32.mrf.mxu0 }
 0x18d   : > { %v1799_v21 = vpop.f32.mrf.mxu3  ;;  %v1751_v22 = vadd.f32 %v1750_v9, %v1702_v59  ;;  %v1703_v11 = vpop.f32.mrf.mxu1 }
 0x18e   : > { %v1704_v17 = vadd.f32 %v1703_v11, %v1654_v10 }
 0x18f   : > { %v1800_v15 = vadd.f32 %v1799_v21, %v1751_v22  ;;  %v1369_v22 = vld [vmem:[#allocation2 + $0x28] sm:$0xff] }
 0x191   : > { %v1830_v16 = vadd.f32 %v1800_v15, %v1362_v14 }
 0x193   : > { %1846 = vst [vmem:[#allocation2 + $0xf0] sm:$0xff] %v1830_v16 }
 0x194   : > { %v1752_v51 = vpop.f32.mrf.mxu2  ;;  %v1657_v23 = vpop.f32.mrf.mxu0 }
 0x195   : > { %v1801_v19 = vpop.f32.mrf.mxu3  ;;  %v1753_v20 = vadd.f32 %v1752_v51, %v1704_v17  ;;  %v1706_v24 = vpop.f32.mrf.mxu1 }
 0x196   : > { %v1707_v29 = vadd.f32 %v1706_v24, %v1657_v23 }
 0x197   : > { %v1802_v27 = vadd.f32 %v1801_v19, %v1753_v20  ;;  %v1370_v20 = vld [vmem:[#allocation2 + $0xf8] sm:$0xff] }
 0x199   : > { %v1831_v28 = vadd.f32 %v1802_v27, %v1363_v25 }
 0x19b   : > { %1847 = vst [vmem:[#allocation2 + $0x78] sm:$0xff] %v1831_v28 }
 0x19c   : > { %v1755_v36 = vpop.f32.mrf.mxu2  ;;  %v1659_v34 = vpop.f32.mrf.mxu0 }
 0x19d   : > { %v1804_v4 = vpop.f32.mrf.mxu3  ;;  %v1756_v33 = vadd.f32 %v1755_v36, %v1707_v29  ;;  %v1708_v5 = vpop.f32.mrf.mxu1 }
 0x19e   : > { %v1709_v42 = vadd.f32 %v1708_v5, %v1659_v34 }
 0x19f   : > { %v1805_v40 = vadd.f32 %v1804_v4, %v1756_v33  ;;  %v1371_v4 = vld [vmem:[#allocation2 + $0x98] sm:$0xff] }
 0x1a1   : > { %v1832_v41 = vadd.f32 %v1805_v40, %v1364_v37 }
 0x1a3   : > { %1848 = vst [vmem:[#allocation2 + $0x58] sm:$0xff] %v1832_v41 }
 0x1a4   : > { %v1757_v43 = vpop.f32.mrf.mxu2  ;;  %v1662_v18 = vpop.f32.mrf.mxu0 }
 0x1a5   : > { %v1806_v46 = vpop.f32.mrf.mxu3  ;;  %v1758_v47 = vadd.f32 %v1757_v43, %v1709_v42  ;;  %v1711_v39 = vpop.f32.mrf.mxu1 }
 0x1a6   : > { %v1712_v54 = vadd.f32 %v1711_v39, %v1662_v18 }
 0x1a7   : > { %v1807_v52 = vadd.f32 %v1806_v46, %v1758_v47 }
 0x1a9   : > { %v1833_v53 = vadd.f32 %v1807_v52, %v1365_v50 }
 0x1ab   : > { %1849 = vst [vmem:[#allocation2 + $0xc8] sm:$0xff] %v1833_v53 }
 0x1ac   : > { %v1760_v30 = vpop.f32.mrf.mxu2  ;;  %v1664_v45 = vpop.f32.mrf.mxu0 }
 0x1ad   : > { %v1809_v55 = vpop.f32.mrf.mxu3  ;;  %v1761_v44 = vadd.f32 %v1760_v30, %v1712_v54  ;;  %v1713_v56 = vpop.f32.mrf.mxu1 }
 0x1ae   : > { %v1714_v57 = vadd.f32 %v1713_v56, %v1664_v45 }
 0x1af   : > { %v1810_v13 = vadd.f32 %v1809_v55, %v1761_v44 }
 0x1b1   : > { %v1834_v31 = vadd.f32 %v1810_v13, %v1366_v12 }
 0x1b3   : > { %1850 = vst [vmem:[#allocation2 + $0x90] sm:$0xff] %v1834_v31 }
 0x1b4   : > { %v1762_v60 = vpop.f32.mrf.mxu2  ;;  %v1667_v62 = vpop.f32.mrf.mxu0 }
 0x1b5   : > { %v1811_v61 = vpop.f32.mrf.mxu3  ;;  %v1763_v26 = vadd.f32 %v1762_v60, %v1714_v57  ;;  %v1716_v63 = vpop.f32.mrf.mxu1 }
 0x1b6   : > { %v1717_v2 = vadd.f32 %v1716_v63, %v1667_v62 }
 0x1b7   : > { %v1812_v0 = vadd.f32 %v1811_v61, %v1763_v26 }
 0x1b9   : > { %v1835_v1 = vadd.f32 %v1812_v0, %v1367_v32 }
 0x1bb   : > { %1851 = vst [vmem:[#allocation2 + $0xc0] sm:$0xff] %v1835_v1 }
 0x1bc   : > { %v1765_v35 = vpop.f32.mrf.mxu2  ;;  %v1669_v49 = vpop.f32.mrf.mxu0 }
 0x1bd   : > { %v1814_v3 = vpop.f32.mrf.mxu3  ;;  %v1766_v48 = vadd.f32 %v1765_v35, %v1717_v2  ;;  %v1718_v38 = vpop.f32.mrf.mxu1 }
 0x1be   : > { %v1719_v58 = vadd.f32 %v1718_v38, %v1669_v49 }
 0x1bf   : > { %v1815_v7 = vadd.f32 %v1814_v3, %v1766_v48 }
 0x1c1   : > { %v1836_v8 = vadd.f32 %v1815_v7, %v1368_v6 }
 0x1c3   : > { %1852 = vst [vmem:[#allocation2 + $0xd0] sm:$0xff] %v1836_v8 }
 0x1c4   : > { %v1767_v59 = vpop.f32.mrf.mxu2  ;;  %v1672_v10 = vpop.f32.mrf.mxu0 }
 0x1c5   : > { %v1816_v9 = vpop.f32.mrf.mxu3  ;;  %v1768_v21 = vadd.f32 %v1767_v59, %v1719_v58  ;;  %v1721_v11 = vpop.f32.mrf.mxu1 }
 0x1c6   : > { %v1722_v16 = vadd.f32 %v1721_v11, %v1672_v10 }
 0x1c7   : > { %v1817_v14 = vadd.f32 %v1816_v9, %v1768_v21 }
 0x1c9   : > { %v1837_v15 = vadd.f32 %v1817_v14, %v1369_v22 }
 0x1cb   : > { %1853 = vst [vmem:[#allocation2 + $0x28] sm:$0xff] %v1837_v15 }
 0x1cc   : > { %v1770_v17 = vpop.f32.mrf.mxu2  ;;  %v1674_v24 = vpop.f32.mrf.mxu0 }
 0x1cd   : > { %v1819_v51 = vpop.f32.mrf.mxu3  ;;  %v1771_v19 = vadd.f32 %v1770_v17, %v1722_v16  ;;  %v1723_v25 = vpop.f32.mrf.mxu1 }
 0x1ce   : > { %v1724_v28 = vadd.f32 %v1723_v25, %v1674_v24 }
 0x1cf   : > { %v1820_v23 = vadd.f32 %v1819_v51, %v1771_v19 }
 0x1d1   : > { %v1838_v27 = vadd.f32 %v1820_v23, %v1370_v20 }
 0x1d3   : > { %1854 = vst [vmem:[#allocation2 + $0xf8] sm:$0xff] %v1838_v27 }
 0x1d4   : > { %v1772_v29 = vpop.f32.mrf.mxu2 }
 0x1d5   : > { %v1773_v36 = vadd.f32 %v1772_v29, %v1724_v28  ;;  %v1821_v33 = vpop.f32.mrf.mxu3 }
 0x1d7   : > { %v1822_v34 = vadd.f32 %v1821_v33, %v1773_v36  ;;  %1859 = sbr.rel (%p2795_p9) target bundleno = 703 (0x2bf), region = 52 }
 0x1d9   : > { %v1839_v5 = vadd.f32 %v1822_v34, %v1371_v4 }
 0x1db   : > { %1855 = vst [vmem:[#allocation2 + $0x98] sm:$0xff] %v1839_v5 }
 0x1dc   : > { %v2933_v37 = vld [vmem:[%s3731_s4 + $0x38] sm:$0xff]  ;;  %v2932_v41 = vld [vmem:[%s3731_s4 + $0x30] sm:$0xff]  ;;  %v2931_v43 = vld [vmem:[%s3731_s4 + $0x28] sm:$0xff] }
 0x1dd   : > { %v2941_v40 = vld [vmem:[%s3731_s4 + $0x78] sm:$0xff]  ;;  %2040 = vmatpush.bf16.msra.mxu0 %v2933_v37  ;;  %2942 = vmatpush.bf16.msra.mxu2 %v2933_v37  ;;  %v2940_v42 = vld [vmem:[%s3731_s4 + $0x70] sm:$0xff]  ;;  %v2939_v46 = vld [vmem:[%s3731_s4 + $0x68] sm:$0xff] }
 0x1de   : > { %2089 = vmatpush.bf16.msra.mxu1 %v2941_v40  ;;  %2950 = vmatpush.bf16.msra.mxu3 %v2941_v40  ;;  %v2930_v47 = vld [vmem:[%s3731_s4 + $0x20] sm:$0xff]  ;;  %v2929_v39 = vld [vmem:[%s3731_s4 + $0x18] sm:$0xff]  ;;  %v2928_v52 = vld [vmem:[%s3731_s4 + $0x10] sm:$0xff] }
 0x1df   : > { %v2938_v18 = vld [vmem:[%s3731_s4 + $0x60] sm:$0xff]  ;;  %v2937_v50 = vld [vmem:[%s3731_s4 + $0x58] sm:$0xff]  ;;  %v2936_v53 = vld [vmem:[%s3731_s4 + $0x50] sm:$0xff] }
 0x1e0   : > { %v2927_v54 = vld [vmem:[%s3731_s4 + $0x8] sm:$0xff]  ;;  %v2926_v55 = vld [vmem:[%s3731_s4] sm:$0xff]  ;;  %v1860_v45 = vld [vmem:[#allocation2 + $0xb0] sm:$0xff] }
 0x1e1   : > { %2041 = vmatpush.bf16.msra.mxu0 %v2932_v41  ;;  %2943 = vmatpush.bf16.msra.mxu2 %v2932_v41  ;;  %v2935_v30 = vld [vmem:[%s3731_s4 + $0x48] sm:$0xff]  ;;  %v2934_v44 = vld [vmem:[%s3731_s4 + $0x40] sm:$0xff]  ;;  %v1862_v56 = vld [vmem:[#allocation2 + $0xd8] sm:$0xff] }
 0x1e2   : > { %2090 = vmatpush.bf16.msra.mxu1 %v2940_v42  ;;  %2951 = vmatpush.bf16.msra.mxu3 %v2940_v42  ;;  %v1876_v12 = vld [vmem:[#allocation2 + $0x38] sm:$0xff]  ;;  %v1878_v13 = vld [vmem:[#allocation2 + $0x40] sm:$0xff]  ;;  %v1879_v61 = vld [vmem:[#allocation2 + $0xc8] sm:$0xff]  ;;  %v1892_v26 = vpack.c.bf16 %v1862_v56, %v1860_v45 }
 0x1e3   : > { %v1861_v31 = vld [vmem:[#allocation2] sm:$0xff]  ;;  %v1863_v57 = vld [vmem:[#allocation2 + $0x18] sm:$0xff]  ;;  %v1900_v62 = vpack.c.bf16 %v1878_v13, %v1876_v12  ;;  %v1864_v0 = vld [vmem:[#allocation2 + $0x50] sm:$0xff] }
 0x1e4   : > { %v1877_v60 = vld [vmem:[#allocation2 + $0x58] sm:$0xff]  ;;  %v1893_v63 = vpack.c.bf16 %v1863_v57, %v1861_v31  ;;  %v1866_v1 = vld [vmem:[#allocation2 + $0x30] sm:$0xff]  ;;  %v1880_v2 = vld [vmem:[#allocation2 + $0xe0] sm:$0xff] }
 0x1e5   : > { %2042 = vmatpush.bf16.msra.mxu0 %v2931_v43  ;;  %2944 = vmatpush.bf16.msra.mxu2 %v2931_v43  ;;  %v1901_v32 = vpack.c.bf16 %v1879_v61, %v1877_v60  ;;  %v1882_v35 = vld [vmem:[#allocation2 + $0x70] sm:$0xff]  ;;  %v1865_v3 = vld [vmem:[#allocation2 + $0x68] sm:$0xff]  ;;  %v1883_v38 = vld [vmem:[#allocation2 + $0xc0] sm:$0xff]  ;;  %v1894_v6 = vpack.c.bf16 %v1866_v1, %v1864_v0 }
 0x1e6   : > { %2091 = vmatpush.bf16.msra.mxu1 %v2939_v46  ;;  %2952 = vmatpush.bf16.msra.mxu3 %v2939_v46  ;;  %v1867_v48 = vld [vmem:[#allocation2 + $0x48] sm:$0xff]  ;;  %v1881_v49 = vld [vmem:[#allocation2 + $0x90] sm:$0xff]  ;;  %v1902_v7 = vpack.c.bf16 %v1882_v35, %v1880_v2  ;;  %v1868_v59 = vld [vmem:[#allocation2 + $0x80] sm:$0xff] }
 0x1e7   : > { %v1895_v8 = vpack.c.bf16 %v1867_v48, %v1865_v3  ;;  %v1903_v58 = vpack.c.bf16 %v1883_v38, %v1881_v49  ;;  %v1870_v9 = vld [vmem:[#allocation2 + $0xe8] sm:$0xff]  ;;  %v1886_v22 = vld [vmem:[#allocation2 + $0x10] sm:$0xff]  ;;  %v1871_v11 = vld [vmem:[#allocation2 + $0xb8] sm:$0xff] }
 0x1e8   : > { %v1884_v21 = vld [vmem:[#allocation2 + $0xa8] sm:$0xff]  ;;  %v1885_v14 = vld [vmem:[#allocation2 + $0xd0] sm:$0xff]  ;;  %v1896_v16 = vpack.c.bf16 %v1870_v9, %v1868_v59  ;;  %v1872_v20 = vld [vmem:[#allocation2 + $0x60] sm:$0xff] }
 0x1e9   : > { %2043 = vmatpush.bf16.msra.mxu0 %v2930_v47  ;;  %2945 = vmatpush.bf16.msra.mxu2 %v2930_v47  ;;  %v1869_v10 = vld [vmem:[#allocation2 + $0x88] sm:$0xff]  ;;  %v1904_v17 = vpack.c.bf16 %v1886_v22, %v1884_v21  ;;  %v1888_v24 = vld [vmem:[#allocation2 + $0xa0] sm:$0xff]  ;;  %v1873_v27 = vld [vmem:[#allocation2 + $0xf0] sm:$0xff] }
 0x1ea   : > { %2092 = vmatpush.bf16.msra.mxu1 %v2938_v18  ;;  %2953 = vmatpush.bf16.msra.mxu3 %v2938_v18  ;;  %v1887_v15 = vld [vmem:[#allocation2 + $0x28] sm:$0xff]  ;;  %v1897_v51 = vpack.c.bf16 %v1871_v11, %v1869_v10  ;;  %v1890_v25 = vld [vmem:[#allocation2 + $0x20] sm:$0xff]  ;;  %v1875_v28 = vld [vmem:[#allocation2 + $0x78] sm:$0xff] }
 0x1eb   : > { %v1905_v19 = vpack.c.bf16 %v1887_v15, %v1885_v14  ;;  %v1874_v23 = vld [vmem:[#allocation2 + $0x8] sm:$0xff]  ;;  %v1889_v29 = vld [vmem:[#allocation2 + $0xf8] sm:$0xff]  ;;  %v1906_v33 = vpack.c.bf16 %v1890_v25, %v1888_v24  ;;  %v1899_v34 = vpack.c.bf16 %v1875_v28, %v1873_v27  ;;  %v3678_v37 = vld [vmem:[%s3732_s5] ss:$0 sm:$0xff] }
 0x1ec   : > { %v1891_v36 = vld [vmem:[#allocation2 + $0x98] sm:$0xff]  ;;  %v1898_v4 = vpack.c.bf16 %v1874_v23, %v1872_v20 }
 0x1ed   : > { %2044 = vmatpush.bf16.msra.mxu0 %v2929_v39  ;;  %2946 = vmatpush.bf16.msra.mxu2 %v2929_v39  ;;  %v1907_v5 = vpack.c.bf16 %v1891_v36, %v1889_v29 }
 0x1ee   : > { %2093 = vmatpush.bf16.msra.mxu1 %v2937_v50  ;;  %2954 = vmatpush.bf16.msra.mxu3 %v2937_v50 }
 0x1f1   : > { %2045 = vmatpush.bf16.msra.mxu0 %v2928_v52  ;;  %2947 = vmatpush.bf16.msra.mxu2 %v2928_v52 }
 0x1f2   : > { %2094 = vmatpush.bf16.msra.mxu1 %v2936_v53  ;;  %2955 = vmatpush.bf16.msra.mxu3 %v2936_v53 }
 0x1f5   : > { %2046 = vmatpush.bf16.msra.mxu0 %v2927_v54  ;;  %2948 = vmatpush.bf16.msra.mxu2 %v2927_v54 }
 0x1f6   : > { %2095 = vmatpush.bf16.msra.mxu1 %v2935_v30  ;;  %2956 = vmatpush.bf16.msra.mxu3 %v2935_v30 }
 0x1f9   : > { %2047 = vmatpush.bf16.msra.mxu0 %v2926_v55  ;;  %2949 = vmatpush.bf16.msra.mxu2 %v2926_v55 }
 0x1fa   : > { %2096 = vmatpush.bf16.msra.mxu1 %v2934_v44  ;;  %2957 = vmatpush.bf16.msra.mxu3 %v2934_v44 }
 0x1fc   : > { %2048 = vmatmul.bf16.vlgmr.msra.gmra.mxu0 %v1892_v26  ;;  %2068 = vmatmul.bf16.vlgmr.msra.gmra.mxu2 %v1900_v62 }
 0x1fd   : > { %2097 = vmatmul.bf16.vlgmr.msra.gmra.mxu1 %v1893_v63  ;;  %2117 = vmatmul.bf16.vlgmr.msra.gmra.mxu3 %v1901_v32 }
 0x20c   : > { %2053 = vmatmul.bf16.gmra.mxu0 %v1894_v6  ;;  %2073 = vmatmul.bf16.gmra.mxu2 %v1902_v7 }
 0x20d   : > { %2102 = vmatmul.bf16.gmra.mxu1 %v1895_v8  ;;  %2122 = vmatmul.bf16.gmra.mxu3 %v1903_v58 }
 0x21c   : > { %2058 = vmatmul.bf16.gmra.mxu0 %v1896_v16  ;;  %2078 = vmatmul.bf16.gmra.mxu2 %v1904_v17 }
 0x21d   : > { %2107 = vmatmul.bf16.gmra.mxu1 %v1897_v51  ;;  %2127 = vmatmul.bf16.gmra.mxu3 %v1905_v19 }
 0x22c   : > { %2063 = vmatmul.bf16.gmra.mxu0 %v1898_v4  ;;  %2083 = vmatmul.bf16.gmra.mxu2 %v1906_v33 }
 0x22d   : > { %2112 = vmatmul.bf16.gmra.mxu1 %v1899_v34  ;;  %2132 = vmatmul.bf16.gmra.mxu3 %v1907_v5 }
 0x279   : > { %v2049_v40 = vpop.f32.mrf.mxu0 }
 0x27a   : > { %v2050_v41 = vadd.f32 %v3678_v37, %v2049_v40  ;;  %v2098_v42 = vpop.f32.mrf.mxu1 }
 0x27c   : > { %v2099_v43 = vadd.f32 %v2098_v42, %v2050_v41 }
 0x27e   : > { %v2138_v46 = vmax.f32 %v2099_v43, 0.0 }
 0x27f   : > { %v2069_v47 = vpop.f32.mrf.mxu2 }
 0x280   : > { %2154 = vst [vmem:[%s3138_s9] sm:$0xff] %v2138_v46  ;;  %v2070_v18 = vadd.f32 %v3678_v37, %v2069_v47  ;;  %v2118_v39 = vpop.f32.mrf.mxu3 }
 0x281   : > { %v2051_v50 = vpop.f32.mrf.mxu0 }
 0x282   : > { %v2119_v52 = vadd.f32 %v2118_v39, %v2070_v18  ;;  %v2052_v53 = vadd.f32 %v3678_v37, %v2051_v50  ;;  %v2100_v54 = vpop.f32.mrf.mxu1 }
 0x284   : > { %v2146_v30 = vmax.f32 %v2119_v52, 0.0  ;;  %v2101_v55 = vadd.f32 %v2100_v54, %v2052_v53 }
 0x286   : > { %2162 = vst [vmem:[%s3138_s9 + $0x40] sm:$0xff] %v2146_v30  ;;  %v2139_v44 = vmax.f32 %v2101_v55, 0.0 }
 0x287   : > { %v2071_v45 = vpop.f32.mrf.mxu2 }
 0x288   : > { %2155 = vst [vmem:[%s3138_s9 + $0x8] sm:$0xff] %v2139_v44  ;;  %v2072_v56 = vadd.f32 %v3678_v37, %v2071_v45  ;;  %v2120_v12 = vpop.f32.mrf.mxu3 }
 0x289   : > { %v2054_v13 = vpop.f32.mrf.mxu0 }
 0x28a   : > { %v2121_v31 = vadd.f32 %v2120_v12, %v2072_v56  ;;  %v2055_v57 = vadd.f32 %v3678_v37, %v2054_v13  ;;  %v2103_v60 = vpop.f32.mrf.mxu1 }
 0x28c   : > { %v2147_v61 = vmax.f32 %v2121_v31, 0.0  ;;  %v2104_v26 = vadd.f32 %v2103_v60, %v2055_v57 }
 0x28e   : > { %2163 = vst [vmem:[%s3138_s9 + $0x48] sm:$0xff] %v2147_v61  ;;  %v2140_v62 = vmax.f32 %v2104_v26, 0.0 }
 0x28f   : > { %v2074_v63 = vpop.f32.mrf.mxu2 }
 0x290   : > { %2156 = vst [vmem:[%s3138_s9 + $0x10] sm:$0xff] %v2140_v62  ;;  %v2075_v32 = vadd.f32 %v3678_v37, %v2074_v63  ;;  %v2123_v0 = vpop.f32.mrf.mxu3 }
 0x291   : > { %v2056_v1 = vpop.f32.mrf.mxu0 }
 0x292   : > { %v2124_v2 = vadd.f32 %v2123_v0, %v2075_v32  ;;  %v2057_v35 = vadd.f32 %v3678_v37, %v2056_v1  ;;  %v2105_v3 = vpop.f32.mrf.mxu1 }
 0x294   : > { %v2148_v48 = vmax.f32 %v2124_v2, 0.0  ;;  %v2106_v49 = vadd.f32 %v2105_v3, %v2057_v35 }
 0x296   : > { %2164 = vst [vmem:[%s3138_s9 + $0x50] sm:$0xff] %v2148_v48  ;;  %v2141_v38 = vmax.f32 %v2106_v49, 0.0 }
 0x297   : > { %v2076_v6 = vpop.f32.mrf.mxu2 }
 0x298   : > { %2157 = vst [vmem:[%s3138_s9 + $0x18] sm:$0xff] %v2141_v38  ;;  %v2077_v7 = vadd.f32 %v3678_v37, %v2076_v6  ;;  %v2125_v8 = vpop.f32.mrf.mxu3 }
 0x299   : > { %v2059_v58 = vpop.f32.mrf.mxu0 }
 0x29a   : > { %v2126_v59 = vadd.f32 %v2125_v8, %v2077_v7  ;;  %v2060_v9 = vadd.f32 %v3678_v37, %v2059_v58  ;;  %v2108_v21 = vpop.f32.mrf.mxu1 }
 0x29c   : > { %v2149_v22 = vmax.f32 %v2126_v59, 0.0  ;;  %v2109_v10 = vadd.f32 %v2108_v21, %v2060_v9 }
 0x29e   : > { %2165 = vst [vmem:[%s3138_s9 + $0x58] sm:$0xff] %v2149_v22  ;;  %v2142_v11 = vmax.f32 %v2109_v10, 0.0 }
 0x29f   : > { %v2079_v14 = vpop.f32.mrf.mxu2 }
 0x2a0   : > { %2158 = vst [vmem:[%s3138_s9 + $0x20] sm:$0xff] %v2142_v11  ;;  %v2080_v15 = vadd.f32 %v3678_v37, %v2079_v14  ;;  %v2128_v16 = vpop.f32.mrf.mxu3 }
 0x2a1   : > { %v2061_v17 = vpop.f32.mrf.mxu0 }
 0x2a2   : > { %v2129_v51 = vadd.f32 %v2128_v16, %v2080_v15  ;;  %v2062_v19 = vadd.f32 %v3678_v37, %v2061_v17  ;;  %v2110_v20 = vpop.f32.mrf.mxu1 }
 0x2a4   : > { %v2150_v23 = vmax.f32 %v2129_v51, 0.0  ;;  %v2111_v24 = vadd.f32 %v2110_v20, %v2062_v19 }
 0x2a6   : > { %2166 = vst [vmem:[%s3138_s9 + $0x60] sm:$0xff] %v2150_v23  ;;  %v2143_v25 = vmax.f32 %v2111_v24, 0.0 }
 0x2a7   : > { %v2081_v27 = vpop.f32.mrf.mxu2 }
 0x2a8   : > { %2159 = vst [vmem:[%s3138_s9 + $0x28] sm:$0xff] %v2143_v25  ;;  %v2082_v28 = vadd.f32 %v3678_v37, %v2081_v27  ;;  %v2130_v29 = vpop.f32.mrf.mxu3 }
 0x2a9   : > { %v2064_v36 = vpop.f32.mrf.mxu0 }
 0x2aa   : > { %v2131_v4 = vadd.f32 %v2130_v29, %v2082_v28  ;;  %v2065_v33 = vadd.f32 %v3678_v37, %v2064_v36  ;;  %v2113_v34 = vpop.f32.mrf.mxu1 }
 0x2ac   : > { %v2151_v5 = vmax.f32 %v2131_v4, 0.0  ;;  %v2114_v40 = vadd.f32 %v2113_v34, %v2065_v33 }
 0x2ae   : > { %2167 = vst [vmem:[%s3138_s9 + $0x68] sm:$0xff] %v2151_v5  ;;  %v2144_v41 = vmax.f32 %v2114_v40, 0.0 }
 0x2af   : > { %v2084_v42 = vpop.f32.mrf.mxu2 }
 0x2b0   : > { %2160 = vst [vmem:[%s3138_s9 + $0x30] sm:$0xff] %v2144_v41  ;;  %v2085_v43 = vadd.f32 %v3678_v37, %v2084_v42  ;;  %v2133_v46 = vpop.f32.mrf.mxu3 }
 0x2b1   : > { %v2066_v47 = vpop.f32.mrf.mxu0 }
 0x2b2   : > { %v2134_v18 = vadd.f32 %v2133_v46, %v2085_v43  ;;  %v2067_v39 = vadd.f32 %v3678_v37, %v2066_v47  ;;  %v2115_v50 = vpop.f32.mrf.mxu1 }
 0x2b4   : > { %v2152_v52 = vmax.f32 %v2134_v18, 0.0  ;;  %v2116_v53 = vadd.f32 %v2115_v50, %v2067_v39 }
 0x2b6   : > { %2168 = vst [vmem:[%s3138_s9 + $0x70] sm:$0xff] %v2152_v52  ;;  %v2145_v54 = vmax.f32 %v2116_v53, 0.0 }
 0x2b7   : > { %v2086_v30 = vpop.f32.mrf.mxu2 }
 0x2b8   : > { %2161 = vst [vmem:[%s3138_s9 + $0x38] sm:$0xff] %v2145_v54  ;;  %v2087_v55 = vadd.f32 %v3678_v37, %v2086_v30  ;;  %v2135_v44 = vpop.f32.mrf.mxu3 }
 0x2ba   : > { %v2136_v45 = vadd.f32 %v2135_v44, %v2087_v55 }
 0x2bc   : > { %v2153_v56 = vmax.f32 %v2136_v45, 0.0 }
 0x2be   : > { %2169 = vst [vmem:[%s3138_s9 + $0x78] sm:$0xff] %v2153_v56 }
 0x2bf PF: > { %s16_s25 = sadd.s32 1, %s3039_s25   ;;  %s3737_s21 = smov %s3031_s23 }
 0x2c0   : > { %p13_p10 = scmp.ge.s32.totalorder %s16_s25, 6   ;;  %s3738_s22 = smov %s3035_s24 }
 0x2c1   : > { %s3739_s23 = smov %s3742_s26  ;;  %s3740_s24 = smov %s3746_s27 }
 0x2c2   :  { %15 = sbr.rel (!%p13_p10) target bundleno = 3 (0x3), region = 91 }

// kernel: taxorel_cgc_forward.5
= control target key start
LH: loop header
LB: loop body
LE: loop exit
PB: predicated region body
PF: predicated region fallthrough
CT: control target
= control target key end

     0   :  { %s595_s12 = smov 0   ;;  %s661_s0 = inlined_call_operand.vmem [shape: bf16[640,128], index: 0, kind: input, shape index: {}]   ;;  %s662_s1 = inlined_call_operand.vmem [shape: bf16[128,128], index: 1, kind: input, shape index: {}]   ;;  %s663_s2 = inlined_call_operand.vmem [shape: f32[1,128], index: 2, kind: input, shape index: {}]   ;;  %s664_s3 = inlined_call_operand.vmem [shape: f32[640,128], index: 3, kind: output, shape index: {}]  }
   0x1 LB: > { %s443_s13 = sadd.s32 4294967295, %s573_s12   ;;  %p447_p0 = scmp.ge.s32.totalorder %s573_s12, 1  ;;  %s573_s12 = sphi %s595_s12, %s13_s12  }
   0x2   : > { %p138_p1 = scmp.lt.s32.totalorder %s573_s12, 6 }
   0x4   : > { %p139_p2 = pnand %p447_p0, %p138_p1 }
   0x5   : > { %s448_s22 = sshll.u32 (!%p139_p2), %s443_s13, 4 }
   0x6   : > { %142 = sbr.rel (%p139_p2) target bundleno = 206 (0xce), region = 32  ;;  %p163_p3 = scmp.lt.s32.totalorder (!%p139_p2), %s448_s22, 79 }
   0xb   : > { %v533_v0 = vld [vmem:[%s662_s1 + $0x38] sm:$0xff]  ;;  %v532_v1 = vld [vmem:[%s662_s1 + $0x30] sm:$0xff]  ;;  %v531_v2 = vld [vmem:[%s662_s1 + $0x28] sm:$0xff]  ;;  %s666_s22 = smov (!%p163_p3, %s448_s22), 79 }
   0xc   : > { %306 = vmatpush.bf16.msra.mxu0 %v533_v0  ;;  %534 = vmatpush.bf16.msra.mxu1 %v533_v0  ;;  %v530_v3 = vld [vmem:[%s662_s1 + $0x20] sm:$0xff]  ;;  %v529_v4 = vld [vmem:[%s662_s1 + $0x18] sm:$0xff]  ;;  %v528_v5 = vld [vmem:[%s662_s1 + $0x10] sm:$0xff]  ;;  %s449_s29 = sshll.u32 %s666_s22, 2  ;;  %s451_s10 = sshll.u32 %s666_s22, 3 }
   0xd   : > { %535 = vmatpush.bf16.msra.mxu2 %v533_v0  ;;  %536 = vmatpush.bf16.msra.mxu3 %v533_v0  ;;  %v527_v6 = vld [vmem:[%s662_s1 + $0x8] sm:$0xff]  ;;  %v526_v7 = vld [vmem:[%s662_s1] sm:$0xff]  ;;  %s166_s7 = scalar_lea.vmem %s661_s0, %s449_s29  ;;  %s640_s14 = scalar_lea.vmem %s664_s3, %s451_s10 }
   0xe   : > { %v518_v8 = vld [vmem:[%s166_s7] sm:$0xff]  ;;  %v520_v9 = vld [vmem:[%s166_s7 + $0x10] sm:$0xff]  ;;  %v519_v12 = vld [vmem:[%s166_s7 + $0x8] sm:$0xff] }
   0xf   : > { %v522_v10 = vld [vmem:[%s166_s7 + $0x20] sm:$0xff]  ;;  %v524_v11 = vld [vmem:[%s166_s7 + $0x30] sm:$0xff]  ;;  %v521_v13 = vld [vmem:[%s166_s7 + $0x18] sm:$0xff] }
  0x10   : > { %307 = vmatpush.bf16.msra.mxu0 %v532_v1  ;;  %537 = vmatpush.bf16.msra.mxu1 %v532_v1  ;;  %v523_v14 = vld [vmem:[%s166_s7 + $0x28] sm:$0xff]  ;;  %v525_v15 = vld [vmem:[%s166_s7 + $0x38] sm:$0xff]  ;;  %v566_v16 = vld [vmem:[%s663_s2] ss:$0 sm:$0xff] }
  0x11   : > { %538 = vmatpush.bf16.msra.mxu2 %v532_v1  ;;  %539 = vmatpush.bf16.msra.mxu3 %v532_v1 }
  0x14   : > { %308 = vmatpush.bf16.msra.mxu0 %v531_v2  ;;  %540 = vmatpush.bf16.msra.mxu1 %v531_v2 }
  0x15   : > { %541 = vmatpush.bf16.msra.mxu2 %v531_v2  ;;  %542 = vmatpush.bf16.msra.mxu3 %v531_v2 }
  0x18   : > { %309 = vmatpush.bf16.msra.mxu0 %v530_v3  ;;  %543 = vmatpush.bf16.msra.mxu1 %v530_v3 }
  0x19   : > { %544 = vmatpush.bf16.msra.mxu2 %v530_v3  ;;  %545 = vmatpush.bf16.msra.mxu3 %v530_v3 }
  0x1c   : > { %310 = vmatpush.bf16.msra.mxu0 %v529_v4  ;;  %546 = vmatpush.bf16.msra.mxu1 %v529_v4 }
  0x1d   : > { %547 = vmatpush.bf16.msra.mxu2 %v529_v4  ;;  %548 = vmatpush.bf16.msra.mxu3 %v529_v4 }
  0x20   : > { %311 = vmatpush.bf16.msra.mxu0 %v528_v5  ;;  %549 = vmatpush.bf16.msra.mxu1 %v528_v5 }
  0x21   : > { %550 = vmatpush.bf16.msra.mxu2 %v528_v5  ;;  %551 = vmatpush.bf16.msra.mxu3 %v528_v5 }
  0x24   : > { %312 = vmatpush.bf16.msra.mxu0 %v527_v6  ;;  %552 = vmatpush.bf16.msra.mxu1 %v527_v6 }
  0x25   : > { %553 = vmatpush.bf16.msra.mxu2 %v527_v6  ;;  %554 = vmatpush.bf16.msra.mxu3 %v527_v6 }
  0x28   : > { %313 = vmatpush.bf16.msra.mxu0 %v526_v7  ;;  %555 = vmatpush.bf16.msra.mxu1 %v526_v7 }
  0x29   : > { %556 = vmatpush.bf16.msra.mxu2 %v526_v7  ;;  %557 = vmatpush.bf16.msra.mxu3 %v526_v7 }
  0x2b   : > { %314 = vmatmul.bf16.vlgmr.msra.gmra.mxu0 %v518_v8  ;;  %324 = vmatmul.bf16.vlgmr.msra.gmra.mxu1 %v520_v9 }
  0x2c   : > { %334 = vmatmul.bf16.vlgmr.msra.gmra.mxu2 %v522_v10  ;;  %344 = vmatmul.bf16.vlgmr.msra.gmra.mxu3 %v524_v11 }
  0x3b   : > { %319 = vmatmul.bf16.gmra.mxu0 %v519_v12  ;;  %329 = vmatmul.bf16.gmra.mxu1 %v521_v13 }
  0x3c   : > { %339 = vmatmul.bf16.gmra.mxu2 %v523_v14  ;;  %349 = vmatmul.bf16.gmra.mxu3 %v525_v15 }
  0xa8   : > { %v315_v17 = vpop.f32.mrf.mxu0  ;;  %v325_v18 = vpop.f32.mrf.mxu1 }
  0xa9   : > { %v316_v19 = vadd.f32 %v566_v16, %v315_v17  ;;  %v326_v20 = vadd.f32 %v566_v16, %v325_v18 }
  0xab   : > { %v355_v21 = vmax.f32 %v316_v19, 0.0  ;;  %v359_v22 = vmax.f32 %v326_v20, 0.0 }
  0xad   : > { %371 = vst [vmem:[%s640_s14] sm:$0xff] %v355_v21 }
  0xae   : > { %375 = vst [vmem:[%s640_s14 + $0x20] sm:$0xff] %v359_v22 }
  0xaf   : > { %v335_v23 = vpop.f32.mrf.mxu2  ;;  %v345_v24 = vpop.f32.mrf.mxu3 }
  0xb0   : > { %v336_v25 = vadd.f32 %v566_v16, %v335_v23  ;;  %v346_v26 = vadd.f32 %v566_v16, %v345_v24  ;;  %v317_v27 = vpop.f32.mrf.mxu0  ;;  %v327_v28 = vpop.f32.mrf.mxu1 }
  0xb1   : > { %v318_v29 = vadd.f32 %v566_v16, %v317_v27  ;;  %v328_v30 = vadd.f32 %v566_v16, %v327_v28 }
  0xb2   : > { %v363_v31 = vmax.f32 %v336_v25, 0.0  ;;  %v367_v32 = vmax.f32 %v346_v26, 0.0 }
  0xb3   : > { %v356_v33 = vmax.f32 %v318_v29, 0.0  ;;  %v360_v34 = vmax.f32 %v328_v30, 0.0 }
  0xb4   : > { %379 = vst [vmem:[%s640_s14 + $0x40] sm:$0xff] %v363_v31 }
  0xb5   : > { %383 = vst [vmem:[%s640_s14 + $0x60] sm:$0xff] %v367_v32 }
  0xb6   : > { %372 = vst [vmem:[%s640_s14 + $0x8] sm:$0xff] %v356_v33 }
  0xb7   : > { %376 = vst [vmem:[%s640_s14 + $0x28] sm:$0xff] %v360_v34  ;;  %v337_v35 = vpop.f32.mrf.mxu2  ;;  %v347_v36 = vpop.f32.mrf.mxu3 }
  0xb8   : > { %v338_v37 = vadd.f32 %v566_v16, %v337_v35  ;;  %v348_v38 = vadd.f32 %v566_v16, %v347_v36  ;;  %v320_v39 = vpop.f32.mrf.mxu0  ;;  %v330_v40 = vpop.f32.mrf.mxu1 }
  0xb9   : > { %v321_v41 = vadd.f32 %v566_v16, %v320_v39  ;;  %v331_v42 = vadd.f32 %v566_v16, %v330_v40 }
  0xba   : > { %v364_v43 = vmax.f32 %v338_v37, 0.0  ;;  %v368_v44 = vmax.f32 %v348_v38, 0.0 }
  0xbb   : > { %v357_v45 = vmax.f32 %v321_v41, 0.0  ;;  %v361_v46 = vmax.f32 %v331_v42, 0.0 }
  0xbc   : > { %380 = vst [vmem:[%s640_s14 + $0x48] sm:$0xff] %v364_v43 }
  0xbd   : > { %384 = vst [vmem:[%s640_s14 + $0x68] sm:$0xff] %v368_v44 }
  0xbe   : > { %373 = vst [vmem:[%s640_s14 + $0x10] sm:$0xff] %v357_v45 }
  0xbf   : > { %377 = vst [vmem:[%s640_s14 + $0x30] sm:$0xff] %v361_v46  ;;  %v340_v47 = vpop.f32.mrf.mxu2  ;;  %v350_v48 = vpop.f32.mrf.mxu3 }
  0xc0   : > { %v341_v49 = vadd.f32 %v566_v16, %v340_v47  ;;  %v351_v50 = vadd.f32 %v566_v16, %v350_v48  ;;  %v322_v51 = vpop.f32.mrf.mxu0  ;;  %v332_v52 = vpop.f32.mrf.mxu1 }
  0xc1   : > { %v323_v53 = vadd.f32 %v566_v16, %v322_v51  ;;  %v333_v54 = vadd.f32 %v566_v16, %v332_v52 }
  0xc2   : > { %v365_v55 = vmax.f32 %v341_v49, 0.0  ;;  %v369_v56 = vmax.f32 %v351_v50, 0.0 }
  0xc3   : > { %v358_v57 = vmax.f32 %v323_v53, 0.0  ;;  %v362_v58 = vmax.f32 %v333_v54, 0.0 }
  0xc4   : > { %381 = vst [vmem:[%s640_s14 + $0x50] sm:$0xff] %v365_v55 }
  0xc5   : > { %385 = vst [vmem:[%s640_s14 + $0x70] sm:$0xff] %v369_v56 }
  0xc6   : > { %374 = vst [vmem:[%s640_s14 + $0x18] sm:$0xff] %v358_v57 }
  0xc7   : > { %378 = vst [vmem:[%s640_s14 + $0x38] sm:$0xff] %v362_v58  ;;  %v342_v59 = vpop.f32.mrf.mxu2  ;;  %v352_v60 = vpop.f32.mrf.mxu3 }
  0xc8   : > { %v343_v61 = vadd.f32 %v566_v16, %v342_v59  ;;  %v353_v62 = vadd.f32 %v566_v16, %v352_v60 }
  0xca   : > { %v366_v63 = vmax.f32 %v343_v61, 0.0  ;;  %v370_v0 = vmax.f32 %v353_v62, 0.0 }
  0xcc   : > { %382 = vst [vmem:[%s640_s14 + $0x58] sm:$0xff] %v366_v63 }
  0xcd   : > { %386 = vst [vmem:[%s640_s14 + $0x78] sm:$0xff] %v370_v0 }
  0xce PF: > { %s13_s12 = sadd.s32 1, %s573_s12  }
  0xcf   : > { %p10_p4 = scmp.ge.s32.totalorder %s13_s12, 7  }
  0xd1   :  { %12 = sbr.rel (!%p10_p4) target bundleno = 1 (0x1), region = 62 }

// kernel: taxorel_cgc_forward.7
= control target key start
LH: loop header
LB: loop body
LE: loop exit
PB: predicated region body
PF: predicated region fallthrough
CT: control target
= control target key end

     0   :  { %s835_s3 = inlined_call_operand.vmem [shape: bf16[128,128], index: 3, kind: input, shape index: {}]   ;;  %s836_s4 = inlined_call_operand.vmem [shape: f32[1,128], index: 4, kind: input, shape index: {}]   ;;  %s837_s2 = inlined_call_operand.vmem [shape: bf16[128,128], index: 2, kind: input, shape index: {}]   ;;  %s838_s1 = inlined_call_operand.vmem [shape: f32[256,128], index: 1, kind: input, shape index: {}]   ;;  %s839_s0 = inlined_call_operand.vmem [shape: f32[8,256], index: 0, kind: input, shape index: {}]   ;;  %s840_s5 = inlined_call_operand.vmem [shape: bf16[128,128], index: 5, kind: input, shape index: {}]   ;;  %s841_s6 = inlined_call_operand.vmem [shape: f32[1,128], index: 6, kind: input, shape index: {}]   ;;  %s842_s7 = inlined_call_operand.vmem [shape: f32[8,128], index: 7, kind: output, shape index: {}]  }
   0x1   :  { %v558_v0 = vld [vmem:[%s835_s3 + $0x38] sm:$0xff]  ;;  %v557_v1 = vld [vmem:[%s835_s3 + $0x30] sm:$0xff]  ;;  %v634_v2 = vld [vmem:[%s835_s3 + $0x28] sm:$0xff] }
   0x2   :  { %567 = vmatpush.bf16.msra.mxu2 %v558_v0  ;;  %v640_v3 = vld [vmem:[%s835_s3 + $0x20] sm:$0xff]  ;;  %v646_v4 = vld [vmem:[%s835_s3 + $0x18] sm:$0xff]  ;;  %v652_v5 = vld [vmem:[%s835_s3 + $0x10] sm:$0xff] }
   0x3   :  { %v658_v6 = vld [vmem:[%s835_s3 + $0x8] sm:$0xff]  ;;  %v664_v7 = vld [vmem:[%s835_s3] sm:$0xff]  ;;  %v545_v8 = vld [vmem:[%s837_s2 + $0x10] sm:$0xff] }
   0x4   :  { %v59_v9 = vld [vmem:[%s838_s1 + $0xf8] sm:$0xff]  ;;  %v58_v10 = vld [vmem:[%s838_s1 + $0xf0] sm:$0xff]  ;;  %v57_v12 = vld [vmem:[%s838_s1 + $0xe8] sm:$0xff] }
   0x5   :  { %80 = vmatpush.msra.mxu1 %v59_v9  ;;  %v546_v11 = vld [vmem:[%s837_s2 + $0x18] sm:$0xff]  ;;  %v56_v13 = vld [vmem:[%s838_s1 + $0xe0] sm:$0xff]  ;;  %v54_v15 = vld [vmem:[%s838_s1 + $0xd0] sm:$0xff] }
   0x6   :  { %568 = vmatpush.bf16.msra.mxu2 %v557_v1  ;;  %v55_v14 = vld [vmem:[%s838_s1 + $0xd8] sm:$0xff]  ;;  %v53_v16 = vld [vmem:[%s838_s1 + $0xc8] sm:$0xff]  ;;  %v52_v17 = vld [vmem:[%s838_s1 + $0xc0] sm:$0xff] }
   0x7   :  { %81 = vmatpush.msra.mxu1 %v58_v10  ;;  %v51_v18 = vld [vmem:[%s838_s1 + $0xb8] sm:$0xff]  ;;  %v547_v19 = vld [vmem:[%s837_s2 + $0x20] sm:$0xff]  ;;  %v50_v20 = vld [vmem:[%s838_s1 + $0xb0] sm:$0xff] }
   0x8   :  { %v49_v21 = vld [vmem:[%s838_s1 + $0xa8] sm:$0xff]  ;;  %v48_v22 = vld [vmem:[%s838_s1 + $0xa0] sm:$0xff]  ;;  %v47_v23 = vld [vmem:[%s838_s1 + $0x98] sm:$0xff] }
   0x9   :  { %82 = vmatpush.msra.mxu1 %v57_v12  ;;  %v46_v24 = vld [vmem:[%s838_s1 + $0x90] sm:$0xff]  ;;  %v45_v25 = vld [vmem:[%s838_s1 + $0x88] sm:$0xff]  ;;  %v44_v26 = vld [vmem:[%s838_s1 + $0x80] sm:$0xff] }
   0xa   :  { %569 = vmatpush.bf16.msra.mxu2 %v634_v2  ;;  %v548_v27 = vld [vmem:[%s837_s2 + $0x28] sm:$0xff]  ;;  %v43_v28 = vld [vmem:[%s838_s1 + $0x78] sm:$0xff]  ;;  %v42_v29 = vld [vmem:[%s838_s1 + $0x70] sm:$0xff] }
   0xb   :  { %83 = vmatpush.msra.mxu1 %v56_v13  ;;  %60 = vmatpush.msra.mxu0 %v43_v28  ;;  %v41_v30 = vld [vmem:[%s838_s1 + $0x68] sm:$0xff]  ;;  %v40_v32 = vld [vmem:[%s838_s1 + $0x60] sm:$0xff]  ;;  %v39_v33 = vld [vmem:[%s838_s1 + $0x58] sm:$0xff] }
   0xc   :  { %v27_v31 = vld [vmem:[%s839_s0 + $0x8] sm:$0xff]  ;;  %v566_v34 = vld [vmem:[%s840_s5 + $0x38] sm:$0xff]  ;;  %v38_v35 = vld [vmem:[%s838_s1 + $0x50] sm:$0xff] }
   0xd   :  { %84 = vmatpush.msra.mxu1 %v55_v14  ;;  %61 = vmatpush.msra.mxu0 %v42_v29  ;;  %v565_v36 = vld [vmem:[%s840_s5 + $0x30] sm:$0xff]  ;;  %v37_v37 = vld [vmem:[%s838_s1 + $0x48] sm:$0xff]  ;;  %v36_v39 = vld [vmem:[%s838_s1 + $0x40] sm:$0xff] }
   0xe   :  { %570 = vmatpush.bf16.msra.mxu2 %v640_v3  ;;  %575 = vmatpush.bf16.msra.mxu3 %v566_v34  ;;  %v549_v38 = vld [vmem:[%s837_s2 + $0x30] sm:$0xff]  ;;  %v564_v40 = vld [vmem:[%s840_s5 + $0x28] sm:$0xff]  ;;  %v35_v41 = vld [vmem:[%s838_s1 + $0x38] sm:$0xff] }
   0xf   :  { %85 = vmatpush.msra.mxu1 %v54_v15  ;;  %62 = vmatpush.msra.mxu0 %v41_v30  ;;  %v34_v42 = vld [vmem:[%s838_s1 + $0x30] sm:$0xff]  ;;  %v563_v43 = vld [vmem:[%s840_s5 + $0x20] sm:$0xff]  ;;  %v33_v44 = vld [vmem:[%s838_s1 + $0x28] sm:$0xff] }
  0x10   :  { %v32_v45 = vld [vmem:[%s838_s1 + $0x20] sm:$0xff]  ;;  %v31_v46 = vld [vmem:[%s838_s1 + $0x18] sm:$0xff]  ;;  %v30_v48 = vld [vmem:[%s838_s1 + $0x10] sm:$0xff] }
  0x11   :  { %86 = vmatpush.msra.mxu1 %v53_v16  ;;  %63 = vmatpush.msra.mxu0 %v40_v32  ;;  %v543_v47 = vld [vmem:[%s837_s2] sm:$0xff]  ;;  %v29_v49 = vld [vmem:[%s838_s1 + $0x8] sm:$0xff]  ;;  %v550_v50 = vld [vmem:[%s837_s2 + $0x38] sm:$0xff] }
  0x12   :  { %571 = vmatpush.bf16.msra.mxu2 %v646_v4  ;;  %576 = vmatpush.bf16.msra.mxu3 %v565_v36  ;;  %v28_v51 = vld [vmem:[%s838_s1] sm:$0xff]  ;;  %v544_v53 = vld [vmem:[%s837_s2 + $0x8] sm:$0xff]  ;;  %v562_v54 = vld [vmem:[%s840_s5 + $0x18] sm:$0xff] }
  0x13   :  { %87 = vmatpush.msra.mxu1 %v52_v17  ;;  %64 = vmatpush.msra.mxu0 %v39_v33  ;;  %v26_v52 = vld [vmem:[%s839_s0] sm:$0xff]  ;;  %v561_v55 = vld [vmem:[%s840_s5 + $0x10] sm:$0xff]  ;;  %v560_v56 = vld [vmem:[%s840_s5 + $0x8] sm:$0xff] }
  0x14   :  { %v559_v57 = vld [vmem:[%s840_s5] sm:$0xff] }
  0x15   :  { %88 = vmatpush.msra.mxu1 %v51_v18  ;;  %65 = vmatpush.msra.mxu0 %v38_v35  ;;  %v583_v59 = vld [vmem:[%s836_s4] ss:$0 sm:$0xff] }
  0x16   :  { %572 = vmatpush.bf16.msra.mxu2 %v652_v5  ;;  %577 = vmatpush.bf16.msra.mxu3 %v564_v40 }
  0x17   :  { %89 = vmatpush.msra.mxu1 %v50_v20  ;;  %66 = vmatpush.msra.mxu0 %v37_v37 }
  0x19   :  { %90 = vmatpush.msra.mxu1 %v49_v21  ;;  %67 = vmatpush.msra.mxu0 %v36_v39 }
  0x1a   :  { %573 = vmatpush.bf16.msra.mxu2 %v658_v6  ;;  %578 = vmatpush.bf16.msra.mxu3 %v563_v43 }
  0x1b   :  { %91 = vmatpush.msra.mxu1 %v48_v22  ;;  %68 = vmatpush.msra.mxu0 %v35_v41 }
  0x1d   :  { %92 = vmatpush.msra.mxu1 %v47_v23  ;;  %69 = vmatpush.msra.mxu0 %v34_v42 }
  0x1e   :  { %574 = vmatpush.bf16.msra.mxu2 %v664_v7  ;;  %579 = vmatpush.bf16.msra.mxu3 %v562_v54 }
  0x1f   :  { %93 = vmatpush.msra.mxu1 %v46_v24  ;;  %70 = vmatpush.msra.mxu0 %v33_v44 }
  0x21   :  { %250 = vmatmul.bf16.vlgmr.msra.gmra.mxu2 %v545_v8  ;;  %94 = vmatpush.msra.mxu1 %v45_v25 }
  0x22   :  { %71 = vmatpush.msra.mxu0 %v32_v45  ;;  %580 = vmatpush.bf16.msra.mxu3 %v561_v55 }
  0x23   :  { %95 = vmatpush.msra.mxu1 %v44_v26 }
  0x24   :  { %96 = vmatmul.f32.vlgmr.msra.gmra.mxu1 %v27_v31  ;;  %72 = vmatpush.msra.mxu0 %v31_v46 }
  0x25   :  { %232 = vmatpush.bf16.msrb.mxu1 %v558_v0 }
  0x26   :  { %73 = vmatpush.msra.mxu0 %v30_v48  ;;  %581 = vmatpush.bf16.msra.mxu3 %v560_v56 }
  0x28   :  { %74 = vmatpush.msra.mxu0 %v29_v49 }
  0x29   :  { %233 = vmatpush.bf16.msrb.mxu1 %v557_v1 }
  0x2a   :  { %75 = vmatpush.msra.mxu0 %v28_v51  ;;  %582 = vmatpush.bf16.msra.mxu3 %v559_v57 }
  0x2b   :  { %76 = vmatmul.f32.vlgmr.msra.gmra.mxu0 %v26_v52 }
  0x2d   :  { %234 = vmatpush.bf16.msrb.mxu1 %v634_v2 }
  0x31   :  { %255 = vmatmul.bf16.gmra.mxu2 %v546_v11  ;;  %235 = vmatpush.bf16.msrb.mxu1 %v640_v3 }
  0x35   :  { %236 = vmatpush.bf16.msrb.mxu1 %v646_v4 }
  0x39   :  { %237 = vmatpush.bf16.msrb.mxu1 %v652_v5 }
  0x3d   :  { %238 = vmatpush.bf16.msrb.mxu1 %v658_v6 }
  0x41   :  { %260 = vmatmul.bf16.gmra.mxu2 %v547_v19  ;;  %239 = vmatpush.bf16.msrb.mxu1 %v664_v7 }
  0x44   :  { %240 = vmatmul.bf16.vlgmr.msrb.gmra.mxu1 %v543_v47 }
  0x45   :  { %373 = vmatpush.bf16.msra.mxu1 %v566_v34 }
  0x49   :  { %374 = vmatpush.bf16.msra.mxu1 %v565_v36 }
  0x4d   :  { %375 = vmatpush.bf16.msra.mxu1 %v564_v40 }
  0x51   :  { %265 = vmatmul.bf16.gmra.mxu2 %v548_v27  ;;  %376 = vmatpush.bf16.msra.mxu1 %v563_v43 }
  0x54   :  { %245 = vmatmul.bf16.gmra.mxu1 %v544_v53 }
  0x55   :  { %377 = vmatpush.bf16.msra.mxu1 %v562_v54 }
  0x59   :  { %378 = vmatpush.bf16.msra.mxu1 %v561_v55 }
  0x5d   :  { %379 = vmatpush.bf16.msra.mxu1 %v560_v56 }
  0x61   :  { %270 = vmatmul.bf16.gmra.mxu2 %v549_v38  ;;  %380 = vmatpush.bf16.msra.mxu1 %v559_v57 }
  0x71   :  { %275 = vmatmul.bf16.gmra.mxu2 %v550_v50 }
  0xa1   :  { %v826_v22 = vpop.f32.mrf.mxu1 }
  0xa4   :  { %v251_v58 = vpop.f32.mrf.mxu2 }
  0xa5   :  { %v252_v60 = vadd.f32 %v583_v59, %v251_v58 }
  0xa7   :  { %v285_v63 = vmax.f32 %v252_v60, 0.0 }
  0xac   :  { %v253_v61 = vpop.f32.mrf.mxu2 }
  0xad   :  { %v254_v62 = vadd.f32 %v583_v59, %v253_v61 }
  0xaf   :  { %v286_v0 = vmax.f32 %v254_v62, 0.0 }
  0xb1   :  { %v299_v1 = vpack.c.bf16 %v286_v0, %v285_v63  ;;  %v584_v0 = vld [vmem:[%s841_s6] ss:$0 sm:$0xff] }
  0xb3   :  { %391 = vmatmul.bf16.vlgmr.msra.gmra.mxu3 %v299_v1 }
  0xb4   :  { %v256_v2 = vpop.f32.mrf.mxu2 }
  0xb5   :  { %v257_v3 = vadd.f32 %v583_v59, %v256_v2 }
  0xb7   :  { %v287_v6 = vmax.f32 %v257_v3, 0.0 }
  0xbc   :  { %v258_v4 = vpop.f32.mrf.mxu2 }
  0xbd   :  { %v259_v5 = vadd.f32 %v583_v59, %v258_v4 }
  0xbf   :  { %v288_v7 = vmax.f32 %v259_v5, 0.0 }
  0xc1   :  { %v300_v8 = vpack.c.bf16 %v288_v7, %v287_v6  ;;  %v241_v25 = vpop.f32.mrf.mxu1 }
  0xc2   :  { %v242_v29 = vadd.f32 %v583_v59, %v241_v25 }
  0xc3   :  { %396 = vmatmul.bf16.gmra.mxu3 %v300_v8 }
  0xc4   :  { %v261_v9 = vpop.f32.mrf.mxu2  ;;  %v281_v34 = vmax.f32 %v242_v29, 0.0 }
  0xc5   :  { %v262_v10 = vadd.f32 %v583_v59, %v261_v9 }
  0xc7   :  { %v289_v13 = vmax.f32 %v262_v10, 0.0 }
  0xc9   :  { %v243_v33 = vpop.f32.mrf.mxu1 }
  0xca   :  { %v244_v35 = vadd.f32 %v583_v59, %v243_v33 }
  0xcc   :  { %v263_v11 = vpop.f32.mrf.mxu2  ;;  %v282_v37 = vmax.f32 %v244_v35, 0.0 }
  0xcd   :  { %v264_v12 = vadd.f32 %v583_v59, %v263_v11 }
  0xce   :  { %v297_v38 = vpack.c.bf16 %v282_v37, %v281_v34 }
  0xcf   :  { %v290_v14 = vmax.f32 %v264_v12, 0.0 }
  0xd0   :  { %381 = vmatmul.bf16.vlgmr.msra.gmra.mxu1 %v297_v38 }
  0xd1   :  { %v301_v15 = vpack.c.bf16 %v290_v14, %v289_v13  ;;  %v246_v39 = vpop.f32.mrf.mxu1 }
  0xd2   :  { %v247_v43 = vadd.f32 %v583_v59, %v246_v39 }
  0xd3   :  { %401 = vmatmul.bf16.gmra.mxu3 %v301_v15 }
  0xd4   :  { %v266_v16 = vpop.f32.mrf.mxu2  ;;  %v283_v48 = vmax.f32 %v247_v43, 0.0 }
  0xd5   :  { %v267_v17 = vadd.f32 %v583_v59, %v266_v16 }
  0xd7   :  { %v291_v20 = vmax.f32 %v267_v17, 0.0 }
  0xd9   :  { %v248_v47 = vpop.f32.mrf.mxu1 }
  0xda   :  { %v249_v49 = vadd.f32 %v583_v59, %v248_v47 }
  0xdc   :  { %v268_v18 = vpop.f32.mrf.mxu2  ;;  %v284_v50 = vmax.f32 %v249_v49, 0.0 }
  0xdd   :  { %v269_v19 = vadd.f32 %v583_v59, %v268_v18 }
  0xde   :  { %v298_v51 = vpack.c.bf16 %v284_v50, %v283_v48 }
  0xdf   :  { %v292_v21 = vmax.f32 %v269_v19, 0.0 }
  0xe0   :  { %386 = vmatmul.bf16.gmra.mxu1 %v298_v51 }
  0xe1   :  { %v302_v23 = vpack.c.bf16 %v292_v21, %v291_v20  ;;  %v77_v20 = vpop.f32.mrf.mxu0 }
  0xe3   :  { %406 = vmatmul.bf16.gmra.mxu3 %v302_v23  ;;  %v98_v23 = vadd.f32 %v826_v22, %v77_v20 }
  0xe4   :  { %v271_v24 = vpop.f32.mrf.mxu2 }
  0xe5   :  { %v272_v26 = vadd.f32 %v583_v59, %v271_v24 }
  0xe7   :  { %v293_v30 = vmax.f32 %v272_v26, 0.0 }
  0xec   :  { %v273_v27 = vpop.f32.mrf.mxu2 }
  0xed   :  { %v274_v28 = vadd.f32 %v583_v59, %v273_v27 }
  0xef   :  { %v294_v31 = vmax.f32 %v274_v28, 0.0 }
  0xf1   :  { %v303_v32 = vpack.c.bf16 %v294_v31, %v293_v30 }
  0xf3   :  { %411 = vmatmul.bf16.gmra.mxu3 %v303_v32 }
  0xf4   :  { %v276_v36 = vpop.f32.mrf.mxu2 }
  0xf5   :  { %v277_v40 = vadd.f32 %v583_v59, %v276_v36 }
  0xf7   :  { %v295_v44 = vmax.f32 %v277_v40, 0.0 }
  0xfc   :  { %v278_v41 = vpop.f32.mrf.mxu2 }
  0xfd   :  { %v279_v42 = vadd.f32 %v583_v59, %v278_v41 }
  0xff   :  { %v296_v45 = vmax.f32 %v279_v42, 0.0 }
 0x101   :  { %v304_v46 = vpack.c.bf16 %v296_v45, %v295_v44 }
 0x103   :  { %416 = vmatmul.bf16.gmra.mxu3 %v304_v46 }
 0x136   :  { %v392_v52 = vpop.f32.mrf.mxu3 }
 0x137   :  { %v393_v15 = vadd.f32 %v584_v0, %v392_v52 }
 0x13e   :  { %v394_v53 = vpop.f32.mrf.mxu3 }
 0x13f   :  { %v395_v14 = vadd.f32 %v584_v0, %v394_v53 }
 0x146   :  { %v397_v54 = vpop.f32.mrf.mxu3 }
 0x147   :  { %v398_v13 = vadd.f32 %v584_v0, %v397_v54 }
 0x14d   :  { %v382_v5 = vpop.f32.mrf.mxu1 }
 0x14e   :  { %v399_v55 = vpop.f32.mrf.mxu3  ;;  %v383_v21 = vadd.f32 %v584_v0, %v382_v5 }
 0x14f   :  { %v400_v11 = vadd.f32 %v584_v0, %v399_v55 }
 0x155   :  { %v384_v9 = vpop.f32.mrf.mxu1 }
 0x156   :  { %v402_v56 = vpop.f32.mrf.mxu3  ;;  %v385_v19 = vadd.f32 %v584_v0, %v384_v9 }
 0x157   :  { %v403_v10 = vadd.f32 %v584_v0, %v402_v56 }
 0x15d   :  { %v387_v12 = vpop.f32.mrf.mxu1 }
 0x15e   :  { %v404_v57 = vpop.f32.mrf.mxu3  ;;  %v388_v18 = vadd.f32 %v584_v0, %v387_v12 }
 0x15f   :  { %v405_v8 = vadd.f32 %v584_v0, %v404_v57 }
 0x165   :  { %v389_v16 = vpop.f32.mrf.mxu1 }
 0x166   :  { %v407_v58 = vpop.f32.mrf.mxu3  ;;  %v390_v17 = vadd.f32 %v584_v0, %v389_v16 }
 0x167   :  { %v408_v7 = vadd.f32 %v584_v0, %v407_v58 }
 0x16e   :  { %v409_v60 = vpop.f32.mrf.mxu3 }
 0x16f   :  { %v410_v6 = vadd.f32 %v584_v0, %v409_v60 }
 0x176   :  { %v412_v61 = vpop.f32.mrf.mxu3 }
 0x177   :  { %v413_v4 = vadd.f32 %v584_v0, %v412_v61 }
 0x17e   :  { %v414_v62 = vpop.f32.mrf.mxu3 }
 0x17f   :  { %v415_v3 = vadd.f32 %v584_v0, %v414_v62 }
 0x186   :  { %v417_v63 = vpop.f32.mrf.mxu3 }
 0x187   :  { %v418_v2 = vadd.f32 %v584_v0, %v417_v63 }
 0x18e   :  { %v419_v59 = vpop.f32.mrf.mxu3 }
 0x18f   :  { %v420_v1 = vadd.f32 %v584_v0, %v419_v59 }
 0x191   :  { %422 = vmatpush.xpose.msrb.mxu0 %v420_v1 }
 0x195   :  { %423 = vmatpush.xpose.msrb.mxu0 %v418_v2 }
 0x199   :  { %424 = vmatpush.xpose.msrb.mxu0 %v415_v3 }
 0x19d   :  { %425 = vmatpush.xpose.msrb.mxu0 %v413_v4 }
 0x1a1   :  { %426 = vmatpush.xpose.msrb.mxu0 %v410_v6 }
 0x1a5   :  { %427 = vmatpush.xpose.msrb.mxu0 %v408_v7 }
 0x1a9   :  { %428 = vmatpush.xpose.msrb.mxu0 %v405_v8 }
 0x1ad   :  { %429 = vmatpush.xpose.msrb.mxu0 %v403_v10 }
 0x1b1   :  { %430 = vmatpush.xpose.msrb.mxu0 %v400_v11 }
 0x1b5   :  { %431 = vmatpush.xpose.msrb.mxu0 %v398_v13 }
 0x1b9   :  { %432 = vmatpush.xpose.msrb.mxu0 %v395_v14 }
 0x1bd   :  { %433 = vmatpush.xpose.msrb.mxu0 %v393_v15 }
 0x1c1   :  { %434 = vmatpush.xpose.msrb.mxu0 %v390_v17 }
 0x1c5   :  { %435 = vmatpush.xpose.msrb.mxu0 %v388_v18 }
 0x1c9   :  { %436 = vmatpush.xpose.msrb.mxu0 %v385_v19 }
 0x1cd   :  { %437 = vmatpush.xpose.msrb.mxu0 %v383_v21 }
 0x1d0   :  { %438 = vmatmul.f32.vlgmr.msrb.gmra.mxu0 %v98_v23 }
 0x24d   :  { %v439_v24 = vpop.f32.mrf.mxu0 }
 0x24e   :  { %442 = vst [vmem:[%s842_s7] sm:$0xff] %v439_v24 }

// kernel: taxorel_cgc_forward.6
= control target key start
LH: loop header
LB: loop body
LE: loop exit
PB: predicated region body
PF: predicated region fallthrough
CT: control target
= control target key end

     0   :  { %s3062_s21 = smov 0   ;;  %s3064_s22 = smov 0   ;;  %s3711_s0 = inlined_call_operand.vmem [shape: s32[1,1024], index: 0, kind: input, shape index: {}]   ;;  %s3712_s1 = inlined_call_operand.vmem [shape: s32[1,1024], index: 1, kind: input, shape index: {}]   ;;  %s3713_s2 = inlined_call_operand.vmem [shape: bf16[1024,128], index: 2, kind: input, shape index: {}]   ;;  %s3714_s3 = inlined_call_operand.vmem [shape: bf16[1024,128], index: 3, kind: input, shape index: {}]   ;;  %s3715_s4 = inlined_call_operand.vmem [shape: bf16[256,128], index: 4, kind: input, shape index: {}]   ;;  %s3716_s5 = inlined_call_operand.vmem [shape: f32[1,128], index: 5, kind: input, shape index: {}]   ;;  %s3717_s6 = inlined_call_operand.vmem [shape: f32[256,128], index: 6, kind: output, shape index: {}]  }
   0x1   :  { %s3066_s23 = smov 0   ;;  %s3068_s24 = smov 0  }
   0x2   :  { %s3070_s25 = smov 0  }
   0x3 LB: > { %s25_s26 = sadd.s32 1, %s3015_s23  ;;  %s28_s27 = sadd.s32 1, %s3019_s24  ;;  %s3023_s25 = sphi %s3070_s25, %s16_s25   ;;  %s3019_s24 = sphi %s3068_s24, %s3724_s24   ;;  %s3015_s23 = sphi %s3066_s23, %s3723_s23   ;;  %s3011_s22 = sphi %s3064_s22, %s3722_s22   ;;  %s3007_s21 = sphi %s3062_s21, %s3721_s21  }
   0x4   : > { %p26_p0 = scmp.ge.s32.totalorder %s25_s26, 2  ;;  %p2256_p1 = scmp.ge.s32.totalorder %s3023_s25, 1 }
   0x5   : > { %p256_p2 = scmp.lt.s32.totalorder %s3023_s25, 5 }
   0x6   : > { %s3726_s26 = smov (%p26_p0, %s25_s26), 0  ;;  %s3728_s27 = smov (!%p26_p0, %s28_s27), %s3019_s24 }
   0x7   : > { %p257_p3 = pnand %p2256_p1, %p256_p2  ;;  %p30_p4 = scmp.ge.s32.totalorder %s3728_s27, 2 }
   0x8   : > { %s2257_s28 = sshll.u32 (!%p257_p3), %s3007_s21, 2  ;;  %s2259_s29 = sshll.u32 (!%p257_p3), %s3007_s21, 6 }
   0x9   : > { %s3730_s27 = smov (%p30_p4, %s3728_s27), 0  ;;  %260 = sbr.rel (%p257_p3) target bundleno = 701 (0x2bd), region = 44 }
   0xa   : > { %p300_p5 = scmp.lt.s32.totalorder (!%p257_p3), %s2257_s28, 7  ;;  %p310_p6 = scmp.lt.s32.totalorder (!%p257_p3), %s2259_s29, 127 }
   0xb   : > { %s2263_s30 = sshll.u32 (!%p257_p3), %s3011_s22, 4  ;;  %p2265_p8 = scmp.ne.s32.totalorder (!%p257_p3), %s3007_s21, 0 }
   0xc   : > { %p322_p7 = scmp.lt.s32.totalorder (!%p257_p3), %s2263_s30, 31 }
   0xe   : > { %s3732_s28 = smov (!%p300_p5, %s2257_s28), 7  ;;  %s3734_s29 = smov (!%p310_p6, %s2259_s29), 127 }
   0xf   : > { %s307_s12 = scalar_lea.vmem %s3712_s1, %s3732_s28  ;;  %s2260_s13 = sshll.u32 %s3734_s29, 2 }
  0x10   : > { %s3112_s16 = scalar_lea.vmem %s3713_s2, %s2260_s13  ;;  %s3117_s19 = scalar_lea.vmem %s3714_s3, %s2260_s13 }
  0x11   : > { %s3736_s30 = smov (!%p322_p7, %s2263_s30), 31  ;;  %330 = sbr.rel (%p2265_p8) target bundleno = 55 (0x37), region = 48 }
  0x12   : > { %s2264_s20 = sshll.u32 %s3736_s30, 3 }
  0x13   : > { %s3122_s9 = scalar_lea.vmem %s3717_s6, %s2264_s20 }
  0x16   : > { %v3025_v0 = vmov 0.0  }
  0x17   : > { %331 = vst [vmem:[#allocation2 + $0xb0] sm:$0xff] %v3025_v0 }
  0x18   : > { %332 = vst [vmem:[#allocation2] sm:$0xff] %v3025_v0 }
  0x19   : > { %333 = vst [vmem:[#allocation2 + $0xd8] sm:$0xff] %v3025_v0 }
  0x1a   : > { %334 = vst [vmem:[#allocation2 + $0x18] sm:$0xff] %v3025_v0 }
  0x1b   : > { %335 = vst [vmem:[#allocation2 + $0x50] sm:$0xff] %v3025_v0 }
  0x1c   : > { %336 = vst [vmem:[#allocation2 + $0x68] sm:$0xff] %v3025_v0 }
  0x1d   : > { %337 = vst [vmem:[#allocation2 + $0x30] sm:$0xff] %v3025_v0 }
  0x1e   : > { %338 = vst [vmem:[#allocation2 + $0x48] sm:$0xff] %v3025_v0 }
  0x1f   : > { %339 = vst [vmem:[#allocation2 + $0x80] sm:$0xff] %v3025_v0 }
  0x20   : > { %340 = vst [vmem:[#allocation2 + $0x88] sm:$0xff] %v3025_v0 }
  0x21   : > { %341 = vst [vmem:[#allocation2 + $0xe8] sm:$0xff] %v3025_v0 }
  0x22   : > { %342 = vst [vmem:[#allocation2 + $0xb8] sm:$0xff] %v3025_v0 }
  0x23   : > { %343 = vst [vmem:[#allocation2 + $0x60] sm:$0xff] %v3025_v0 }
  0x24   : > { %344 = vst [vmem:[#allocation2 + $0xf0] sm:$0xff] %v3025_v0 }
  0x25   : > { %345 = vst [vmem:[#allocation2 + $0x8] sm:$0xff] %v3025_v0 }
  0x26   : > { %346 = vst [vmem:[#allocation2 + $0x78] sm:$0xff] %v3025_v0 }
  0x27   : > { %347 = vst [vmem:[#allocation2 + $0x38] sm:$0xff] %v3025_v0 }
  0x28   : > { %348 = vst [vmem:[#allocation2 + $0x58] sm:$0xff] %v3025_v0 }
  0x29   : > { %349 = vst [vmem:[#allocation2 + $0x40] sm:$0xff] %v3025_v0 }
  0x2a   : > { %350 = vst [vmem:[#allocation2 + $0xc8] sm:$0xff] %v3025_v0 }
  0x2b   : > { %351 = vst [vmem:[#allocation2 + $0xe0] sm:$0xff] %v3025_v0 }
  0x2c   : > { %352 = vst [vmem:[#allocation2 + $0x90] sm:$0xff] %v3025_v0 }
  0x2d   : > { %353 = vst [vmem:[#allocation2 + $0x70] sm:$0xff] %v3025_v0 }
  0x2e   : > { %354 = vst [vmem:[#allocation2 + $0xc0] sm:$0xff] %v3025_v0 }
  0x2f   : > { %355 = vst [vmem:[#allocation2 + $0xa8] sm:$0xff] %v3025_v0 }
  0x30   : > { %356 = vst [vmem:[#allocation2 + $0xd0] sm:$0xff] %v3025_v0 }
  0x31   : > { %357 = vst [vmem:[#allocation2 + $0x10] sm:$0xff] %v3025_v0 }
  0x32   : > { %358 = vst [vmem:[#allocation2 + $0x28] sm:$0xff] %v3025_v0 }
  0x33   : > { %359 = vst [vmem:[#allocation2 + $0xa0] sm:$0xff] %v3025_v0 }
  0x34   : > { %360 = vst [vmem:[#allocation2 + $0xf8] sm:$0xff] %v3025_v0 }
  0x35   : > { %361 = vst [vmem:[#allocation2 + $0x20] sm:$0xff] %v3025_v0 }
  0x36   : > { %362 = vst [vmem:[#allocation2 + $0x98] sm:$0xff] %v3025_v0 }
  0x37 PF: > { %v2853_v1 = vld [vmem:[%s3112_s16 + $0x38] sm:$0xff]  ;;  %v2852_v5 = vld [vmem:[%s3112_s16 + $0x30] sm:$0xff]  ;;  %v2851_v9 = vld [vmem:[%s3112_s16 + $0x28] sm:$0xff]  ;;  %v364_v13 = vlaneseq  ;;  %s2266_s29 = sshll.u32 %s3011_s22, 7  ;;  %s3718_s11 = scalar_lea.vmem %s3711_s0, %s3732_s28  ;;  %v3026_v51 = vmov 1.0|1.0  }
  0x38   : > { %v2861_v2 = vld [vmem:[%s3112_s16 + $0x78] sm:$0xff]  ;;  %1128 = vmatpush.bf16.msra.mxu0 %v2853_v1  ;;  %v2860_v6 = vld [vmem:[%s3112_s16 + $0x70] sm:$0xff]  ;;  %v2859_v10 = vld [vmem:[%s3112_s16 + $0x68] sm:$0xff]  ;;  %v3151_v26 = vstv %s2266_s29  ;;  %p2779_p9 = scmp.ne.s32.totalorder %s3007_s21, 1 }
  0x39   : > { %v2869_v3 = vld [vmem:[%s3112_s16 + $0xb8] sm:$0xff]  ;;  %1177 = vmatpush.bf16.msra.mxu1 %v2861_v2  ;;  %v2868_v7 = vld [vmem:[%s3112_s16 + $0xb0] sm:$0xff]  ;;  %v2867_v11 = vld [vmem:[%s3112_s16 + $0xa8] sm:$0xff]  ;;  %v3141_v18 = vshrl.u32 %v364_v13, 7 }
  0x3a   : > { %v2877_v4 = vld [vmem:[%s3112_s16 + $0xf8] sm:$0xff]  ;;  %1226 = vmatpush.bf16.msra.mxu2 %v2869_v3  ;;  %v2876_v8 = vld [vmem:[%s3112_s16 + $0xf0] sm:$0xff]  ;;  %v2875_v12 = vld [vmem:[%s3112_s16 + $0xe8] sm:$0xff] }
  0x3b   : > { %1275 = vmatpush.bf16.msra.mxu3 %v2877_v4  ;;  %v2850_v14 = vld [vmem:[%s3112_s16 + $0x20] sm:$0xff]  ;;  %v2849_v19 = vld [vmem:[%s3112_s16 + $0x18] sm:$0xff]  ;;  %v366_v23 = vadd.s32 8, %v3141_v18  ;;  %v2848_v24 = vld [vmem:[%s3112_s16 + $0x10] sm:$0xff]  ;;  %v3162_v30 = vadd.s32 %v3151_v26, %v3141_v18  ;;  %v367_v52 = vadd.s32 16, %v3141_v18  ;;  %v368_v53 = vadd.s32 24, %v3141_v18 }
  0x3c   : > { %1129 = vmatpush.bf16.msra.mxu0 %v2852_v5  ;;  %v2858_v15 = vld [vmem:[%s3112_s16 + $0x60] sm:$0xff]  ;;  %v2857_v20 = vld [vmem:[%s3112_s16 + $0x58] sm:$0xff]  ;;  %v2856_v25 = vld [vmem:[%s3112_s16 + $0x50] sm:$0xff]  ;;  %v369_v62 = vadd.s32 32, %v3141_v18  ;;  %v370_v63 = vadd.s32 40, %v3141_v18 }
  0x3d   : > { %1178 = vmatpush.bf16.msra.mxu1 %v2860_v6  ;;  %v2866_v16 = vld [vmem:[%s3112_s16 + $0xa0] sm:$0xff]  ;;  %v2865_v21 = vld [vmem:[%s3112_s16 + $0x98] sm:$0xff]  ;;  %v2864_v28 = vld [vmem:[%s3112_s16 + $0x90] sm:$0xff]  ;;  %v3165_v31 = vadd.s32 %v3151_v26, %v366_v23  ;;  %v3222_v58 = vadd.s32 %v3151_v26, %v367_v52  ;;  %v3225_v59 = vadd.s32 %v3151_v26, %v368_v53  ;;  %v371_v6 = vadd.s32 48, %v3141_v18 }
  0x3e   : > { %1227 = vmatpush.bf16.msra.mxu2 %v2868_v7  ;;  %v2874_v17 = vld [vmem:[%s3112_s16 + $0xe0] sm:$0xff]  ;;  %v2873_v22 = vld [vmem:[%s3112_s16 + $0xd8] sm:$0xff]  ;;  %v2872_v29 = vld [vmem:[%s3112_s16 + $0xd0] sm:$0xff]  ;;  %v3256_v4 = vadd.s32 %v3151_v26, %v369_v62  ;;  %v3259_v5 = vadd.s32 %v3151_v26, %v370_v63  ;;  %v372_v7 = vadd.s32 56, %v3141_v18  ;;  %v375_v23 = vadd.s32 80, %v3141_v18 }
  0x3f   : > { %1276 = vmatpush.bf16.msra.mxu3 %v2876_v8  ;;  %v398_v27 = vld [vmem:[%s3718_s11] sm:$0xf]  ;;  %v2847_v33 = vld [vmem:[%s3112_s16 + $0x8] sm:$0xff]  ;;  %v2901_v45 = vld [vmem:[%s3117_s19 + $0xb8] sm:$0xff] }
  0x40   : > { %1130 = vmatpush.bf16.msra.mxu0 %v2851_v9  ;;  %v3167_v32 = vperm.slane %v398_v27, 0  ;;  %v2855_v34 = vld [vmem:[%s3112_s16 + $0x48] sm:$0xff]  ;;  %v3171_v35 = vperm.slane %v398_v27, 1  ;;  %v3175_v38 = vperm.slane %v398_v27, 2  ;;  %v3177_v39 = vperm.slane %v398_v27, 3  ;;  %v2846_v40 = vld [vmem:[%s3112_s16] sm:$0xff] }
  0x41   : > { %1179 = vmatpush.bf16.msra.mxu1 %v2859_v10  ;;  %v2863_v36 = vld [vmem:[%s3112_s16 + $0x88] sm:$0xff]  ;;  %v2854_v41 = vld [vmem:[%s3112_s16 + $0x40] sm:$0xff]  ;;  %v2909_v46 = vld [vmem:[%s3117_s19 + $0xf8] sm:$0xff]  ;;  %v3291_v13 = vadd.s32 %v3151_v26, %v372_v7 }
  0x42   : > { %1228 = vmatpush.bf16.msra.mxu2 %v2867_v11  ;;  %v2871_v37 = vld [vmem:[%s3112_s16 + $0xc8] sm:$0xff]  ;;  %vm403_vm0 = vcmp.eq.s32.totalorder %v3167_v32, %v3162_v30  ;;  %vm407_vm1 = vcmp.eq.s32.totalorder %v3167_v32, %v3165_v31  ;;  %vm404_vm2 = vcmp.eq.s32.totalorder %v3171_v35, %v3162_v30  ;;  %vm408_vm3 = vcmp.eq.s32.totalorder %v3171_v35, %v3165_v31  ;;  %v2862_v42 = vld [vmem:[%s3112_s16 + $0x80] sm:$0xff]  ;;  %v2885_v47 = vld [vmem:[%s3117_s19 + $0x38] sm:$0xff] }
  0x43   : > { %1277 = vmatpush.bf16.msra.mxu3 %v2875_v12  ;;  %v2870_v43 = vld [vmem:[%s3112_s16 + $0xc0] sm:$0xff]  ;;  %vm405_vm4 = vcmp.eq.s32.totalorder %v3175_v38, %v3162_v30  ;;  %vm409_vm5 = vcmp.eq.s32.totalorder %v3175_v38, %v3165_v31  ;;  %vm3195_vm6 = vmpackc.low %vm407_vm1, %vm403_vm0  ;;  %vm406_vm7 = vcmp.eq.s32.totalorder %v3177_v39, %v3162_v30  ;;  %vm410_vm8 = vcmp.eq.s32.totalorder %v3177_v39, %v3165_v31  ;;  %v2893_v48 = vld [vmem:[%s3117_s19 + $0x78] sm:$0xff] }
  0x44   : > { %1131 = vmatpush.bf16.msra.mxu0 %v2850_v14  ;;  %vm2539_vm9 = vmpackc.low %vm408_vm3, %vm404_vm2  ;;  %v2900_v49 = vld [vmem:[%s3117_s19 + $0xb0] sm:$0xff]  ;;  %v2899_v56 = vld [vmem:[%s3117_s19 + $0xa8] sm:$0xff]  ;;  %vm411_vm12 = vcmp.eq.s32.totalorder %v3167_v32, %v3222_v58  ;;  %vm415_vm13 = vcmp.eq.s32.totalorder %v3167_v32, %v3225_v59  ;;  %vm412_vm14 = vcmp.eq.s32.totalorder %v3171_v35, %v3222_v58  ;;  %vm416_vm15 = vcmp.eq.s32.totalorder %v3171_v35, %v3225_v59 }
  0x45   : > { %1180 = vmatpush.bf16.msra.mxu1 %v2858_v15  ;;  %vm2555_vm10 = vmpackc.low %vm409_vm5, %vm405_vm4  ;;  %v2908_v50 = vld [vmem:[%s3117_s19 + $0xf0] sm:$0xff]  ;;  %v2907_v57 = vld [vmem:[%s3117_s19 + $0xe8] sm:$0xff]  ;;  %vm413_vm0 = vcmp.eq.s32.totalorder %v3175_v38, %v3222_v58  ;;  %vm417_vm1 = vcmp.eq.s32.totalorder %v3175_v38, %v3225_v59  ;;  %vm414_vm3 = vcmp.eq.s32.totalorder %v3177_v39, %v3222_v58  ;;  %vm418_vm4 = vcmp.eq.s32.totalorder %v3177_v39, %v3225_v59 }
  0x46   : > { %1229 = vmatpush.bf16.msra.mxu2 %v2866_v16  ;;  %vm2571_vm11 = vmpackc.low %vm410_vm8, %vm406_vm7  ;;  %v2884_v54 = vld [vmem:[%s3117_s19 + $0x30] sm:$0xff]  ;;  %v2883_v60 = vld [vmem:[%s3117_s19 + $0x28] sm:$0xff]  ;;  %vm419_vm8 = vcmp.eq.s32.totalorder %v3167_v32, %v3256_v4  ;;  %v3288_v12 = vadd.s32 %v3151_v26, %v371_v6  ;;  %v373_v14 = vadd.s32 64, %v3141_v18  ;;  %v374_v15 = vadd.s32 72, %v3141_v18 }
  0x47   : > { %1278 = vmatpush.bf16.msra.mxu3 %v2874_v17  ;;  %v2892_v55 = vld [vmem:[%s3117_s19 + $0x70] sm:$0xff]  ;;  %v2891_v61 = vld [vmem:[%s3117_s19 + $0x68] sm:$0xff]  ;;  %vm2525_vm2 = vmpackc.low %vm415_vm13, %vm411_vm12  ;;  %vm421_vm12 = vcmp.eq.s32.totalorder %v3175_v38, %v3256_v4  ;;  %vm425_vm13 = vcmp.eq.s32.totalorder %v3175_v38, %v3259_v5 }
  0x48   : > { %1132 = vmatpush.bf16.msra.mxu0 %v2849_v19  ;;  %vm2541_vm5 = vmpackc.low %vm416_vm15, %vm412_vm14  ;;  %v2898_v0 = vld [vmem:[%s3117_s19 + $0xa0] sm:$0xff]  ;;  %vm422_vm15 = vcmp.eq.s32.totalorder %v3177_v39, %v3256_v4  ;;  %v2897_v8 = vld [vmem:[%s3117_s19 + $0x98] sm:$0xff] }
  0x49   : > { %1181 = vmatpush.bf16.msra.mxu1 %v2857_v20  ;;  %vm2573_vm7 = vmpackc.low %vm418_vm4, %vm414_vm3  ;;  %v2906_v1 = vld [vmem:[%s3117_s19 + $0xe0] sm:$0xff]  ;;  %v2905_v9 = vld [vmem:[%s3117_s19 + $0xd8] sm:$0xff]  ;;  %vm427_vm4 = vcmp.eq.s32.totalorder %v3167_v32, %v3288_v12 }
  0x4a   : > { %1230 = vmatpush.bf16.msra.mxu2 %v2865_v21  ;;  %v2882_v2 = vld [vmem:[%s3117_s19 + $0x20] sm:$0xff]  ;;  %v2881_v10 = vld [vmem:[%s3117_s19 + $0x18] sm:$0xff]  ;;  %v2896_v16 = vld [vmem:[%s3117_s19 + $0x90] sm:$0xff]  ;;  %v3320_v21 = vadd.s32 %v3151_v26, %v373_v14 }
  0x4b   : > { %1279 = vmatpush.bf16.msra.mxu3 %v2873_v22  ;;  %v2890_v3 = vld [vmem:[%s3117_s19 + $0x60] sm:$0xff]  ;;  %v2889_v11 = vld [vmem:[%s3117_s19 + $0x58] sm:$0xff]  ;;  %v2904_v17 = vld [vmem:[%s3117_s19 + $0xd0] sm:$0xff]  ;;  %v3323_v22 = vadd.s32 %v3151_v26, %v374_v15 }
  0x4c   : > { %1133 = vmatpush.bf16.msra.mxu0 %v2848_v24  ;;  %v2880_v19 = vld [vmem:[%s3117_s19 + $0x10] sm:$0xff]  ;;  %v376_v24 = vadd.s32 88, %v3141_v18  ;;  %v2903_v27 = vld [vmem:[%s3117_s19 + $0xc8] sm:$0xff] }
  0x4d   : > { %1182 = vmatpush.bf16.msra.mxu1 %v2856_v25  ;;  %v2888_v20 = vld [vmem:[%s3117_s19 + $0x50] sm:$0xff]  ;;  %v2895_v25 = vld [vmem:[%s3117_s19 + $0x88] sm:$0xff] }
  0x4e   : > { %1231 = vmatpush.bf16.msra.mxu2 %v2864_v28  ;;  %v2879_v28 = vld [vmem:[%s3117_s19 + $0x8] sm:$0xff]  ;;  %v858_v14 = vld [vmem:[#allocation2 + $0x50] sm:$0xff] }
  0x4f   : > { %1280 = vmatpush.bf16.msra.mxu3 %v2872_v29  ;;  %v2887_v29 = vld [vmem:[%s3117_s19 + $0x48] sm:$0xff] }
  0x50   : > { %1134 = vmatpush.bf16.msra.mxu0 %v2847_v33  ;;  %v3352_v33 = vadd.s32 %v3151_v26, %v375_v23 }
  0x51   : > { %1183 = vmatpush.bf16.msra.mxu1 %v2855_v34  ;;  %v3355_v34 = vadd.s32 %v3151_v26, %v376_v24 }
  0x52   : > { %1232 = vmatpush.bf16.msra.mxu2 %v2863_v36  ;;  %v377_v36 = vadd.s32 96, %v3141_v18 }
  0x53   : > { %1281 = vmatpush.bf16.msra.mxu3 %v2871_v37  ;;  %v378_v37 = vadd.s32 104, %v3141_v18 }
  0x54   : > { %1135 = vmatpush.bf16.msra.mxu0 %v2846_v40  ;;  %v2894_v40 = vld [vmem:[%s3117_s19 + $0x80] sm:$0xff]  ;;  %v3384_v44 = vadd.s32 %v3151_v26, %v377_v36 }
  0x55   : > { %1184 = vmatpush.bf16.msra.mxu1 %v2854_v41  ;;  %v2902_v41 = vld [vmem:[%s3117_s19 + $0xc0] sm:$0xff] }
  0x56   : > { %1233 = vmatpush.bf16.msra.mxu2 %v2862_v42  ;;  %v2878_v42 = vld [vmem:[%s3117_s19] sm:$0xff] }
  0x57   : > { %1282 = vmatpush.bf16.msra.mxu3 %v2870_v43  ;;  %2524 = vmatmul.msk.bf16.vlgmr.msra.gmra.mxu0 %vm3195_vm6, %v3026_v51  ;;  %vm2557_vm6 = vmpackc.low %vm417_vm1, %vm413_vm0  ;;  %vm426_vm0 = vcmp.eq.s32.totalorder %v3177_v39, %v3259_v5  ;;  %v2886_v43 = vld [vmem:[%s3117_s19 + $0x40] sm:$0xff] }
  0x58   : > { %2540 = vmatmul.msk.bf16.vlgmr.msra.gmra.mxu1 %vm2539_vm9, %v3026_v51  ;;  %1628 = vmatpush.bf16.msrb.mxu0 %v2885_v47  ;;  %vm423_vm9 = vcmp.eq.s32.totalorder %v3167_v32, %v3259_v5  ;;  %vm2575_vm3 = vmpackc.low %vm426_vm0, %vm422_vm15  ;;  %vm435_vm0 = vcmp.eq.s32.totalorder %v3167_v32, %v3320_v21  ;;  %v380_v47 = vadd.s32 120, %v3141_v18 }
  0x59   : > { %2556 = vmatmul.msk.bf16.vlgmr.msra.gmra.mxu2 %vm2555_vm10, %v3026_v51  ;;  %1677 = vmatpush.bf16.msrb.mxu1 %v2893_v48  ;;  %vm420_vm10 = vcmp.eq.s32.totalorder %v3171_v35, %v3256_v4  ;;  %vm2527_vm14 = vmpackc.low %vm423_vm9, %vm419_vm8  ;;  %vm429_vm8 = vcmp.eq.s32.totalorder %v3175_v38, %v3288_v12  ;;  %vm433_vm9 = vcmp.eq.s32.totalorder %v3175_v38, %v3291_v13 }
  0x5a   : > { %1726 = vmatpush.bf16.msrb.mxu2 %v2901_v45  ;;  %2572 = vmatmul.msk.bf16.vlgmr.msra.gmra.mxu3 %vm2571_vm11, %v3026_v51  ;;  %vm424_vm11 = vcmp.eq.s32.totalorder %v3171_v35, %v3259_v5  ;;  %v3387_v45 = vadd.s32 %v3151_v26, %v378_v37 }
  0x5b   : > { %1775 = vmatpush.bf16.msrb.mxu3 %v2909_v46  ;;  %vm2543_vm1 = vmpackc.low %vm424_vm11, %vm420_vm10  ;;  %vm430_vm11 = vcmp.eq.s32.totalorder %v3177_v39, %v3288_v12  ;;  %v379_v46 = vadd.s32 112, %v3141_v18  ;;  %v627_v18 = vld [vmem:[%s307_s12] sm:$0xf] }
  0x5c   : > { %1629 = vmatpush.bf16.msrb.mxu0 %v2884_v54 }
  0x5d   : > { %1678 = vmatpush.bf16.msrb.mxu1 %v2892_v55  ;;  %v3412_v48 = vadd.s32 %v3151_v26, %v379_v46 }
  0x5e   : > { %1727 = vmatpush.bf16.msrb.mxu2 %v2900_v49  ;;  %v3415_v49 = vadd.s32 %v3151_v26, %v380_v47  ;;  %v3442_v26 = vperm.slane %v627_v18, 0 }
  0x5f   : > { %1776 = vmatpush.bf16.msrb.mxu3 %v2908_v50 }
  0x60   : > { %1630 = vmatpush.bf16.msrb.mxu0 %v2883_v60 }
  0x61   : > { %1679 = vmatpush.bf16.msrb.mxu1 %v2891_v61 }
  0x62   : > { %1728 = vmatpush.bf16.msrb.mxu2 %v2899_v56 }
  0x63   : > { %1777 = vmatpush.bf16.msrb.mxu3 %v2907_v57 }
  0x64   : > { %1631 = vmatpush.bf16.msrb.mxu0 %v2882_v2 }
  0x65   : > { %1680 = vmatpush.bf16.msrb.mxu1 %v2890_v3  ;;  %v857_v3 = vld [vmem:[#allocation2 + $0xd8] sm:$0xff] }
  0x66   : > { %1729 = vmatpush.bf16.msrb.mxu2 %v2898_v0 }
  0x67   : > { %2526 = vmatmul.msk.bf16.gmra.mxu0 %vm2525_vm2, %v3026_v51  ;;  %1778 = vmatpush.bf16.msrb.mxu3 %v2906_v1  ;;  %vm2559_vm2 = vmpackc.low %vm425_vm13, %vm421_vm12  ;;  %vm434_vm12 = vcmp.eq.s32.totalorder %v3177_v39, %v3291_v13 }
  0x68   : > { %2542 = vmatmul.msk.bf16.gmra.mxu1 %vm2541_vm5, %v3026_v51  ;;  %1632 = vmatpush.bf16.msrb.mxu0 %v2881_v10  ;;  %vm431_vm5 = vcmp.eq.s32.totalorder %v3167_v32, %v3291_v13  ;;  %vm2577_vm15 = vmpackc.low %vm434_vm12, %vm430_vm11  ;;  %vm443_vm12 = vcmp.eq.s32.totalorder %v3167_v32, %v3352_v33 }
  0x69   : > { %2558 = vmatmul.msk.bf16.gmra.mxu2 %vm2557_vm6, %v3026_v51  ;;  %1681 = vmatpush.bf16.msrb.mxu1 %v2889_v11  ;;  %vm428_vm6 = vcmp.eq.s32.totalorder %v3171_v35, %v3288_v12  ;;  %vm2529_vm10 = vmpackc.low %vm431_vm5, %vm427_vm4  ;;  %vm437_vm4 = vcmp.eq.s32.totalorder %v3175_v38, %v3320_v21  ;;  %vm441_vm5 = vcmp.eq.s32.totalorder %v3175_v38, %v3323_v22 }
  0x6a   : > { %2574 = vmatmul.msk.bf16.gmra.mxu3 %vm2573_vm7, %v3026_v51  ;;  %1730 = vmatpush.bf16.msrb.mxu2 %v2897_v8  ;;  %vm432_vm7 = vcmp.eq.s32.totalorder %v3171_v35, %v3291_v13 }
  0x6b   : > { %1779 = vmatpush.bf16.msrb.mxu3 %v2905_v9  ;;  %vm2545_vm13 = vmpackc.low %vm432_vm7, %vm428_vm6  ;;  %vm438_vm7 = vcmp.eq.s32.totalorder %v3177_v39, %v3320_v21 }
  0x6c   : > { %1633 = vmatpush.bf16.msrb.mxu0 %v2880_v19 }
  0x6d   : > { %1682 = vmatpush.bf16.msrb.mxu1 %v2888_v20 }
  0x6e   : > { %1731 = vmatpush.bf16.msrb.mxu2 %v2896_v16 }
  0x6f   : > { %1780 = vmatpush.bf16.msrb.mxu3 %v2904_v17 }
  0x70   : > { %1634 = vmatpush.bf16.msrb.mxu0 %v2879_v28 }
  0x71   : > { %1683 = vmatpush.bf16.msrb.mxu1 %v2887_v29 }
  0x72   : > { %1732 = vmatpush.bf16.msrb.mxu2 %v2895_v25 }
  0x73   : > { %1781 = vmatpush.bf16.msrb.mxu3 %v2903_v27  ;;  %v859_v27 = vld [vmem:[#allocation2 + $0x30] sm:$0xff] }
  0x74   : > { %1635 = vmatpush.bf16.msrb.mxu0 %v2878_v42  ;;  %v860_v42 = vld [vmem:[#allocation2 + $0x80] sm:$0xff] }
  0x75   : > { %1684 = vmatpush.bf16.msrb.mxu1 %v2886_v43 }
  0x76   : > { %1733 = vmatpush.bf16.msrb.mxu2 %v2894_v40 }
  0x77   : > { %2528 = vmatmul.msk.bf16.gmra.mxu0 %vm2527_vm14, %v3026_v51  ;;  %vm2561_vm14 = vmpackc.low %vm433_vm9, %vm429_vm8  ;;  %vm442_vm8 = vcmp.eq.s32.totalorder %v3177_v39, %v3323_v22  ;;  %1782 = vmatpush.bf16.msrb.mxu3 %v2902_v41 }
  0x78   : > { %2544 = vmatmul.msk.bf16.gmra.mxu1 %vm2543_vm1, %v3026_v51  ;;  %vm439_vm1 = vcmp.eq.s32.totalorder %v3167_v32, %v3323_v22  ;;  %vm2579_vm11 = vmpackc.low %vm442_vm8, %vm438_vm7  ;;  %vm451_vm8 = vcmp.eq.s32.totalorder %v3167_v32, %v3384_v44 }
  0x79   : > { %2560 = vmatmul.msk.bf16.gmra.mxu2 %vm2559_vm2, %v3026_v51  ;;  %vm436_vm2 = vcmp.eq.s32.totalorder %v3171_v35, %v3320_v21  ;;  %vm2531_vm6 = vmpackc.low %vm439_vm1, %vm435_vm0  ;;  %vm445_vm0 = vcmp.eq.s32.totalorder %v3175_v38, %v3352_v33  ;;  %vm449_vm1 = vcmp.eq.s32.totalorder %v3175_v38, %v3355_v34 }
  0x7a   : > { %2576 = vmatmul.msk.bf16.gmra.mxu3 %vm2575_vm3, %v3026_v51  ;;  %vm440_vm3 = vcmp.eq.s32.totalorder %v3171_v35, %v3323_v22 }
  0x7b   : > { %vm2547_vm9 = vmpackc.low %vm440_vm3, %vm436_vm2  ;;  %vm446_vm3 = vcmp.eq.s32.totalorder %v3177_v39, %v3352_v33 }
  0x87   : > { %2530 = vmatmul.msk.bf16.gmra.mxu0 %vm2529_vm10, %v3026_v51  ;;  %vm2563_vm10 = vmpackc.low %vm441_vm5, %vm437_vm4  ;;  %vm450_vm4 = vcmp.eq.s32.totalorder %v3177_v39, %v3355_v34 }
  0x88   : > { %2546 = vmatmul.msk.bf16.gmra.mxu1 %vm2545_vm13, %v3026_v51  ;;  %vm447_vm13 = vcmp.eq.s32.totalorder %v3167_v32, %v3355_v34  ;;  %vm2581_vm7 = vmpackc.low %vm450_vm4, %vm446_vm3  ;;  %vm459_vm4 = vcmp.eq.s32.totalorder %v3167_v32, %v3412_v48 }
  0x89   : > { %2562 = vmatmul.msk.bf16.gmra.mxu2 %vm2561_vm14, %v3026_v51  ;;  %vm444_vm14 = vcmp.eq.s32.totalorder %v3171_v35, %v3352_v33  ;;  %vm2533_vm2 = vmpackc.low %vm447_vm13, %vm443_vm12  ;;  %vm453_vm12 = vcmp.eq.s32.totalorder %v3175_v38, %v3384_v44  ;;  %vm457_vm13 = vcmp.eq.s32.totalorder %v3175_v38, %v3387_v45 }
  0x8a   : > { %2578 = vmatmul.msk.bf16.gmra.mxu3 %vm2577_vm15, %v3026_v51  ;;  %vm448_vm15 = vcmp.eq.s32.totalorder %v3171_v35, %v3355_v34 }
  0x8b   : > { %vm2549_vm5 = vmpackc.low %vm448_vm15, %vm444_vm14  ;;  %vm454_vm15 = vcmp.eq.s32.totalorder %v3177_v39, %v3384_v44 }
  0x97   : > { %2532 = vmatmul.msk.bf16.gmra.mxu0 %vm2531_vm6, %v3026_v51  ;;  %vm2565_vm6 = vmpackc.low %vm449_vm1, %vm445_vm0  ;;  %vm458_vm0 = vcmp.eq.s32.totalorder %v3177_v39, %v3387_v45 }
  0x98   : > { %2548 = vmatmul.msk.bf16.gmra.mxu1 %vm2547_vm9, %v3026_v51  ;;  %vm455_vm9 = vcmp.eq.s32.totalorder %v3167_v32, %v3387_v45  ;;  %vm2583_vm3 = vmpackc.low %vm458_vm0, %vm454_vm15  ;;  %vm632_vm0 = vcmp.eq.s32.totalorder %v3442_v26, %v3162_v30 }
  0x99   : > { %2564 = vmatmul.msk.bf16.gmra.mxu2 %vm2563_vm10, %v3026_v51  ;;  %vm452_vm10 = vcmp.eq.s32.totalorder %v3171_v35, %v3384_v44  ;;  %vm2535_vm14 = vmpackc.low %vm455_vm9, %vm451_vm8  ;;  %vm461_vm8 = vcmp.eq.s32.totalorder %v3175_v38, %v3412_v48  ;;  %vm465_vm9 = vcmp.eq.s32.totalorder %v3175_v38, %v3415_v49  ;;  %v3448_v38 = vperm.slane %v627_v18, 3 }
  0x9a   : > { %2580 = vmatmul.msk.bf16.gmra.mxu3 %vm2579_vm11, %v3026_v51  ;;  %vm456_vm11 = vcmp.eq.s32.totalorder %v3171_v35, %v3387_v45 }
  0x9b   : > { %vm2551_vm1 = vmpackc.low %vm456_vm11, %vm452_vm10  ;;  %vm462_vm11 = vcmp.eq.s32.totalorder %v3177_v39, %v3412_v48 }
  0xa7   : > { %2534 = vmatmul.msk.bf16.gmra.mxu0 %vm2533_vm2, %v3026_v51  ;;  %vm2567_vm2 = vmpackc.low %vm457_vm13, %vm453_vm12  ;;  %vm466_vm12 = vcmp.eq.s32.totalorder %v3177_v39, %v3415_v49 }
  0xa8   : > { %2550 = vmatmul.msk.bf16.gmra.mxu1 %vm2549_vm5, %v3026_v51  ;;  %vm463_vm5 = vcmp.eq.s32.totalorder %v3167_v32, %v3415_v49  ;;  %vm2585_vm15 = vmpackc.low %vm466_vm12, %vm462_vm11  ;;  %v3444_v32 = vperm.slane %v627_v18, 1  ;;  %vm640_vm12 = vcmp.eq.s32.totalorder %v3442_v26, %v3222_v58 }
  0xa9   : > { %2566 = vmatmul.msk.bf16.gmra.mxu2 %vm2565_vm6, %v3026_v51  ;;  %vm460_vm6 = vcmp.eq.s32.totalorder %v3171_v35, %v3412_v48  ;;  %vm2537_vm10 = vmpackc.low %vm463_vm5, %vm459_vm4 }
  0xaa   : > { %2582 = vmatmul.msk.bf16.gmra.mxu3 %vm2581_vm7, %v3026_v51  ;;  %vm464_vm7 = vcmp.eq.s32.totalorder %v3171_v35, %v3415_v49  ;;  %v3446_v35 = vperm.slane %v627_v18, 2 }
  0xab   : > { %vm2553_vm13 = vmpackc.low %vm464_vm7, %vm460_vm6  ;;  %vm635_vm7 = vcmp.eq.s32.totalorder %v3448_v38, %v3162_v30 }
  0xac   : > { %vm634_vm4 = vcmp.eq.s32.totalorder %v3446_v35, %v3162_v30  ;;  %vm638_vm5 = vcmp.eq.s32.totalorder %v3446_v35, %v3165_v31 }
  0xb7   : > { %2536 = vmatmul.msk.bf16.gmra.mxu0 %vm2535_vm14, %v3026_v51  ;;  %vm2569_vm14 = vmpackc.low %vm465_vm9, %vm461_vm8  ;;  %vm639_vm8 = vcmp.eq.s32.totalorder %v3448_v38, %v3165_v31 }
  0xb8   : > { %2552 = vmatmul.msk.bf16.gmra.mxu1 %vm2551_vm1, %v3026_v51  ;;  %vm636_vm1 = vcmp.eq.s32.totalorder %v3442_v26, %v3165_v31  ;;  %vm2763_vm11 = vmpackc.low %vm639_vm8, %vm635_vm7  ;;  %vm648_vm8 = vcmp.eq.s32.totalorder %v3442_v26, %v3256_v4 }
  0xb9   : > { %2568 = vmatmul.msk.bf16.gmra.mxu2 %vm2567_vm2, %v3026_v51  ;;  %vm633_vm2 = vcmp.eq.s32.totalorder %v3444_v32, %v3162_v30  ;;  %vm2715_vm6 = vmpackc.low %vm636_vm1, %vm632_vm0  ;;  %vm642_vm0 = vcmp.eq.s32.totalorder %v3446_v35, %v3222_v58  ;;  %vm646_vm1 = vcmp.eq.s32.totalorder %v3446_v35, %v3225_v59 }
  0xba   : > { %2584 = vmatmul.msk.bf16.gmra.mxu3 %vm2583_vm3, %v3026_v51  ;;  %vm637_vm3 = vcmp.eq.s32.totalorder %v3444_v32, %v3165_v31  ;;  %v856_v31 = vld [vmem:[#allocation2 + $0xb0] sm:$0xff] }
  0xbb   : > { %vm2731_vm9 = vmpackc.low %vm637_vm3, %vm633_vm2  ;;  %vm643_vm3 = vcmp.eq.s32.totalorder %v3448_v38, %v3222_v58 }
  0xc7   : > { %2538 = vmatmul.msk.bf16.gmra.mxu0 %vm2537_vm10, %v3026_v51  ;;  %vm2747_vm10 = vmpackc.low %vm638_vm5, %vm634_vm4  ;;  %vm647_vm4 = vcmp.eq.s32.totalorder %v3448_v38, %v3225_v59 }
  0xc8   : > { %2554 = vmatmul.msk.bf16.gmra.mxu1 %vm2553_vm13, %v3026_v51  ;;  %vm644_vm13 = vcmp.eq.s32.totalorder %v3442_v26, %v3225_v59  ;;  %vm2765_vm7 = vmpackc.low %vm647_vm4, %vm643_vm3  ;;  %vm656_vm4 = vcmp.eq.s32.totalorder %v3442_v26, %v3288_v12 }
  0xc9   : > { %2570 = vmatmul.msk.bf16.gmra.mxu2 %vm2569_vm14, %v3026_v51  ;;  %vm641_vm14 = vcmp.eq.s32.totalorder %v3444_v32, %v3222_v58  ;;  %vm2717_vm2 = vmpackc.low %vm644_vm13, %vm640_vm12  ;;  %vm650_vm12 = vcmp.eq.s32.totalorder %v3446_v35, %v3256_v4  ;;  %vm654_vm13 = vcmp.eq.s32.totalorder %v3446_v35, %v3259_v5 }
  0xca   : > { %2586 = vmatmul.msk.bf16.gmra.mxu3 %vm2585_vm15, %v3026_v51  ;;  %vm645_vm15 = vcmp.eq.s32.totalorder %v3444_v32, %v3225_v59 }
  0xcb   : > { %vm2733_vm5 = vmpackc.low %vm645_vm15, %vm641_vm14  ;;  %vm651_vm15 = vcmp.eq.s32.totalorder %v3448_v38, %v3256_v4 }
  0xd4   : > { %v1137_v39 = vpop.f32.mrf.mxu0 }
  0xd5   : > { %v1186_v50 = vpop.f32.mrf.mxu1 }
  0xd6   : > { %v1187_v52 = vadd.f32 %v1186_v50, %v1137_v39 }
  0xd7   : > { %2716 = vmatmul.msk.bf16.vlgmr.msrb.gmra.mxu0 %vm2715_vm6, %v3026_v51  ;;  %vm2749_vm6 = vmpackc.low %vm646_vm1, %vm642_vm0  ;;  %vm655_vm0 = vcmp.eq.s32.totalorder %v3448_v38, %v3259_v5 }
  0xd8   : > { %2732 = vmatmul.msk.bf16.vlgmr.msrb.gmra.mxu1 %vm2731_vm9, %v3026_v51  ;;  %vm652_vm9 = vcmp.eq.s32.totalorder %v3442_v26, %v3259_v5  ;;  %vm2767_vm3 = vmpackc.low %vm655_vm0, %vm651_vm15  ;;  %vm664_vm0 = vcmp.eq.s32.totalorder %v3442_v26, %v3320_v21 }
  0xd9   : > { %2748 = vmatmul.msk.bf16.vlgmr.msrb.gmra.mxu2 %vm2747_vm10, %v3026_v51  ;;  %vm649_vm10 = vcmp.eq.s32.totalorder %v3444_v32, %v3256_v4  ;;  %vm2719_vm14 = vmpackc.low %vm652_vm9, %vm648_vm8  ;;  %vm658_vm8 = vcmp.eq.s32.totalorder %v3446_v35, %v3288_v12  ;;  %vm662_vm9 = vcmp.eq.s32.totalorder %v3446_v35, %v3291_v13 }
  0xda   : > { %2764 = vmatmul.msk.bf16.vlgmr.msrb.gmra.mxu3 %vm2763_vm11, %v3026_v51  ;;  %vm653_vm11 = vcmp.eq.s32.totalorder %v3444_v32, %v3259_v5 }
  0xdb   : > { %vm2735_vm1 = vmpackc.low %vm653_vm11, %vm649_vm10  ;;  %vm659_vm11 = vcmp.eq.s32.totalorder %v3448_v38, %v3288_v12 }
  0xdc   : > { %v1235_v53 = vpop.f32.mrf.mxu2  ;;  %v1139_v55 = vpop.f32.mrf.mxu0 }
  0xdd   : > { %v1284_v54 = vpop.f32.mrf.mxu3  ;;  %v1236_v30 = vadd.f32 %v1235_v53, %v1187_v52  ;;  %v1188_v56 = vpop.f32.mrf.mxu1 }
  0xde   : > { %v1189_v61 = vadd.f32 %v1188_v56, %v1139_v55 }
  0xdf   : > { %v1285_v57 = vadd.f32 %v1284_v54, %v1236_v30  ;;  %v861_v54 = vld [vmem:[#allocation2 + $0xe8] sm:$0xff] }
  0xe1   : > { %v1324_v60 = vadd.f32 %v1285_v57, %v856_v31 }
  0xe3   : > { %1340 = vst [vmem:[#allocation2 + $0xb0] sm:$0xff] %v1324_v60 }
  0xe4   : > { %v1237_v62 = vpop.f32.mrf.mxu2  ;;  %v1142_v1 = vpop.f32.mrf.mxu0 }
  0xe5   : > { %v1286_v63 = vpop.f32.mrf.mxu3  ;;  %v1238_v0 = vadd.f32 %v1237_v62, %v1189_v61  ;;  %v1191_v2 = vpop.f32.mrf.mxu1  ;;  %v862_v61 = vld [vmem:[#allocation2 + $0x60] sm:$0xff] }
  0xe6   : > { %v1192_v8 = vadd.f32 %v1191_v2, %v1142_v1 }
  0xe7   : > { %v1287_v6 = vadd.f32 %v1286_v63, %v1238_v0  ;;  %2718 = vmatmul.msk.bf16.gmra.mxu0 %vm2717_vm2, %v3026_v51  ;;  %vm2751_vm2 = vmpackc.low %vm654_vm13, %vm650_vm12  ;;  %vm663_vm12 = vcmp.eq.s32.totalorder %v3448_v38, %v3291_v13 }
  0xe8   : > { %2734 = vmatmul.msk.bf16.gmra.mxu1 %vm2733_vm5, %v3026_v51  ;;  %vm660_vm5 = vcmp.eq.s32.totalorder %v3442_v26, %v3291_v13  ;;  %vm2769_vm15 = vmpackc.low %vm663_vm12, %vm659_vm11  ;;  %vm672_vm12 = vcmp.eq.s32.totalorder %v3442_v26, %v3352_v33 }
  0xe9   : > { %v1325_v7 = vadd.f32 %v1287_v6, %v857_v3  ;;  %2750 = vmatmul.msk.bf16.gmra.mxu2 %vm2749_vm6, %v3026_v51  ;;  %vm657_vm6 = vcmp.eq.s32.totalorder %v3444_v32, %v3288_v12  ;;  %vm2721_vm10 = vmpackc.low %vm660_vm5, %vm656_vm4  ;;  %vm666_vm4 = vcmp.eq.s32.totalorder %v3446_v35, %v3320_v21  ;;  %vm670_vm5 = vcmp.eq.s32.totalorder %v3446_v35, %v3323_v22 }
  0xea   : > { %2766 = vmatmul.msk.bf16.gmra.mxu3 %vm2765_vm7, %v3026_v51  ;;  %vm661_vm7 = vcmp.eq.s32.totalorder %v3444_v32, %v3291_v13 }
  0xeb   : > { %1341 = vst [vmem:[#allocation2 + $0xd8] sm:$0xff] %v1325_v7  ;;  %vm2737_vm13 = vmpackc.low %vm661_vm7, %vm657_vm6  ;;  %vm667_vm7 = vcmp.eq.s32.totalorder %v3448_v38, %v3320_v21 }
  0xec   : > { %v1240_v58 = vpop.f32.mrf.mxu2  ;;  %v1144_v10 = vpop.f32.mrf.mxu0 }
  0xed   : > { %v1289_v59 = vpop.f32.mrf.mxu3  ;;  %v1241_v9 = vadd.f32 %v1240_v58, %v1192_v8  ;;  %v1193_v11 = vpop.f32.mrf.mxu1  ;;  %v863_v8 = vld [vmem:[#allocation2 + $0x8] sm:$0xff] }
  0xee   : > { %v1194_v17 = vadd.f32 %v1193_v11, %v1144_v10 }
  0xef   : > { %v1290_v15 = vadd.f32 %v1289_v59, %v1241_v9 }
  0xf1   : > { %v1326_v16 = vadd.f32 %v1290_v15, %v858_v14  ;;  %v864_v15 = vld [vmem:[#allocation2 + $0x38] sm:$0xff] }
  0xf3   : > { %1342 = vst [vmem:[#allocation2 + $0x50] sm:$0xff] %v1326_v16 }
  0xf4   : > { %v1242_v19 = vpop.f32.mrf.mxu2  ;;  %v1147_v24 = vpop.f32.mrf.mxu0 }
  0xf5   : > { %v1291_v20 = vpop.f32.mrf.mxu3  ;;  %v1243_v23 = vadd.f32 %v1242_v19, %v1194_v17  ;;  %v1196_v25 = vpop.f32.mrf.mxu1 }
  0xf6   : > { %v1197_v36 = vadd.f32 %v1196_v25, %v1147_v24 }
  0xf7   : > { %v1292_v28 = vadd.f32 %v1291_v20, %v1243_v23  ;;  %2720 = vmatmul.msk.bf16.gmra.mxu0 %vm2719_vm14, %v3026_v51  ;;  %vm2753_vm14 = vmpackc.low %vm662_vm9, %vm658_vm8  ;;  %vm671_vm8 = vcmp.eq.s32.totalorder %v3448_v38, %v3323_v22 }
  0xf8   : > { %2736 = vmatmul.msk.bf16.gmra.mxu1 %vm2735_vm1, %v3026_v51  ;;  %vm668_vm1 = vcmp.eq.s32.totalorder %v3442_v26, %v3323_v22  ;;  %vm2771_vm11 = vmpackc.low %vm671_vm8, %vm667_vm7  ;;  %vm680_vm8 = vcmp.eq.s32.totalorder %v3442_v26, %v3384_v44 }
  0xf9   : > { %v1327_v29 = vadd.f32 %v1292_v28, %v859_v27  ;;  %2752 = vmatmul.msk.bf16.gmra.mxu2 %vm2751_vm2, %v3026_v51  ;;  %vm665_vm2 = vcmp.eq.s32.totalorder %v3444_v32, %v3320_v21  ;;  %vm2723_vm6 = vmpackc.low %vm668_vm1, %vm664_vm0  ;;  %vm674_vm0 = vcmp.eq.s32.totalorder %v3446_v35, %v3352_v33  ;;  %vm678_vm1 = vcmp.eq.s32.totalorder %v3446_v35, %v3355_v34  ;;  %v865_v28 = vld [vmem:[#allocation2 + $0x40] sm:$0xff] }
  0xfa   : > { %2768 = vmatmul.msk.bf16.gmra.mxu3 %vm2767_vm3, %v3026_v51  ;;  %vm669_vm3 = vcmp.eq.s32.totalorder %v3444_v32, %v3323_v22 }
  0xfb   : > { %1343 = vst [vmem:[#allocation2 + $0x30] sm:$0xff] %v1327_v29  ;;  %vm2739_vm9 = vmpackc.low %vm669_vm3, %vm665_vm2  ;;  %vm675_vm3 = vcmp.eq.s32.totalorder %v3448_v38, %v3352_v33 }
  0xfc   : > { %v1245_v4 = vpop.f32.mrf.mxu2  ;;  %v1149_v40 = vpop.f32.mrf.mxu0 }
  0xfd   : > { %v1294_v5 = vpop.f32.mrf.mxu3  ;;  %v1246_v37 = vadd.f32 %v1245_v4, %v1197_v36  ;;  %v1198_v41 = vpop.f32.mrf.mxu1 }
  0xfe   : > { %v1199_v47 = vadd.f32 %v1198_v41, %v1149_v40  ;;  %v866_v41 = vld [vmem:[#allocation2 + $0xe0] sm:$0xff] }
  0xff   : > { %v1295_v43 = vadd.f32 %v1294_v5, %v1246_v37 }
 0x101   : > { %v1328_v46 = vadd.f32 %v1295_v43, %v860_v42 }
 0x103   : > { %1344 = vst [vmem:[#allocation2 + $0x80] sm:$0xff] %v1328_v46 }
 0x104   : > { %v1247_v18 = vpop.f32.mrf.mxu2  ;;  %v1152_v52 = vpop.f32.mrf.mxu0 }
 0x105   : > { %v1296_v39 = vpop.f32.mrf.mxu3  ;;  %v1248_v50 = vadd.f32 %v1247_v18, %v1199_v47  ;;  %v1201_v53 = vpop.f32.mrf.mxu1 }
 0x106   : > { %v1202_v56 = vadd.f32 %v1201_v53, %v1152_v52  ;;  %v867_v53 = vld [vmem:[#allocation2 + $0x70] sm:$0xff] }
 0x107   : > { %v1297_v30 = vadd.f32 %v1296_v39, %v1248_v50  ;;  %2722 = vmatmul.msk.bf16.gmra.mxu0 %vm2721_vm10, %v3026_v51  ;;  %vm2755_vm10 = vmpackc.low %vm670_vm5, %vm666_vm4  ;;  %vm679_vm4 = vcmp.eq.s32.totalorder %v3448_v38, %v3355_v34 }
 0x108   : > { %2738 = vmatmul.msk.bf16.gmra.mxu1 %vm2737_vm13, %v3026_v51  ;;  %vm676_vm13 = vcmp.eq.s32.totalorder %v3442_v26, %v3355_v34  ;;  %vm2773_vm7 = vmpackc.low %vm679_vm4, %vm675_vm3  ;;  %vm688_vm4 = vcmp.eq.s32.totalorder %v3442_v26, %v3412_v48 }
 0x109   : > { %v1329_v55 = vadd.f32 %v1297_v30, %v861_v54  ;;  %2754 = vmatmul.msk.bf16.gmra.mxu2 %vm2753_vm14, %v3026_v51  ;;  %vm673_vm14 = vcmp.eq.s32.totalorder %v3444_v32, %v3352_v33  ;;  %vm2725_vm2 = vmpackc.low %vm676_vm13, %vm672_vm12  ;;  %vm682_vm12 = vcmp.eq.s32.totalorder %v3446_v35, %v3384_v44  ;;  %vm686_vm13 = vcmp.eq.s32.totalorder %v3446_v35, %v3387_v45 }
 0x10a   : > { %2770 = vmatmul.msk.bf16.gmra.mxu3 %vm2769_vm15, %v3026_v51  ;;  %vm677_vm15 = vcmp.eq.s32.totalorder %v3444_v32, %v3355_v34 }
 0x10b   : > { %1345 = vst [vmem:[#allocation2 + $0xe8] sm:$0xff] %v1329_v55  ;;  %vm2741_vm5 = vmpackc.low %vm677_vm15, %vm673_vm14  ;;  %vm683_vm15 = vcmp.eq.s32.totalorder %v3448_v38, %v3384_v44 }
 0x10c   : > { %v1250_v12 = vpop.f32.mrf.mxu2  ;;  %v1154_v57 = vpop.f32.mrf.mxu0 }
 0x10d   : > { %v1299_v13 = vpop.f32.mrf.mxu3  ;;  %v1251_v31 = vadd.f32 %v1250_v12, %v1202_v56  ;;  %v1203_v60 = vpop.f32.mrf.mxu1 }
 0x10e   : > { %v1204_v0 = vadd.f32 %v1203_v60, %v1154_v57 }
 0x10f   : > { %v1300_v62 = vadd.f32 %v1299_v13, %v1251_v31  ;;  %v868_v31 = vld [vmem:[#allocation2 + $0xa8] sm:$0xff] }
 0x111   : > { %v1330_v63 = vadd.f32 %v1300_v62, %v862_v61 }
 0x113   : > { %1346 = vst [vmem:[#allocation2 + $0x60] sm:$0xff] %v1330_v63 }
 0x114   : > { %v1252_v1 = vpop.f32.mrf.mxu2  ;;  %v1157_v6 = vpop.f32.mrf.mxu0 }
 0x115   : > { %v1301_v2 = vpop.f32.mrf.mxu3  ;;  %v1253_v3 = vadd.f32 %v1252_v1, %v1204_v0  ;;  %v1206_v7 = vpop.f32.mrf.mxu1  ;;  %v869_v1 = vld [vmem:[#allocation2 + $0x10] sm:$0xff] }
 0x116   : > { %v1207_v9 = vadd.f32 %v1206_v7, %v1157_v6 }
 0x117   : > { %v1302_v58 = vadd.f32 %v1301_v2, %v1253_v3  ;;  %2724 = vmatmul.msk.bf16.gmra.mxu0 %vm2723_vm6, %v3026_v51  ;;  %vm2757_vm6 = vmpackc.low %vm678_vm1, %vm674_vm0  ;;  %vm687_vm0 = vcmp.eq.s32.totalorder %v3448_v38, %v3387_v45 }
 0x118   : > { %2740 = vmatmul.msk.bf16.gmra.mxu1 %vm2739_vm9, %v3026_v51  ;;  %vm684_vm9 = vcmp.eq.s32.totalorder %v3442_v26, %v3387_v45  ;;  %vm2775_vm3 = vmpackc.low %vm687_vm0, %vm683_vm15 }
 0x119   : > { %v1331_v59 = vadd.f32 %v1302_v58, %v863_v8  ;;  %2756 = vmatmul.msk.bf16.gmra.mxu2 %vm2755_vm10, %v3026_v51  ;;  %vm681_vm10 = vcmp.eq.s32.totalorder %v3444_v32, %v3384_v44  ;;  %vm2727_vm14 = vmpackc.low %vm684_vm9, %vm680_vm8  ;;  %vm690_vm8 = vcmp.eq.s32.totalorder %v3446_v35, %v3412_v48  ;;  %vm694_vm9 = vcmp.eq.s32.totalorder %v3446_v35, %v3415_v49  ;;  %v870_v8 = vld [vmem:[#allocation2 + $0xa0] sm:$0xff] }
 0x11a   : > { %2772 = vmatmul.msk.bf16.gmra.mxu3 %vm2771_vm11, %v3026_v51  ;;  %vm685_vm11 = vcmp.eq.s32.totalorder %v3444_v32, %v3387_v45 }
 0x11b   : > { %1347 = vst [vmem:[#allocation2 + $0x8] sm:$0xff] %v1331_v59  ;;  %vm2743_vm1 = vmpackc.low %vm685_vm11, %vm681_vm10  ;;  %vm691_vm11 = vcmp.eq.s32.totalorder %v3448_v38, %v3412_v48 }
 0x11c   : > { %v1255_v21 = vpop.f32.mrf.mxu2  ;;  %v1159_v11 = vpop.f32.mrf.mxu0 }
 0x11d   : > { %v1304_v22 = vpop.f32.mrf.mxu3  ;;  %v1256_v10 = vadd.f32 %v1255_v21, %v1207_v9  ;;  %v1208_v14 = vpop.f32.mrf.mxu1 }
 0x11e   : > { %v1209_v19 = vadd.f32 %v1208_v14, %v1159_v11 }
 0x11f   : > { %v1305_v16 = vadd.f32 %v1304_v22, %v1256_v10 }
 0x121   : > { %v1332_v17 = vadd.f32 %v1305_v16, %v864_v15  ;;  %v871_v15 = vld [vmem:[#allocation2 + $0x20] sm:$0xff] }
 0x123   : > { %1348 = vst [vmem:[#allocation2 + $0x38] sm:$0xff] %v1332_v17 }
 0x124   : > { %v1257_v20 = vpop.f32.mrf.mxu2  ;;  %v1162_v25 = vpop.f32.mrf.mxu0 }
 0x125   : > { %v1306_v23 = vpop.f32.mrf.mxu3  ;;  %v1258_v24 = vadd.f32 %v1257_v20, %v1209_v19  ;;  %v1211_v27 = vpop.f32.mrf.mxu1 }
 0x126   : > { %v1212_v4 = vadd.f32 %v1211_v27, %v1162_v25  ;;  %v1356_v27 = vld [vmem:[#allocation2] sm:$0xff] }
 0x127   : > { %v1307_v29 = vadd.f32 %v1306_v23, %v1258_v24  ;;  %2726 = vmatmul.msk.bf16.gmra.mxu0 %vm2725_vm2, %v3026_v51  ;;  %vm2759_vm2 = vmpackc.low %vm686_vm13, %vm682_vm12  ;;  %vm695_vm12 = vcmp.eq.s32.totalorder %v3448_v38, %v3415_v49 }
 0x128   : > { %2742 = vmatmul.msk.bf16.gmra.mxu1 %vm2741_vm5, %v3026_v51  ;;  %vm692_vm5 = vcmp.eq.s32.totalorder %v3442_v26, %v3415_v49  ;;  %vm2777_vm15 = vmpackc.low %vm695_vm12, %vm691_vm11 }
 0x129   : > { %v1333_v36 = vadd.f32 %v1307_v29, %v865_v28  ;;  %2758 = vmatmul.msk.bf16.gmra.mxu2 %vm2757_vm6, %v3026_v51  ;;  %vm689_vm6 = vcmp.eq.s32.totalorder %v3444_v32, %v3412_v48  ;;  %vm2729_vm10 = vmpackc.low %vm692_vm5, %vm688_vm4 }
 0x12a   : > { %2774 = vmatmul.msk.bf16.gmra.mxu3 %vm2773_vm7, %v3026_v51  ;;  %vm693_vm7 = vcmp.eq.s32.totalorder %v3444_v32, %v3415_v49 }
 0x12b   : > { %1349 = vst [vmem:[#allocation2 + $0x40] sm:$0xff] %v1333_v36  ;;  %vm2745_vm13 = vmpackc.low %vm693_vm7, %vm689_vm6 }
 0x12c   : > { %v1260_v33 = vpop.f32.mrf.mxu2  ;;  %v1164_v37 = vpop.f32.mrf.mxu0 }
 0x12d   : > { %v1309_v34 = vpop.f32.mrf.mxu3  ;;  %v1261_v5 = vadd.f32 %v1260_v33, %v1212_v4  ;;  %v1213_v40 = vpop.f32.mrf.mxu1 }
 0x12e   : > { %v1214_v46 = vadd.f32 %v1213_v40, %v1164_v37  ;;  %v1357_v40 = vld [vmem:[#allocation2 + $0x18] sm:$0xff] }
 0x12f   : > { %v1310_v42 = vadd.f32 %v1309_v34, %v1261_v5 }
 0x131   : > { %v1334_v43 = vadd.f32 %v1310_v42, %v866_v41 }
 0x133   : > { %1350 = vst [vmem:[#allocation2 + $0xe0] sm:$0xff] %v1334_v43 }
 0x134   : > { %v1262_v47 = vpop.f32.mrf.mxu2  ;;  %v1167_v50 = vpop.f32.mrf.mxu0 }
 0x135   : > { %v1311_v18 = vpop.f32.mrf.mxu3  ;;  %v1263_v39 = vadd.f32 %v1262_v47, %v1214_v46  ;;  %v1216_v52 = vpop.f32.mrf.mxu1 }
 0x136   : > { %v1217_v55 = vadd.f32 %v1216_v52, %v1167_v50  ;;  %v1358_v52 = vld [vmem:[#allocation2 + $0x68] sm:$0xff] }
 0x137   : > { %v1312_v54 = vadd.f32 %v1311_v18, %v1263_v39  ;;  %2728 = vmatmul.msk.bf16.gmra.mxu0 %vm2727_vm14, %v3026_v51  ;;  %vm2761_vm14 = vmpackc.low %vm694_vm9, %vm690_vm8 }
 0x138   : > { %2744 = vmatmul.msk.bf16.gmra.mxu1 %vm2743_vm1, %v3026_v51 }
 0x139   : > { %v1335_v30 = vadd.f32 %v1312_v54, %v867_v53  ;;  %2760 = vmatmul.msk.bf16.gmra.mxu2 %vm2759_vm2, %v3026_v51 }
 0x13a   : > { %2776 = vmatmul.msk.bf16.gmra.mxu3 %vm2775_vm3, %v3026_v51 }
 0x13b   : > { %1351 = vst [vmem:[#allocation2 + $0x70] sm:$0xff] %v1335_v30 }
 0x13c   : > { %v1265_v44 = vpop.f32.mrf.mxu2  ;;  %v1169_v12 = vpop.f32.mrf.mxu0 }
 0x13d   : > { %v1314_v45 = vpop.f32.mrf.mxu3  ;;  %v1266_v56 = vadd.f32 %v1265_v44, %v1217_v55  ;;  %v1218_v13 = vpop.f32.mrf.mxu1 }
 0x13e   : > { %v1219_v61 = vadd.f32 %v1218_v13, %v1169_v12  ;;  %v1359_v13 = vld [vmem:[#allocation2 + $0x48] sm:$0xff] }
 0x13f   : > { %v1315_v57 = vadd.f32 %v1314_v45, %v1266_v56 }
 0x141   : > { %v1336_v60 = vadd.f32 %v1315_v57, %v868_v31 }
 0x143   : > { %1352 = vst [vmem:[#allocation2 + $0xa8] sm:$0xff] %v1336_v60 }
 0x144   : > { %v1267_v26 = vpop.f32.mrf.mxu2  ;;  %v1172_v32 = vpop.f32.mrf.mxu0 }
 0x145   : > { %v1316_v62 = vpop.f32.mrf.mxu3  ;;  %v1268_v63 = vadd.f32 %v1267_v26, %v1219_v61  ;;  %v1221_v0 = vpop.f32.mrf.mxu1 }
 0x146   : > { %v1222_v3 = vadd.f32 %v1221_v0, %v1172_v32  ;;  %v1360_v0 = vld [vmem:[#allocation2 + $0x88] sm:$0xff] }
 0x147   : > { %v1317_v2 = vadd.f32 %v1316_v62, %v1268_v63  ;;  %2730 = vmatmul.msk.bf16.gmra.mxu0 %vm2729_vm10, %v3026_v51 }
 0x148   : > { %2746 = vmatmul.msk.bf16.gmra.mxu1 %vm2745_vm13, %v3026_v51 }
 0x149   : > { %v1337_v35 = vadd.f32 %v1317_v2, %v869_v1  ;;  %2762 = vmatmul.msk.bf16.gmra.mxu2 %vm2761_vm14, %v3026_v51 }
 0x14a   : > { %2778 = vmatmul.msk.bf16.gmra.mxu3 %vm2777_vm15, %v3026_v51 }
 0x14b   : > { %1353 = vst [vmem:[#allocation2 + $0x10] sm:$0xff] %v1337_v35 }
 0x14c   : > { %v1270_v48 = vpop.f32.mrf.mxu2  ;;  %v1174_v6 = vpop.f32.mrf.mxu0 }
 0x14d   : > { %v1319_v49 = vpop.f32.mrf.mxu3  ;;  %v1271_v38 = vadd.f32 %v1270_v48, %v1222_v3  ;;  %v1223_v7 = vpop.f32.mrf.mxu1 }
 0x14e   : > { %v1224_v9 = vadd.f32 %v1223_v7, %v1174_v6  ;;  %v1361_v7 = vld [vmem:[#allocation2 + $0xb8] sm:$0xff] }
 0x14f   : > { %v1320_v58 = vadd.f32 %v1319_v49, %v1271_v38 }
 0x151   : > { %v1338_v59 = vadd.f32 %v1320_v58, %v870_v8 }
 0x153   : > { %1354 = vst [vmem:[#allocation2 + $0xa0] sm:$0xff] %v1338_v59 }
 0x154   : > { %v1272_v21 = vpop.f32.mrf.mxu2  ;;  %v1637_v11 = vpop.f32.mrf.mxu0 }
 0x155   : > { %v1321_v22 = vpop.f32.mrf.mxu3  ;;  %v1273_v10 = vadd.f32 %v1272_v21, %v1224_v9  ;;  %v1686_v14 = vpop.f32.mrf.mxu1 }
 0x156   : > { %v1687_v51 = vadd.f32 %v1686_v14, %v1637_v11  ;;  %v1362_v14 = vld [vmem:[#allocation2 + $0xf0] sm:$0xff] }
 0x157   : > { %v1322_v16 = vadd.f32 %v1321_v22, %v1273_v10 }
 0x159   : > { %v1339_v17 = vadd.f32 %v1322_v16, %v871_v15 }
 0x15b   : > { %1355 = vst [vmem:[#allocation2 + $0x20] sm:$0xff] %v1339_v17 }
 0x15c   : > { %v1735_v19 = vpop.f32.mrf.mxu2  ;;  %v1639_v24 = vpop.f32.mrf.mxu0 }
 0x15d   : > { %v1784_v20 = vpop.f32.mrf.mxu3  ;;  %v1736_v23 = vadd.f32 %v1735_v19, %v1687_v51  ;;  %v1688_v25 = vpop.f32.mrf.mxu1 }
 0x15e   : > { %v1689_v36 = vadd.f32 %v1688_v25, %v1639_v24  ;;  %v1363_v25 = vld [vmem:[#allocation2 + $0x78] sm:$0xff] }
 0x15f   : > { %v1785_v28 = vadd.f32 %v1784_v20, %v1736_v23 }
 0x161   : > { %v1824_v29 = vadd.f32 %v1785_v28, %v1356_v27 }
 0x163   : > { %1840 = vst [vmem:[#allocation2] sm:$0xff] %v1824_v29 }
 0x164   : > { %v1737_v4 = vpop.f32.mrf.mxu2  ;;  %v1642_v5 = vpop.f32.mrf.mxu0 }
 0x165   : > { %v1786_v33 = vpop.f32.mrf.mxu3  ;;  %v1738_v34 = vadd.f32 %v1737_v4, %v1689_v36  ;;  %v1691_v37 = vpop.f32.mrf.mxu1 }
 0x166   : > { %v1692_v43 = vadd.f32 %v1691_v37, %v1642_v5  ;;  %v1364_v37 = vld [vmem:[#allocation2 + $0x58] sm:$0xff] }
 0x167   : > { %v1787_v41 = vadd.f32 %v1786_v33, %v1738_v34 }
 0x169   : > { %v1825_v42 = vadd.f32 %v1787_v41, %v1357_v40 }
 0x16b   : > { %1841 = vst [vmem:[#allocation2 + $0x18] sm:$0xff] %v1825_v42 }
 0x16c   : > { %v1740_v46 = vpop.f32.mrf.mxu2  ;;  %v1644_v39 = vpop.f32.mrf.mxu0 }
 0x16d   : > { %v1789_v47 = vpop.f32.mrf.mxu3  ;;  %v1741_v18 = vadd.f32 %v1740_v46, %v1692_v43  ;;  %v1693_v50 = vpop.f32.mrf.mxu1 }
 0x16e   : > { %v1694_v30 = vadd.f32 %v1693_v50, %v1644_v39  ;;  %v1365_v50 = vld [vmem:[#allocation2 + $0xc8] sm:$0xff] }
 0x16f   : > { %v1790_v53 = vadd.f32 %v1789_v47, %v1741_v18 }
 0x171   : > { %v1826_v54 = vadd.f32 %v1790_v53, %v1358_v52 }
 0x173   : > { %1842 = vst [vmem:[#allocation2 + $0x68] sm:$0xff] %v1826_v54 }
 0x174   : > { %v1742_v55 = vpop.f32.mrf.mxu2  ;;  %v1647_v56 = vpop.f32.mrf.mxu0 }
 0x175   : > { %v1791_v44 = vpop.f32.mrf.mxu3  ;;  %v1743_v45 = vadd.f32 %v1742_v55, %v1694_v30  ;;  %v1696_v12 = vpop.f32.mrf.mxu1 }
 0x176   : > { %v1697_v60 = vadd.f32 %v1696_v12, %v1647_v56  ;;  %v1366_v12 = vld [vmem:[#allocation2 + $0x90] sm:$0xff] }
 0x177   : > { %v1792_v31 = vadd.f32 %v1791_v44, %v1743_v45 }
 0x179   : > { %v1827_v57 = vadd.f32 %v1792_v31, %v1359_v13 }
 0x17b   : > { %1843 = vst [vmem:[#allocation2 + $0x48] sm:$0xff] %v1827_v57 }
 0x17c   : > { %v1745_v61 = vpop.f32.mrf.mxu2  ;;  %v1649_v63 = vpop.f32.mrf.mxu0 }
 0x17d   : > { %v1794_v26 = vpop.f32.mrf.mxu3  ;;  %v1746_v62 = vadd.f32 %v1745_v61, %v1697_v60  ;;  %v1698_v32 = vpop.f32.mrf.mxu1 }
 0x17e   : > { %v1699_v35 = vadd.f32 %v1698_v32, %v1649_v63  ;;  %v1367_v32 = vld [vmem:[#allocation2 + $0xc0] sm:$0xff] }
 0x17f   : > { %v1795_v1 = vadd.f32 %v1794_v26, %v1746_v62 }
 0x181   : > { %v1828_v2 = vadd.f32 %v1795_v1, %v1360_v0 }
 0x183   : > { %1844 = vst [vmem:[#allocation2 + $0x88] sm:$0xff] %v1828_v2 }
 0x184   : > { %v1747_v3 = vpop.f32.mrf.mxu2  ;;  %v1652_v38 = vpop.f32.mrf.mxu0 }
 0x185   : > { %v1796_v48 = vpop.f32.mrf.mxu3  ;;  %v1748_v49 = vadd.f32 %v1747_v3, %v1699_v35  ;;  %v1701_v6 = vpop.f32.mrf.mxu1 }
 0x186   : > { %v1702_v59 = vadd.f32 %v1701_v6, %v1652_v38  ;;  %v1368_v6 = vld [vmem:[#allocation2 + $0xd0] sm:$0xff] }
 0x187   : > { %v1797_v8 = vadd.f32 %v1796_v48, %v1748_v49 }
 0x189   : > { %v1829_v58 = vadd.f32 %v1797_v8, %v1361_v7 }
 0x18b   : > { %1845 = vst [vmem:[#allocation2 + $0xb8] sm:$0xff] %v1829_v58 }
 0x18c   : > { %v1750_v9 = vpop.f32.mrf.mxu2  ;;  %v1654_v10 = vpop.f32.mrf.mxu0 }
 0x18d   : > { %v1799_v21 = vpop.f32.mrf.mxu3  ;;  %v1751_v22 = vadd.f32 %v1750_v9, %v1702_v59  ;;  %v1703_v11 = vpop.f32.mrf.mxu1 }
 0x18e   : > { %v1704_v17 = vadd.f32 %v1703_v11, %v1654_v10 }
 0x18f   : > { %v1800_v15 = vadd.f32 %v1799_v21, %v1751_v22  ;;  %v1369_v22 = vld [vmem:[#allocation2 + $0x28] sm:$0xff] }
 0x191   : > { %v1830_v16 = vadd.f32 %v1800_v15, %v1362_v14 }
 0x193   : > { %1846 = vst [vmem:[#allocation2 + $0xf0] sm:$0xff] %v1830_v16 }
 0x194   : > { %v1752_v51 = vpop.f32.mrf.mxu2  ;;  %v1657_v23 = vpop.f32.mrf.mxu0 }
 0x195   : > { %v1801_v19 = vpop.f32.mrf.mxu3  ;;  %v1753_v20 = vadd.f32 %v1752_v51, %v1704_v17  ;;  %v1706_v24 = vpop.f32.mrf.mxu1 }
 0x196   : > { %v1707_v29 = vadd.f32 %v1706_v24, %v1657_v23 }
 0x197   : > { %v1802_v27 = vadd.f32 %v1801_v19, %v1753_v20  ;;  %v1370_v20 = vld [vmem:[#allocation2 + $0xf8] sm:$0xff] }
 0x199   : > { %v1831_v28 = vadd.f32 %v1802_v27, %v1363_v25 }
 0x19b   : > { %1847 = vst [vmem:[#allocation2 + $0x78] sm:$0xff] %v1831_v28 }
 0x19c   : > { %v1755_v36 = vpop.f32.mrf.mxu2  ;;  %v1659_v34 = vpop.f32.mrf.mxu0 }
 0x19d   : > { %v1804_v4 = vpop.f32.mrf.mxu3  ;;  %v1756_v33 = vadd.f32 %v1755_v36, %v1707_v29  ;;  %v1708_v5 = vpop.f32.mrf.mxu1 }
 0x19e   : > { %v1709_v42 = vadd.f32 %v1708_v5, %v1659_v34 }
 0x19f   : > { %v1805_v40 = vadd.f32 %v1804_v4, %v1756_v33  ;;  %v1371_v4 = vld [vmem:[#allocation2 + $0x98] sm:$0xff] }
 0x1a1   : > { %v1832_v41 = vadd.f32 %v1805_v40, %v1364_v37 }
 0x1a3   : > { %1848 = vst [vmem:[#allocation2 + $0x58] sm:$0xff] %v1832_v41 }
 0x1a4   : > { %v1757_v43 = vpop.f32.mrf.mxu2  ;;  %v1662_v18 = vpop.f32.mrf.mxu0 }
 0x1a5   : > { %v1806_v46 = vpop.f32.mrf.mxu3  ;;  %v1758_v47 = vadd.f32 %v1757_v43, %v1709_v42  ;;  %v1711_v39 = vpop.f32.mrf.mxu1 }
 0x1a6   : > { %v1712_v54 = vadd.f32 %v1711_v39, %v1662_v18 }
 0x1a7   : > { %v1807_v52 = vadd.f32 %v1806_v46, %v1758_v47 }
 0x1a9   : > { %v1833_v53 = vadd.f32 %v1807_v52, %v1365_v50 }
 0x1ab   : > { %1849 = vst [vmem:[#allocation2 + $0xc8] sm:$0xff] %v1833_v53 }
 0x1ac   : > { %v1760_v30 = vpop.f32.mrf.mxu2  ;;  %v1664_v45 = vpop.f32.mrf.mxu0 }
 0x1ad   : > { %v1809_v55 = vpop.f32.mrf.mxu3  ;;  %v1761_v44 = vadd.f32 %v1760_v30, %v1712_v54  ;;  %v1713_v56 = vpop.f32.mrf.mxu1 }
 0x1ae   : > { %v1714_v57 = vadd.f32 %v1713_v56, %v1664_v45 }
 0x1af   : > { %v1810_v13 = vadd.f32 %v1809_v55, %v1761_v44 }
 0x1b1   : > { %v1834_v31 = vadd.f32 %v1810_v13, %v1366_v12 }
 0x1b3   : > { %1850 = vst [vmem:[#allocation2 + $0x90] sm:$0xff] %v1834_v31 }
 0x1b4   : > { %v1762_v60 = vpop.f32.mrf.mxu2  ;;  %v1667_v62 = vpop.f32.mrf.mxu0 }
 0x1b5   : > { %v1811_v61 = vpop.f32.mrf.mxu3  ;;  %v1763_v26 = vadd.f32 %v1762_v60, %v1714_v57  ;;  %v1716_v63 = vpop.f32.mrf.mxu1 }
 0x1b6   : > { %v1717_v2 = vadd.f32 %v1716_v63, %v1667_v62 }
 0x1b7   : > { %v1812_v0 = vadd.f32 %v1811_v61, %v1763_v26 }
 0x1b9   : > { %v1835_v1 = vadd.f32 %v1812_v0, %v1367_v32 }
 0x1bb   : > { %1851 = vst [vmem:[#allocation2 + $0xc0] sm:$0xff] %v1835_v1 }
 0x1bc   : > { %v1765_v35 = vpop.f32.mrf.mxu2  ;;  %v1669_v49 = vpop.f32.mrf.mxu0 }
 0x1bd   : > { %v1814_v3 = vpop.f32.mrf.mxu3  ;;  %v1766_v48 = vadd.f32 %v1765_v35, %v1717_v2  ;;  %v1718_v38 = vpop.f32.mrf.mxu1 }
 0x1be   : > { %v1719_v58 = vadd.f32 %v1718_v38, %v1669_v49 }
 0x1bf   : > { %v1815_v7 = vadd.f32 %v1814_v3, %v1766_v48 }
 0x1c1   : > { %v1836_v8 = vadd.f32 %v1815_v7, %v1368_v6 }
 0x1c3   : > { %1852 = vst [vmem:[#allocation2 + $0xd0] sm:$0xff] %v1836_v8 }
 0x1c4   : > { %v1767_v59 = vpop.f32.mrf.mxu2  ;;  %v1672_v10 = vpop.f32.mrf.mxu0 }
 0x1c5   : > { %v1816_v9 = vpop.f32.mrf.mxu3  ;;  %v1768_v21 = vadd.f32 %v1767_v59, %v1719_v58  ;;  %v1721_v11 = vpop.f32.mrf.mxu1 }
 0x1c6   : > { %v1722_v16 = vadd.f32 %v1721_v11, %v1672_v10 }
 0x1c7   : > { %v1817_v14 = vadd.f32 %v1816_v9, %v1768_v21 }
 0x1c9   : > { %v1837_v15 = vadd.f32 %v1817_v14, %v1369_v22 }
 0x1cb   : > { %1853 = vst [vmem:[#allocation2 + $0x28] sm:$0xff] %v1837_v15 }
 0x1cc   : > { %v1770_v17 = vpop.f32.mrf.mxu2  ;;  %v1674_v24 = vpop.f32.mrf.mxu0 }
 0x1cd   : > { %v1819_v51 = vpop.f32.mrf.mxu3  ;;  %v1771_v19 = vadd.f32 %v1770_v17, %v1722_v16  ;;  %v1723_v25 = vpop.f32.mrf.mxu1 }
 0x1ce   : > { %v1724_v28 = vadd.f32 %v1723_v25, %v1674_v24 }
 0x1cf   : > { %v1820_v23 = vadd.f32 %v1819_v51, %v1771_v19 }
 0x1d1   : > { %v1838_v27 = vadd.f32 %v1820_v23, %v1370_v20 }
 0x1d3   : > { %1854 = vst [vmem:[#allocation2 + $0xf8] sm:$0xff] %v1838_v27 }
 0x1d4   : > { %v1772_v29 = vpop.f32.mrf.mxu2 }
 0x1d5   : > { %v1773_v36 = vadd.f32 %v1772_v29, %v1724_v28  ;;  %v1821_v33 = vpop.f32.mrf.mxu3 }
 0x1d7   : > { %v1822_v34 = vadd.f32 %v1821_v33, %v1773_v36  ;;  %1859 = sbr.rel (%p2779_p9) target bundleno = 701 (0x2bd), region = 52 }
 0x1d9   : > { %v1839_v5 = vadd.f32 %v1822_v34, %v1371_v4 }
 0x1db   : > { %1855 = vst [vmem:[#allocation2 + $0x98] sm:$0xff] %v1839_v5 }
 0x1dc   : > { %v2917_v37 = vld [vmem:[%s3715_s4 + $0x38] sm:$0xff]  ;;  %v2916_v41 = vld [vmem:[%s3715_s4 + $0x30] sm:$0xff]  ;;  %v2915_v43 = vld [vmem:[%s3715_s4 + $0x28] sm:$0xff] }
 0x1dd   : > { %v2925_v40 = vld [vmem:[%s3715_s4 + $0x78] sm:$0xff]  ;;  %2040 = vmatpush.bf16.msra.mxu0 %v2917_v37  ;;  %2926 = vmatpush.bf16.msra.mxu2 %v2917_v37  ;;  %v2924_v42 = vld [vmem:[%s3715_s4 + $0x70] sm:$0xff]  ;;  %v2923_v46 = vld [vmem:[%s3715_s4 + $0x68] sm:$0xff] }
 0x1de   : > { %2089 = vmatpush.bf16.msra.mxu1 %v2925_v40  ;;  %2934 = vmatpush.bf16.msra.mxu3 %v2925_v40  ;;  %v2914_v47 = vld [vmem:[%s3715_s4 + $0x20] sm:$0xff]  ;;  %v2913_v39 = vld [vmem:[%s3715_s4 + $0x18] sm:$0xff]  ;;  %v2912_v52 = vld [vmem:[%s3715_s4 + $0x10] sm:$0xff] }
 0x1df   : > { %v2922_v18 = vld [vmem:[%s3715_s4 + $0x60] sm:$0xff]  ;;  %v2921_v50 = vld [vmem:[%s3715_s4 + $0x58] sm:$0xff]  ;;  %v2920_v53 = vld [vmem:[%s3715_s4 + $0x50] sm:$0xff] }
 0x1e0   : > { %v2911_v54 = vld [vmem:[%s3715_s4 + $0x8] sm:$0xff]  ;;  %v2910_v55 = vld [vmem:[%s3715_s4] sm:$0xff]  ;;  %v1860_v45 = vld [vmem:[#allocation2 + $0xb0] sm:$0xff] }
 0x1e1   : > { %2041 = vmatpush.bf16.msra.mxu0 %v2916_v41  ;;  %2927 = vmatpush.bf16.msra.mxu2 %v2916_v41  ;;  %v2919_v30 = vld [vmem:[%s3715_s4 + $0x48] sm:$0xff]  ;;  %v2918_v44 = vld [vmem:[%s3715_s4 + $0x40] sm:$0xff]  ;;  %v1862_v56 = vld [vmem:[#allocation2 + $0xd8] sm:$0xff] }
 0x1e2   : > { %2090 = vmatpush.bf16.msra.mxu1 %v2924_v42  ;;  %2935 = vmatpush.bf16.msra.mxu3 %v2924_v42  ;;  %v1876_v12 = vld [vmem:[#allocation2 + $0x38] sm:$0xff]  ;;  %v1878_v13 = vld [vmem:[#allocation2 + $0x40] sm:$0xff]  ;;  %v1879_v61 = vld [vmem:[#allocation2 + $0xc8] sm:$0xff]  ;;  %v1892_v26 = vpack.c.bf16 %v1862_v56, %v1860_v45 }
 0x1e3   : > { %v1861_v31 = vld [vmem:[#allocation2] sm:$0xff]  ;;  %v1863_v57 = vld [vmem:[#allocation2 + $0x18] sm:$0xff]  ;;  %v1900_v62 = vpack.c.bf16 %v1878_v13, %v1876_v12  ;;  %v1864_v0 = vld [vmem:[#allocation2 + $0x50] sm:$0xff] }
 0x1e4   : > { %v1877_v60 = vld [vmem:[#allocation2 + $0x58] sm:$0xff]  ;;  %v1893_v63 = vpack.c.bf16 %v1863_v57, %v1861_v31  ;;  %v1866_v1 = vld [vmem:[#allocation2 + $0x30] sm:$0xff]  ;;  %v1880_v2 = vld [vmem:[#allocation2 + $0xe0] sm:$0xff] }
 0x1e5   : > { %2042 = vmatpush.bf16.msra.mxu0 %v2915_v43  ;;  %2928 = vmatpush.bf16.msra.mxu2 %v2915_v43  ;;  %v1901_v32 = vpack.c.bf16 %v1879_v61, %v1877_v60  ;;  %v1882_v35 = vld [vmem:[#allocation2 + $0x70] sm:$0xff]  ;;  %v1865_v3 = vld [vmem:[#allocation2 + $0x68] sm:$0xff]  ;;  %v1883_v38 = vld [vmem:[#allocation2 + $0xc0] sm:$0xff]  ;;  %v1894_v6 = vpack.c.bf16 %v1866_v1, %v1864_v0 }
 0x1e6   : > { %2091 = vmatpush.bf16.msra.mxu1 %v2923_v46  ;;  %2936 = vmatpush.bf16.msra.mxu3 %v2923_v46  ;;  %v1867_v48 = vld [vmem:[#allocation2 + $0x48] sm:$0xff]  ;;  %v1881_v49 = vld [vmem:[#allocation2 + $0x90] sm:$0xff]  ;;  %v1902_v7 = vpack.c.bf16 %v1882_v35, %v1880_v2  ;;  %v1868_v59 = vld [vmem:[#allocation2 + $0x80] sm:$0xff] }
 0x1e7   : > { %v1895_v8 = vpack.c.bf16 %v1867_v48, %v1865_v3  ;;  %v1903_v58 = vpack.c.bf16 %v1883_v38, %v1881_v49  ;;  %v1870_v9 = vld [vmem:[#allocation2 + $0xe8] sm:$0xff]  ;;  %v1886_v22 = vld [vmem:[#allocation2 + $0x10] sm:$0xff]  ;;  %v1871_v11 = vld [vmem:[#allocation2 + $0xb8] sm:$0xff] }
 0x1e8   : > { %v1884_v21 = vld [vmem:[#allocation2 + $0xa8] sm:$0xff]  ;;  %v1885_v14 = vld [vmem:[#allocation2 + $0xd0] sm:$0xff]  ;;  %v1896_v16 = vpack.c.bf16 %v1870_v9, %v1868_v59  ;;  %v1872_v20 = vld [vmem:[#allocation2 + $0x60] sm:$0xff] }
 0x1e9   : > { %2043 = vmatpush.bf16.msra.mxu0 %v2914_v47  ;;  %2929 = vmatpush.bf16.msra.mxu2 %v2914_v47  ;;  %v1869_v10 = vld [vmem:[#allocation2 + $0x88] sm:$0xff]  ;;  %v1904_v17 = vpack.c.bf16 %v1886_v22, %v1884_v21  ;;  %v1888_v24 = vld [vmem:[#allocation2 + $0xa0] sm:$0xff]  ;;  %v1873_v27 = vld [vmem:[#allocation2 + $0xf0] sm:$0xff] }
 0x1ea   : > { %2092 = vmatpush.bf16.msra.mxu1 %v2922_v18  ;;  %2937 = vmatpush.bf16.msra.mxu3 %v2922_v18  ;;  %v1887_v15 = vld [vmem:[#allocation2 + $0x28] sm:$0xff]  ;;  %v1897_v51 = vpack.c.bf16 %v1871_v11, %v1869_v10  ;;  %v1890_v25 = vld [vmem:[#allocation2 + $0x20] sm:$0xff]  ;;  %v1875_v28 = vld [vmem:[#allocation2 + $0x78] sm:$0xff] }
 0x1eb   : > { %v1905_v19 = vpack.c.bf16 %v1887_v15, %v1885_v14  ;;  %v1874_v23 = vld [vmem:[#allocation2 + $0x8] sm:$0xff]  ;;  %v1889_v29 = vld [vmem:[#allocation2 + $0xf8] sm:$0xff]  ;;  %v1906_v33 = vpack.c.bf16 %v1890_v25, %v1888_v24  ;;  %v1899_v34 = vpack.c.bf16 %v1875_v28, %v1873_v27  ;;  %v3662_v37 = vld [vmem:[%s3716_s5] ss:$0 sm:$0xff] }
 0x1ec   : > { %v1891_v36 = vld [vmem:[#allocation2 + $0x98] sm:$0xff]  ;;  %v1898_v4 = vpack.c.bf16 %v1874_v23, %v1872_v20 }
 0x1ed   : > { %2044 = vmatpush.bf16.msra.mxu0 %v2913_v39  ;;  %2930 = vmatpush.bf16.msra.mxu2 %v2913_v39  ;;  %v1907_v5 = vpack.c.bf16 %v1891_v36, %v1889_v29 }
 0x1ee   : > { %2093 = vmatpush.bf16.msra.mxu1 %v2921_v50  ;;  %2938 = vmatpush.bf16.msra.mxu3 %v2921_v50 }
 0x1f1   : > { %2045 = vmatpush.bf16.msra.mxu0 %v2912_v52  ;;  %2931 = vmatpush.bf16.msra.mxu2 %v2912_v52 }
 0x1f2   : > { %2094 = vmatpush.bf16.msra.mxu1 %v2920_v53  ;;  %2939 = vmatpush.bf16.msra.mxu3 %v2920_v53 }
 0x1f5   : > { %2046 = vmatpush.bf16.msra.mxu0 %v2911_v54  ;;  %2932 = vmatpush.bf16.msra.mxu2 %v2911_v54 }
 0x1f6   : > { %2095 = vmatpush.bf16.msra.mxu1 %v2919_v30  ;;  %2940 = vmatpush.bf16.msra.mxu3 %v2919_v30 }
 0x1f9   : > { %2047 = vmatpush.bf16.msra.mxu0 %v2910_v55  ;;  %2933 = vmatpush.bf16.msra.mxu2 %v2910_v55 }
 0x1fa   : > { %2096 = vmatpush.bf16.msra.mxu1 %v2918_v44  ;;  %2941 = vmatpush.bf16.msra.mxu3 %v2918_v44 }
 0x1fc   : > { %2048 = vmatmul.bf16.vlgmr.msra.gmra.mxu0 %v1892_v26  ;;  %2068 = vmatmul.bf16.vlgmr.msra.gmra.mxu2 %v1900_v62 }
 0x1fd   : > { %2097 = vmatmul.bf16.vlgmr.msra.gmra.mxu1 %v1893_v63  ;;  %2117 = vmatmul.bf16.vlgmr.msra.gmra.mxu3 %v1901_v32 }
 0x20c   : > { %2053 = vmatmul.bf16.gmra.mxu0 %v1894_v6  ;;  %2073 = vmatmul.bf16.gmra.mxu2 %v1902_v7 }
 0x20d   : > { %2102 = vmatmul.bf16.gmra.mxu1 %v1895_v8  ;;  %2122 = vmatmul.bf16.gmra.mxu3 %v1903_v58 }
 0x21c   : > { %2058 = vmatmul.bf16.gmra.mxu0 %v1896_v16  ;;  %2078 = vmatmul.bf16.gmra.mxu2 %v1904_v17 }
 0x21d   : > { %2107 = vmatmul.bf16.gmra.mxu1 %v1897_v51  ;;  %2127 = vmatmul.bf16.gmra.mxu3 %v1905_v19 }
 0x22c   : > { %2063 = vmatmul.bf16.gmra.mxu0 %v1898_v4  ;;  %2083 = vmatmul.bf16.gmra.mxu2 %v1906_v33 }
 0x22d   : > { %2112 = vmatmul.bf16.gmra.mxu1 %v1899_v34  ;;  %2132 = vmatmul.bf16.gmra.mxu3 %v1907_v5 }
 0x279   : > { %v2049_v40 = vpop.f32.mrf.mxu0 }
 0x27a   : > { %v2050_v41 = vadd.f32 %v3662_v37, %v2049_v40  ;;  %v2098_v42 = vpop.f32.mrf.mxu1 }
 0x27c   : > { %v2099_v43 = vadd.f32 %v2098_v42, %v2050_v41 }
 0x27e   : > { %2138 = vst [vmem:[%s3122_s9] sm:$0xff] %v2099_v43 }
 0x27f   : > { %v2069_v46 = vpop.f32.mrf.mxu2 }
 0x280   : > { %v2070_v47 = vadd.f32 %v3662_v37, %v2069_v46  ;;  %v2118_v18 = vpop.f32.mrf.mxu3 }
 0x281   : > { %v2051_v39 = vpop.f32.mrf.mxu0 }
 0x282   : > { %v2119_v50 = vadd.f32 %v2118_v18, %v2070_v47  ;;  %v2052_v52 = vadd.f32 %v3662_v37, %v2051_v39  ;;  %v2100_v53 = vpop.f32.mrf.mxu1 }
 0x284   : > { %2146 = vst [vmem:[%s3122_s9 + $0x40] sm:$0xff] %v2119_v50  ;;  %v2101_v54 = vadd.f32 %v2100_v53, %v2052_v52 }
 0x286   : > { %2139 = vst [vmem:[%s3122_s9 + $0x8] sm:$0xff] %v2101_v54 }
 0x287   : > { %v2071_v30 = vpop.f32.mrf.mxu2 }
 0x288   : > { %v2072_v55 = vadd.f32 %v3662_v37, %v2071_v30  ;;  %v2120_v44 = vpop.f32.mrf.mxu3 }
 0x289   : > { %v2054_v45 = vpop.f32.mrf.mxu0 }
 0x28a   : > { %v2121_v56 = vadd.f32 %v2120_v44, %v2072_v55  ;;  %v2055_v12 = vadd.f32 %v3662_v37, %v2054_v45  ;;  %v2103_v13 = vpop.f32.mrf.mxu1 }
 0x28c   : > { %2147 = vst [vmem:[%s3122_s9 + $0x48] sm:$0xff] %v2121_v56  ;;  %v2104_v31 = vadd.f32 %v2103_v13, %v2055_v12 }
 0x28e   : > { %2140 = vst [vmem:[%s3122_s9 + $0x10] sm:$0xff] %v2104_v31 }
 0x28f   : > { %v2074_v57 = vpop.f32.mrf.mxu2 }
 0x290   : > { %v2075_v60 = vadd.f32 %v3662_v37, %v2074_v57  ;;  %v2123_v61 = vpop.f32.mrf.mxu3 }
 0x291   : > { %v2056_v26 = vpop.f32.mrf.mxu0 }
 0x292   : > { %v2124_v62 = vadd.f32 %v2123_v61, %v2075_v60  ;;  %v2057_v63 = vadd.f32 %v3662_v37, %v2056_v26  ;;  %v2105_v32 = vpop.f32.mrf.mxu1 }
 0x294   : > { %2148 = vst [vmem:[%s3122_s9 + $0x50] sm:$0xff] %v2124_v62  ;;  %v2106_v0 = vadd.f32 %v2105_v32, %v2057_v63 }
 0x296   : > { %2141 = vst [vmem:[%s3122_s9 + $0x18] sm:$0xff] %v2106_v0 }
 0x297   : > { %v2076_v1 = vpop.f32.mrf.mxu2 }
 0x298   : > { %v2077_v2 = vadd.f32 %v3662_v37, %v2076_v1  ;;  %v2125_v35 = vpop.f32.mrf.mxu3 }
 0x299   : > { %v2059_v3 = vpop.f32.mrf.mxu0 }
 0x29a   : > { %v2126_v48 = vadd.f32 %v2125_v35, %v2077_v2  ;;  %v2060_v49 = vadd.f32 %v3662_v37, %v2059_v3  ;;  %v2108_v38 = vpop.f32.mrf.mxu1 }
 0x29c   : > { %2149 = vst [vmem:[%s3122_s9 + $0x58] sm:$0xff] %v2126_v48  ;;  %v2109_v6 = vadd.f32 %v2108_v38, %v2060_v49 }
 0x29e   : > { %2142 = vst [vmem:[%s3122_s9 + $0x20] sm:$0xff] %v2109_v6 }
 0x29f   : > { %v2079_v7 = vpop.f32.mrf.mxu2 }
 0x2a0   : > { %v2080_v8 = vadd.f32 %v3662_v37, %v2079_v7  ;;  %v2128_v58 = vpop.f32.mrf.mxu3 }
 0x2a1   : > { %v2061_v59 = vpop.f32.mrf.mxu0 }
 0x2a2   : > { %v2129_v9 = vadd.f32 %v2128_v58, %v2080_v8  ;;  %v2062_v21 = vadd.f32 %v3662_v37, %v2061_v59  ;;  %v2110_v22 = vpop.f32.mrf.mxu1 }
 0x2a4   : > { %2150 = vst [vmem:[%s3122_s9 + $0x60] sm:$0xff] %v2129_v9  ;;  %v2111_v10 = vadd.f32 %v2110_v22, %v2062_v21 }
 0x2a6   : > { %2143 = vst [vmem:[%s3122_s9 + $0x28] sm:$0xff] %v2111_v10 }
 0x2a7   : > { %v2081_v11 = vpop.f32.mrf.mxu2 }
 0x2a8   : > { %v2082_v14 = vadd.f32 %v3662_v37, %v2081_v11  ;;  %v2130_v15 = vpop.f32.mrf.mxu3 }
 0x2a9   : > { %v2064_v16 = vpop.f32.mrf.mxu0 }
 0x2aa   : > { %v2131_v17 = vadd.f32 %v2130_v15, %v2082_v14  ;;  %v2065_v51 = vadd.f32 %v3662_v37, %v2064_v16  ;;  %v2113_v19 = vpop.f32.mrf.mxu1 }
 0x2ac   : > { %2151 = vst [vmem:[%s3122_s9 + $0x68] sm:$0xff] %v2131_v17  ;;  %v2114_v20 = vadd.f32 %v2113_v19, %v2065_v51 }
 0x2ae   : > { %2144 = vst [vmem:[%s3122_s9 + $0x30] sm:$0xff] %v2114_v20 }
 0x2af   : > { %v2084_v23 = vpop.f32.mrf.mxu2 }
 0x2b0   : > { %v2085_v24 = vadd.f32 %v3662_v37, %v2084_v23  ;;  %v2133_v25 = vpop.f32.mrf.mxu3 }
 0x2b1   : > { %v2066_v27 = vpop.f32.mrf.mxu0 }
 0x2b2   : > { %v2134_v28 = vadd.f32 %v2133_v25, %v2085_v24  ;;  %v2067_v29 = vadd.f32 %v3662_v37, %v2066_v27  ;;  %v2115_v36 = vpop.f32.mrf.mxu1 }
 0x2b4   : > { %2152 = vst [vmem:[%s3122_s9 + $0x70] sm:$0xff] %v2134_v28  ;;  %v2116_v4 = vadd.f32 %v2115_v36, %v2067_v29 }
 0x2b6   : > { %2145 = vst [vmem:[%s3122_s9 + $0x38] sm:$0xff] %v2116_v4 }
 0x2b7   : > { %v2086_v33 = vpop.f32.mrf.mxu2 }
 0x2b8   : > { %v2087_v34 = vadd.f32 %v3662_v37, %v2086_v33  ;;  %v2135_v5 = vpop.f32.mrf.mxu3 }
 0x2ba   : > { %v2136_v40 = vadd.f32 %v2135_v5, %v2087_v34 }
 0x2bc   : > { %2153 = vst [vmem:[%s3122_s9 + $0x78] sm:$0xff] %v2136_v40 }
 0x2bd PF: > { %s16_s25 = sadd.s32 1, %s3023_s25   ;;  %s3721_s21 = smov %s3015_s23 }
 0x2be   : > { %p13_p10 = scmp.ge.s32.totalorder %s16_s25, 6   ;;  %s3722_s22 = smov %s3019_s24 }
 0x2bf   : > { %s3723_s23 = smov %s3726_s26  ;;  %s3724_s24 = smov %s3730_s27 }
 0x2c0   :  { %15 = sbr.rel (!%p13_p10) target bundleno = 3 (0x3), region = 91 }

</bundles_post_ra>
